<compile_context>
chip_gen: v5e
topology: v5e:2x2
jax: 0.10.0
libtpu: 0.0.40
codegen_flags: <defaults>
</compile_context>

<pallas_src>
import functools

import jax
import jax.numpy as jnp
from jax import lax
from jax.experimental import pallas as pl
from jax.experimental.pallas import tpu as pltpu

HP = 128                  # padded gate width: each gate (i|f|o|g) gets one 128-lane block
KP = 16                   # padded contraction width (>= input_size, hidden_size; multiple of 8)
_GATE_SRC = (0, 1, 3, 2)  # packed gate block -> PyTorch gate index (i, f, o, g)


# ----------------------------------------------------------------------------
# Single fused kernel: 3-layer LSTM (wavefront) + MLP head.
# ----------------------------------------------------------------------------
def _model_kernel(x_ref, wih_ref, whh_ref, b_ref,
                  w1_ref, b1_ref, g1_ref, be1_ref,
                  w2_ref, b2_ref, g2_ref, be2_ref,
                  w3_ref, b3_ref,
                  out_ref,
                  xg_ref,
                  *, T, BP):
    # x_ref:   (T*BP, KP)      padded time-major layer-0 input
    # wih_ref: (L, KP, 4*HP)   input->gate weights   (gate blocks i|f|o|g)
    # whh_ref: (L, KP, 4*HP)   hidden->gate weights  (gate blocks i|f|o|g)
    # b_ref:   (L, 1, 4*HP)    combined biases
    # xg_ref:  (T*BP, 4*HP)    VMEM scratch: layer-0 input-gate projection
    L = wih_ref.shape[0]
    B = out_ref.shape[0]
    G3 = 3 * HP
    eps = 1e-5

    # Layer-0 whole-sequence input projection with bias folded in: one MXU
    # pass, fully hoisted out of the recurrence.
    xg_ref[...] = jnp.dot(x_ref[...], wih_ref[0],
                          preferred_element_type=jnp.float32) + b_ref[0]

    # Hoist loop-invariant weight loads so every recurrent matmul reuses a
    # single SSA value as its RHS across all unrolled steps (lets Mosaic keep
    # it staged in the MXU); pre-broadcast the per-layer biases once.
    whh = [whh_ref[l][...] for l in range(L)]
    wih = [None] + [wih_ref[l][...] for l in range(1, L)]
    bias = [None] + [jnp.broadcast_to(b_ref[l][...], (BP, 4 * HP))
                     for l in range(1, L)]

    def cell(gates, c_prev):
        # Gates packed i|f|o|g -> one contiguous sigmoid stream + one tanh;
        # all slices at 128-lane boundaries (pure vreg views, no XLU cost).
        sig = jax.nn.sigmoid(gates[:, :G3])
        g = jnp.tanh(gates[:, G3:])
        i = sig[:, 0 * HP:1 * HP]
        f = sig[:, 1 * HP:2 * HP]
        o = sig[:, 2 * HP:3 * HP]
        c_new = f * c_prev + i * g
        h_new = o * jnp.tanh(c_new)
        return h_new, c_new

    h = [jnp.zeros((BP, HP), jnp.float32) for _ in range(L)]
    c = [jnp.zeros((BP, HP), jnp.float32) for _ in range(L)]

    # Layer/time wavefront: at step s run layer0[t=s], layer1[s-1], layer2[s-2]
    # concurrently -> up to L independent recurrences in flight per step,
    # giving the scheduler ILP across the otherwise strictly serial
    # matmul -> EUP -> VPU dependency chain.  T and L are small and static, so
    # the wavefront (T+L-1 = 10 steps, 24 cells) is fully unrolled; live state
    # is only 6 (BP,HP) vregs plus staged weights.
    # TODO(synk): if T grows, roll the steady-state wavefront steps into a
    # lax.fori_loop(..., unroll=2) to bound liveness and compile time.
    for s in range(T + L - 1):
        step_out = []
        for l in range(L):
            t = s - l
            if not (0 <= t < T):
                step_out.append(None)
                continue
            hk = h[l][:, :KP]                        # offset-0 lane slice, K = KP
            if l == 0:
                gates = xg_ref[pl.ds(t * BP, BP), :] + jnp.dot(
                    hk, whh[0], preferred_element_type=jnp.float32)
            else:
                gates = (bias[l]
                         + jnp.dot(h[l - 1][:, :KP], wih[l],
                                   preferred_element_type=jnp.float32)
                         + jnp.dot(hk, whh[l],
                                   preferred_element_type=jnp.float32))
            step_out.append(cell(gates, c[l]))
        for l in range(L):                            # rebind after all reads
            if step_out[l] is not None:
                h[l], c[l] = step_out[l]

    # ---- MLP head (real batch rows only; padded rows never mix in) ---------
    xh = h[L - 1][0:B, :KP]                           # (B, KP); padded lanes are 0

    def batchnorm(v, gamma, beta):
        mean = jnp.mean(v, axis=0, keepdims=True)
        var = jnp.mean(jnp.square(v - mean), axis=0, keepdims=True)
        return (v - mean) * lax.rsqrt(var + eps) * gamma + beta

    o1 = jnp.dot(xh, w1_ref[...], preferred_element_type=jnp.float32) + b1_ref[...]
    o1 = batchnorm(jnp.maximum(o1, 0.0), g1_ref[...], be1_ref[...])
    o2 = jnp.dot(o1, w2_ref[...], preferred_element_type=jnp.float32) + b2_ref[...]
    o2 = batchnorm(jnp.maximum(o2, 0.0), g2_ref[...], be2_ref[...])
    logits = jnp.dot(o2, w3_ref[...], preferred_element_type=jnp.float32) + b3_ref[...]

    # nn.Softmax() on the 2-D output -> dim=1; exact reciprocal keeps row sums tight.
    logits = logits - jnp.max(logits, axis=-1, keepdims=True)
    e = jnp.exp(logits)
    out_ref[...] = e / jnp.sum(e, axis=-1, keepdims=True)


# ----------------------------------------------------------------------------
# One-time parameter repacking: PyTorch layout -> padded, gate-major (i|f|o|g),
# K padded to KP=16 instead of 128 (8x less weight DMA, no dead MXU K rows).
# ----------------------------------------------------------------------------
def prepare_params(lstm_params, head_params, hidden_size):
    H = hidden_size
    G = 4 * HP
    assert H <= KP

    def pack_gates(w_t, n_rows):
        # w_t: (n_rows, 4H), torch gate order i|f|g|o -> (KP, 4*HP) in i|f|o|g.
        assert n_rows <= KP
        out = jnp.zeros((KP, G), jnp.float32)
        for blk, tg in enumerate(_GATE_SRC):
            out = out.at[:n_rows, blk * HP:blk * HP + H].set(
                w_t[:, tg * H:(tg + 1) * H])
        return out

    wih_all, whh_all, b_all = [], [], []
    for p in lstm_params:
        d_in = p["w_ih"].shape[1]
        wih_all.append(pack_gates(jnp.transpose(p["w_ih"]), d_in))
        whh_all.append(pack_gates(jnp.transpose(p["w_hh"]), H))
        bias = p["b_ih"] + p["b_hh"]                       # (4H,)
        b = jnp.zeros((1, G), jnp.float32)
        for blk, tg in enumerate(_GATE_SRC):
            b = b.at[0, blk * HP:blk * HP + H].set(bias[tg * H:(tg + 1) * H])
        b_all.append(b)

    w1 = jnp.zeros((KP, head_params["w1"].shape[0]), jnp.float32)
    w1 = w1.at[:H, :].set(jnp.transpose(head_params["w1"]))
    return dict(
        wih=jnp.stack(wih_all),                 # (L, KP, 4*HP)
        whh=jnp.stack(whh_all),                 # (L, KP, 4*HP)
        b=jnp.stack(b_all),                     # (L, 1, 4*HP)
        w1=w1,
        b1=head_params["b1"].reshape(1, -1),
        g1=head_params["g1"].reshape(1, -1),
        be1=head_params["be1"].reshape(1, -1),
        w2=jnp.transpose(head_params["w2"]),
        b2=head_params["b2"].reshape(1, -1),
        g2=head_params["g2"].reshape(1, -1),
        be2=head_params["be2"].reshape(1, -1),
        w3=jnp.transpose(head_params["w3"]),
        b3=head_params["b3"].reshape(1, -1),
    )


# ----------------------------------------------------------------------------
# Forward: layout prep (tiny XLA ops) + one fused pallas_call.
# ----------------------------------------------------------------------------
def lstm_model_forward(x, packed):
    """x: (B, T, input_size) batch_first float32. Returns (B, num_classes)."""
    B, T, D = x.shape
    assert D <= KP
    BP = ((B + 7) // 8) * 8                      # batch padded to sublane multiple
    num_classes = packed["w3"].shape[1]
    G = packed["wih"].shape[2]

    # batch_first -> time-major, pad batch to BP and features to KP, flatten to
    # (T*BP, KP) so every per-timestep block is a sublane-aligned tile.
    x_tm = jnp.transpose(x, (1, 0, 2)).astype(jnp.float32)       # (T, B, D)
    x_pad = jnp.zeros((T, BP, KP), jnp.float32).at[:, :B, :D].set(x_tm)
    x_flat = x_pad.reshape(T * BP, KP)

    vmem = pl.BlockSpec(memory_space=pltpu.MemorySpace.VMEM)
    kernel = functools.partial(_model_kernel, T=T, BP=BP)

    return pl.pallas_call(
        kernel,
        out_shape=jax.ShapeDtypeStruct((B, num_classes), jnp.float32),
        in_specs=[vmem] * 14,
        out_specs=vmem,
        scratch_shapes=[
            pltpu.VMEM((T * BP, G), jnp.float32),    # layer-0 input-gate projection
        ],
    )(x_flat, packed["wih"], packed["whh"], packed["b"],
      packed["w1"], packed["b1"], packed["g1"], packed["be1"],
      packed["w2"], packed["b2"], packed["g2"], packed["be2"],
      packed["w3"], packed["b3"])


# ----------------------------------------------------------------------------
# Parameter init (PyTorch-style shapes).
# ----------------------------------------------------------------------------
def init_params(key, input_size, hidden_size, num_layers, num_classes):
    ks = jax.random.split(key, 4 * num_layers + 10)
    ki = iter(range(len(ks)))
    scale = 1.0 / jnp.sqrt(jnp.float32(hidden_size))

    def unif(k, shape):
        return jax.random.uniform(k, shape, jnp.float32, -scale, scale)

    lstm_params = []
    for l in range(num_layers):
        d_in = input_size if l == 0 else hidden_size
        lstm_params.append(dict(
            w_ih=unif(ks[next(ki)], (4 * hidden_size, d_in)),
            w_hh=unif(ks[next(ki)], (4 * hidden_size, hidden_size)),
            b_ih=unif(ks[next(ki)], (4 * hidden_size,)),
            b_hh=unif(ks[next(ki)], (4 * hidden_size,)),
        ))

    head_params = dict(
        w1=unif(ks[next(ki)], (20, hidden_size)),
        b1=unif(ks[next(ki)], (20,)),
        g1=jnp.ones((20,), jnp.float32),
        be1=jnp.zeros((20,), jnp.float32),
        w2=unif(ks[next(ki)], (10, 20)),
        b2=unif(ks[next(ki)], (10,)),
        g2=jnp.ones((10,), jnp.float32),
        be2=jnp.zeros((10,), jnp.float32),
        w3=unif(ks[next(ki)], (num_classes, 10)),
        b3=unif(ks[next(ki)], (num_classes,)),
    )
    return lstm_params, head_params


if __name__ == "__main__":
    input_size = 4
    hidden_size = 10
    num_layers = 3
    num_classes = 3
    batch = 2
    seq_len = 8

    key = jax.random.PRNGKey(0)
    k_x, k_p = jax.random.split(key)
    x = jax.random.normal(k_x, (batch, seq_len, input_size), jnp.float32)
    lstm_params, head_params = init_params(
        k_p, input_size, hidden_size, num_layers, num_classes)

    packed = prepare_params(lstm_params, head_params, hidden_size)

    fwd = jax.jit(lstm_model_forward)
    out = jax.block_until_ready(fwd(x, packed))

    assert out.shape == (batch, num_classes)
    # softmax rows should sum to ~1
    assert bool(jnp.all(jnp.abs(jnp.sum(out, axis=-1) - 1.0) < 1e-4))
    print("KERNEL_OK")
</pallas_src>

<mosaic_0001>
module attributes {stable_mosaic.version = 11 : i64} {
  func.func @_model_kernel(%arg0: memref<64x16xf32, #tpu.memory_space<vmem>>, %arg1: memref<3x16x512xf32, #tpu.memory_space<vmem>>, %arg2: memref<3x16x512xf32, #tpu.memory_space<vmem>>, %arg3: memref<3x1x512xf32, #tpu.memory_space<vmem>>, %arg4: memref<16x20xf32, #tpu.memory_space<vmem>>, %arg5: memref<1x20xf32, #tpu.memory_space<vmem>>, %arg6: memref<1x20xf32, #tpu.memory_space<vmem>>, %arg7: memref<1x20xf32, #tpu.memory_space<vmem>>, %arg8: memref<20x10xf32, #tpu.memory_space<vmem>>, %arg9: memref<1x10xf32, #tpu.memory_space<vmem>>, %arg10: memref<1x10xf32, #tpu.memory_space<vmem>>, %arg11: memref<1x10xf32, #tpu.memory_space<vmem>>, %arg12: memref<10x3xf32, #tpu.memory_space<vmem>>, %arg13: memref<1x3xf32, #tpu.memory_space<vmem>>, %arg14: memref<2x3xf32, #tpu.memory_space<vmem>>, %arg15: memref<64x512xf32, #tpu.memory_space<vmem>>) attributes {dimension_semantics = [], scalar_prefetch = 0 : i64, scratch_operands = 1 : i64, tpu.core_type = #tpu.core_type<tc>} {
    %c0 = arith.constant 0 : index
    %c0_0 = arith.constant 0 : index
    %0 = vector.load %arg0[%c0, %c0_0] : memref<64x16xf32, #tpu.memory_space<vmem>>, vector<64x16xf32>
    %c0_1 = arith.constant 0 : index
    %c0_2 = arith.constant 0 : index
    %c0_3 = arith.constant 0 : index
    %1 = vector.load %arg1[%c0_1, %c0_2, %c0_3] : memref<3x16x512xf32, #tpu.memory_space<vmem>>, vector<1x16x512xf32>
    %2 = vector.shape_cast %1 : vector<1x16x512xf32> to vector<16x512xf32>
    %cst = arith.constant dense<0.000000e+00> : vector<64x512xf32>
    %3 = tpu.matmul %0, %2, %cst {dimension_numbers = #tpu.dot_dimension_numbers<[1], [0], [0], [1], [0, 0, 1, 1], [], []>} : vector<64x16xf32>, vector<16x512xf32>, vector<64x512xf32> -> vector<64x512xf32>
    %c0_4 = arith.constant 0 : index
    %c0_5 = arith.constant 0 : index
    %c0_6 = arith.constant 0 : index
    %4 = vector.load %arg3[%c0_4, %c0_5, %c0_6] : memref<3x1x512xf32, #tpu.memory_space<vmem>>, vector<1x1x512xf32>
    %5 = vector.shape_cast %4 : vector<1x1x512xf32> to vector<1x512xf32>
    %6 = vector.broadcast %5 : vector<1x512xf32> to vector<64x512xf32>
    %7 = arith.addf %3, %6 : vector<64x512xf32>
    %c0_7 = arith.constant 0 : index
    %c0_8 = arith.constant 0 : index
    %8 = vector.load %arg15[%c0_7, %c0_8] : memref<64x512xf32, #tpu.memory_space<vmem>>, vector<64x512xf32>
    tpu.vector_store %arg15[%c0_7, %c0_8], %7 {strides = array<i32>} : memref<64x512xf32, #tpu.memory_space<vmem>>, vector<64x512xf32>,
    %c0_9 = arith.constant 0 : index
    %c0_10 = arith.constant 0 : index
    %c0_11 = arith.constant 0 : index
    %9 = vector.load %arg2[%c0_9, %c0_10, %c0_11] : memref<3x16x512xf32, #tpu.memory_space<vmem>>, vector<1x16x512xf32>
    %10 = vector.shape_cast %9 : vector<1x16x512xf32> to vector<16x512xf32>
    %c1 = arith.constant 1 : index
    %c0_12 = arith.constant 0 : index
    %c0_13 = arith.constant 0 : index
    %11 = vector.load %arg2[%c1, %c0_12, %c0_13] : memref<3x16x512xf32, #tpu.memory_space<vmem>>, vector<1x16x512xf32>
    %12 = vector.shape_cast %11 : vector<1x16x512xf32> to vector<16x512xf32>
    %c2 = arith.constant 2 : index
    %c0_14 = arith.constant 0 : index
    %c0_15 = arith.constant 0 : index
    %13 = vector.load %arg2[%c2, %c0_14, %c0_15] : memref<3x16x512xf32, #tpu.memory_space<vmem>>, vector<1x16x512xf32>
    %14 = vector.shape_cast %13 : vector<1x16x512xf32> to vector<16x512xf32>
    %c1_16 = arith.constant 1 : index
    %c0_17 = arith.constant 0 : index
    %c0_18 = arith.constant 0 : index
    %15 = vector.load %arg1[%c1_16, %c0_17, %c0_18] : memref<3x16x512xf32, #tpu.memory_space<vmem>>, vector<1x16x512xf32>
    %16 = vector.shape_cast %15 : vector<1x16x512xf32> to vector<16x512xf32>
    %c2_19 = arith.constant 2 : index
    %c0_20 = arith.constant 0 : index
    %c0_21 = arith.constant 0 : index
    %17 = vector.load %arg1[%c2_19, %c0_20, %c0_21] : memref<3x16x512xf32, #tpu.memory_space<vmem>>, vector<1x16x512xf32>
    %18 = vector.shape_cast %17 : vector<1x16x512xf32> to vector<16x512xf32>
    %c1_22 = arith.constant 1 : index
    %c0_23 = arith.constant 0 : index
    %c0_24 = arith.constant 0 : index
    %19 = vector.load %arg3[%c1_22, %c0_23, %c0_24] : memref<3x1x512xf32, #tpu.memory_space<vmem>>, vector<1x1x512xf32>
    %20 = vector.shape_cast %19 : vector<1x1x512xf32> to vector<1x512xf32>
    %21 = vector.shape_cast %20 : vector<1x512xf32> to vector<1x512xf32>
    %22 = vector.broadcast %21 : vector<1x512xf32> to vector<8x512xf32>
    %c2_25 = arith.constant 2 : index
    %c0_26 = arith.constant 0 : index
    %c0_27 = arith.constant 0 : index
    %23 = vector.load %arg3[%c2_25, %c0_26, %c0_27] : memref<3x1x512xf32, #tpu.memory_space<vmem>>, vector<1x1x512xf32>
    %24 = vector.shape_cast %23 : vector<1x1x512xf32> to vector<1x512xf32>
    %25 = vector.shape_cast %24 : vector<1x512xf32> to vector<1x512xf32>
    %26 = vector.broadcast %25 : vector<1x512xf32> to vector<8x512xf32>
    %cst_28 = arith.constant 0.000000e+00 : f32
    %27 = vector.broadcast %cst_28 : f32 to vector<8x128xf32>
    %cst_29 = arith.constant 0.000000e+00 : f32
    %28 = vector.broadcast %cst_29 : f32 to vector<8x128xf32>
    %cst_30 = arith.constant 0.000000e+00 : f32
    %29 = vector.broadcast %cst_30 : f32 to vector<8x128xf32>
    %cst_31 = arith.constant 0.000000e+00 : f32
    %30 = vector.broadcast %cst_31 : f32 to vector<8x128xf32>
    %cst_32 = arith.constant 0.000000e+00 : f32
    %31 = vector.broadcast %cst_32 : f32 to vector<8x128xf32>
    %cst_33 = arith.constant 0.000000e+00 : f32
    %32 = vector.broadcast %cst_33 : f32 to vector<8x128xf32>
    %33 = vector.extract_strided_slice %27 {offsets = [0, 0], sizes = [8, 16], strides = [1, 1]} : vector<8x128xf32> to vector<8x16xf32>
    %c0_34 = arith.constant 0 : index
    %c0_35 = arith.constant 0 : index
    %34 = vector.load %arg15[%c0_34, %c0_35] : memref<64x512xf32, #tpu.memory_space<vmem>>, vector<8x512xf32>
    %cst_36 = arith.constant dense<0.000000e+00> : vector<8x512xf32>
    %35 = tpu.matmul %33, %10, %cst_36 {dimension_numbers = #tpu.dot_dimension_numbers<[1], [0], [0], [1], [0, 0, 1, 1], [], []>} : vector<8x16xf32>, vector<16x512xf32>, vector<8x512xf32> -> vector<8x512xf32>
    %36 = arith.addf %34, %35 : vector<8x512xf32>
    %37 = vector.extract_strided_slice %36 {offsets = [0, 0], sizes = [8, 384], strides = [1, 1]} : vector<8x512xf32> to vector<8x384xf32>
    %38 = arith.negf %37 : vector<8x384xf32>
    %39 = math.exp %38 : vector<8x384xf32>
    %cst_37 = arith.constant 1.000000e+00 : f32
    %40 = vector.broadcast %cst_37 : f32 to vector<8x384xf32>
    %41 = arith.addf %40, %39 : vector<8x384xf32>
    %42 = arith.divf %40, %41 : vector<8x384xf32>
    %43 = vector.extract_strided_slice %36 {offsets = [0, 384], sizes = [8, 128], strides = [1, 1]} : vector<8x512xf32> to vector<8x128xf32>
    %44 = math.tanh %43 : vector<8x128xf32>
    %45 = vector.extract_strided_slice %42 {offsets = [0, 0], sizes = [8, 128], strides = [1, 1]} : vector<8x384xf32> to vector<8x128xf32>
    %46 = vector.extract_strided_slice %42 {offsets = [0, 128], sizes = [8, 128], strides = [1, 1]} : vector<8x384xf32> to vector<8x128xf32>
    %47 = vector.extract_strided_slice %42 {offsets = [0, 256], sizes = [8, 128], strides = [1, 1]} : vector<8x384xf32> to vector<8x128xf32>
    %48 = arith.mulf %46, %30 : vector<8x128xf32>
    %49 = arith.mulf %45, %44 : vector<8x128xf32>
    %50 = arith.addf %48, %49 : vector<8x128xf32>
    %51 = math.tanh %50 : vector<8x128xf32>
    %52 = arith.mulf %47, %51 : vector<8x128xf32>
    %53 = vector.extract_strided_slice %52 {offsets = [0, 0], sizes = [8, 16], strides = [1, 1]} : vector<8x128xf32> to vector<8x16xf32>
    %c8 = arith.constant 8 : index
    %c0_38 = arith.constant 0 : index
    %54 = vector.load %arg15[%c8, %c0_38] : memref<64x512xf32, #tpu.memory_space<vmem>>, vector<8x512xf32>
    %cst_39 = arith.constant dense<0.000000e+00> : vector<8x512xf32>
    %55 = tpu.matmul %53, %10, %cst_39 {dimension_numbers = #tpu.dot_dimension_numbers<[1], [0], [0], [1], [0, 0, 1, 1], [], []>} : vector<8x16xf32>, vector<16x512xf32>, vector<8x512xf32> -> vector<8x512xf32>
    %56 = arith.addf %54, %55 : vector<8x512xf32>
    %57 = vector.extract_strided_slice %56 {offsets = [0, 0], sizes = [8, 384], strides = [1, 1]} : vector<8x512xf32> to vector<8x384xf32>
    %58 = arith.negf %57 : vector<8x384xf32>
    %59 = math.exp %58 : vector<8x384xf32>
    %cst_40 = arith.constant 1.000000e+00 : f32
    %60 = vector.broadcast %cst_40 : f32 to vector<8x384xf32>
    %61 = arith.addf %60, %59 : vector<8x384xf32>
    %62 = arith.divf %60, %61 : vector<8x384xf32>
    %63 = vector.extract_strided_slice %56 {offsets = [0, 384], sizes = [8, 128], strides = [1, 1]} : vector<8x512xf32> to vector<8x128xf32>
    %64 = math.tanh %63 : vector<8x128xf32>
    %65 = vector.extract_strided_slice %62 {offsets = [0, 0], sizes = [8, 128], strides = [1, 1]} : vector<8x384xf32> to vector<8x128xf32>
    %66 = vector.extract_strided_slice %62 {offsets = [0, 128], sizes = [8, 128], strides = [1, 1]} : vector<8x384xf32> to vector<8x128xf32>
    %67 = vector.extract_strided_slice %62 {offsets = [0, 256], sizes = [8, 128], strides = [1, 1]} : vector<8x384xf32> to vector<8x128xf32>
    %68 = arith.mulf %66, %50 : vector<8x128xf32>
    %69 = arith.mulf %65, %64 : vector<8x128xf32>
    %70 = arith.addf %68, %69 : vector<8x128xf32>
    %71 = math.tanh %70 : vector<8x128xf32>
    %72 = arith.mulf %67, %71 : vector<8x128xf32>
    %73 = vector.extract_strided_slice %28 {offsets = [0, 0], sizes = [8, 16], strides = [1, 1]} : vector<8x128xf32> to vector<8x16xf32>
    %74 = vector.extract_strided_slice %52 {offsets = [0, 0], sizes = [8, 16], strides = [1, 1]} : vector<8x128xf32> to vector<8x16xf32>
    %cst_41 = arith.constant dense<0.000000e+00> : vector<8x512xf32>
    %75 = tpu.matmul %74, %16, %cst_41 {dimension_numbers = #tpu.dot_dimension_numbers<[1], [0], [0], [1], [0, 0, 1, 1], [], []>} : vector<8x16xf32>, vector<16x512xf32>, vector<8x512xf32> -> vector<8x512xf32>
    %76 = arith.addf %22, %75 : vector<8x512xf32>
    %cst_42 = arith.constant dense<0.000000e+00> : vector<8x512xf32>
    %77 = tpu.matmul %73, %12, %cst_42 {dimension_numbers = #tpu.dot_dimension_numbers<[1], [0], [0], [1], [0, 0, 1, 1], [], []>} : vector<8x16xf32>, vector<16x512xf32>, vector<8x512xf32> -> vector<8x512xf32>
    %78 = arith.addf %76, %77 : vector<8x512xf32>
    %79 = vector.extract_strided_slice %78 {offsets = [0, 0], sizes = [8, 384], strides = [1, 1]} : vector<8x512xf32> to vector<8x384xf32>
    %80 = arith.negf %79 : vector<8x384xf32>
    %81 = math.exp %80 : vector<8x384xf32>
    %cst_43 = arith.constant 1.000000e+00 : f32
    %82 = vector.broadcast %cst_43 : f32 to vector<8x384xf32>
    %83 = arith.addf %82, %81 : vector<8x384xf32>
    %84 = arith.divf %82, %83 : vector<8x384xf32>
    %85 = vector.extract_strided_slice %78 {offsets = [0, 384], sizes = [8, 128], strides = [1, 1]} : vector<8x512xf32> to vector<8x128xf32>
    %86 = math.tanh %85 : vector<8x128xf32>
    %87 = vector.extract_strided_slice %84 {offsets = [0, 0], sizes = [8, 128], strides = [1, 1]} : vector<8x384xf32> to vector<8x128xf32>
    %88 = vector.extract_strided_slice %84 {offsets = [0, 128], sizes = [8, 128], strides = [1, 1]} : vector<8x384xf32> to vector<8x128xf32>
    %89 = vector.extract_strided_slice %84 {offsets = [0, 256], sizes = [8, 128], strides = [1, 1]} : vector<8x384xf32> to vector<8x128xf32>
    %90 = arith.mulf %88, %31 : vector<8x128xf32>
    %91 = arith.mulf %87, %86 : vector<8x128xf32>
    %92 = arith.addf %90, %91 : vector<8x128xf32>
    %93 = math.tanh %92 : vector<8x128xf32>
    %94 = arith.mulf %89, %93 : vector<8x128xf32>
    %95 = vector.extract_strided_slice %72 {offsets = [0, 0], sizes = [8, 16], strides = [1, 1]} : vector<8x128xf32> to vector<8x16xf32>
    %c16 = arith.constant 16 : index
    %c0_44 = arith.constant 0 : index
    %96 = vector.load %arg15[%c16, %c0_44] : memref<64x512xf32, #tpu.memory_space<vmem>>, vector<8x512xf32>
    %cst_45 = arith.constant dense<0.000000e+00> : vector<8x512xf32>
    %97 = tpu.matmul %95, %10, %cst_45 {dimension_numbers = #tpu.dot_dimension_numbers<[1], [0], [0], [1], [0, 0, 1, 1], [], []>} : vector<8x16xf32>, vector<16x512xf32>, vector<8x512xf32> -> vector<8x512xf32>
    %98 = arith.addf %96, %97 : vector<8x512xf32>
    %99 = vector.extract_strided_slice %98 {offsets = [0, 0], sizes = [8, 384], strides = [1, 1]} : vector<8x512xf32> to vector<8x384xf32>
    %100 = arith.negf %99 : vector<8x384xf32>
    %101 = math.exp %100 : vector<8x384xf32>
    %cst_46 = arith.constant 1.000000e+00 : f32
    %102 = vector.broadcast %cst_46 : f32 to vector<8x384xf32>
    %103 = arith.addf %102, %101 : vector<8x384xf32>
    %104 = arith.divf %102, %103 : vector<8x384xf32>
    %105 = vector.extract_strided_slice %98 {offsets = [0, 384], sizes = [8, 128], strides = [1, 1]} : vector<8x512xf32> to vector<8x128xf32>
    %106 = math.tanh %105 : vector<8x128xf32>
    %107 = vector.extract_strided_slice %104 {offsets = [0, 0], sizes = [8, 128], strides = [1, 1]} : vector<8x384xf32> to vector<8x128xf32>
    %108 = vector.extract_strided_slice %104 {offsets = [0, 128], sizes = [8, 128], strides = [1, 1]} : vector<8x384xf32> to vector<8x128xf32>
    %109 = vector.extract_strided_slice %104 {offsets = [0, 256], sizes = [8, 128], strides = [1, 1]} : vector<8x384xf32> to vector<8x128xf32>
    %110 = arith.mulf %108, %70 : vector<8x128xf32>
    %111 = arith.mulf %107, %106 : vector<8x128xf32>
    %112 = arith.addf %110, %111 : vector<8x128xf32>
    %113 = math.tanh %112 : vector<8x128xf32>
    %114 = arith.mulf %109, %113 : vector<8x128xf32>
    %115 = vector.extract_strided_slice %94 {offsets = [0, 0], sizes = [8, 16], strides = [1, 1]} : vector<8x128xf32> to vector<8x16xf32>
    %116 = vector.extract_strided_slice %72 {offsets = [0, 0], sizes = [8, 16], strides = [1, 1]} : vector<8x128xf32> to vector<8x16xf32>
    %cst_47 = arith.constant dense<0.000000e+00> : vector<8x512xf32>
    %117 = tpu.matmul %116, %16, %cst_47 {dimension_numbers = #tpu.dot_dimension_numbers<[1], [0], [0], [1], [0, 0, 1, 1], [], []>} : vector<8x16xf32>, vector<16x512xf32>, vector<8x512xf32> -> vector<8x512xf32>
    %118 = arith.addf %22, %117 : vector<8x512xf32>
    %cst_48 = arith.constant dense<0.000000e+00> : vector<8x512xf32>
    %119 = tpu.matmul %115, %12, %cst_48 {dimension_numbers = #tpu.dot_dimension_numbers<[1], [0], [0], [1], [0, 0, 1, 1], [], []>} : vector<8x16xf32>, vector<16x512xf32>, vector<8x512xf32> -> vector<8x512xf32>
    %120 = arith.addf %118, %119 : vector<8x512xf32>
    %121 = vector.extract_strided_slice %120 {offsets = [0, 0], sizes = [8, 384], strides = [1, 1]} : vector<8x512xf32> to vector<8x384xf32>
    %122 = arith.negf %121 : vector<8x384xf32>
    %123 = math.exp %122 : vector<8x384xf32>
    %cst_49 = arith.constant 1.000000e+00 : f32
    %124 = vector.broadcast %cst_49 : f32 to vector<8x384xf32>
    %125 = arith.addf %124, %123 : vector<8x384xf32>
    %126 = arith.divf %124, %125 : vector<8x384xf32>
    %127 = vector.extract_strided_slice %120 {offsets = [0, 384], sizes = [8, 128], strides = [1, 1]} : vector<8x512xf32> to vector<8x128xf32>
    %128 = math.tanh %127 : vector<8x128xf32>
    %129 = vector.extract_strided_slice %126 {offsets = [0, 0], sizes = [8, 128], strides = [1, 1]} : vector<8x384xf32> to vector<8x128xf32>
    %130 = vector.extract_strided_slice %126 {offsets = [0, 128], sizes = [8, 128], strides = [1, 1]} : vector<8x384xf32> to vector<8x128xf32>
    %131 = vector.extract_strided_slice %126 {offsets = [0, 256], sizes = [8, 128], strides = [1, 1]} : vector<8x384xf32> to vector<8x128xf32>
    %132 = arith.mulf %130, %92 : vector<8x128xf32>
    %133 = arith.mulf %129, %128 : vector<8x128xf32>
    %134 = arith.addf %132, %133 : vector<8x128xf32>
    %135 = math.tanh %134 : vector<8x128xf32>
    %136 = arith.mulf %131, %135 : vector<8x128xf32>
    %137 = vector.extract_strided_slice %29 {offsets = [0, 0], sizes = [8, 16], strides = [1, 1]} : vector<8x128xf32> to vector<8x16xf32>
    %138 = vector.extract_strided_slice %94 {offsets = [0, 0], sizes = [8, 16], strides = [1, 1]} : vector<8x128xf32> to vector<8x16xf32>
    %cst_50 = arith.constant dense<0.000000e+00> : vector<8x512xf32>
    %139 = tpu.matmul %138, %18, %cst_50 {dimension_numbers = #tpu.dot_dimension_numbers<[1], [0], [0], [1], [0, 0, 1, 1], [], []>} : vector<8x16xf32>, vector<16x512xf32>, vector<8x512xf32> -> vector<8x512xf32>
    %140 = arith.addf %26, %139 : vector<8x512xf32>
    %cst_51 = arith.constant dense<0.000000e+00> : vector<8x512xf32>
    %141 = tpu.matmul %137, %14, %cst_51 {dimension_numbers = #tpu.dot_dimension_numbers<[1], [0], [0], [1], [0, 0, 1, 1], [], []>} : vector<8x16xf32>, vector<16x512xf32>, vector<8x512xf32> -> vector<8x512xf32>
    %142 = arith.addf %140, %141 : vector<8x512xf32>
    %143 = vector.extract_strided_slice %142 {offsets = [0, 0], sizes = [8, 384], strides = [1, 1]} : vector<8x512xf32> to vector<8x384xf32>
    %144 = arith.negf %143 : vector<8x384xf32>
    %145 = math.exp %144 : vector<8x384xf32>
    %cst_52 = arith.constant 1.000000e+00 : f32
    %146 = vector.broadcast %cst_52 : f32 to vector<8x384xf32>
    %147 = arith.addf %146, %145 : vector<8x384xf32>
    %148 = arith.divf %146, %147 : vector<8x384xf32>
    %149 = vector.extract_strided_slice %142 {offsets = [0, 384], sizes = [8, 128], strides = [1, 1]} : vector<8x512xf32> to vector<8x128xf32>
    %150 = math.tanh %149 : vector<8x128xf32>
    %151 = vector.extract_strided_slice %148 {offsets = [0, 0], sizes = [8, 128], strides = [1, 1]} : vector<8x384xf32> to vector<8x128xf32>
    %152 = vector.extract_strided_slice %148 {offsets = [0, 128], sizes = [8, 128], strides = [1, 1]} : vector<8x384xf32> to vector<8x128xf32>
    %153 = vector.extract_strided_slice %148 {offsets = [0, 256], sizes = [8, 128], strides = [1, 1]} : vector<8x384xf32> to vector<8x128xf32>
    %154 = arith.mulf %152, %32 : vector<8x128xf32>
    %155 = arith.mulf %151, %150 : vector<8x128xf32>
    %156 = arith.addf %154, %155 : vector<8x128xf32>
    %157 = math.tanh %156 : vector<8x128xf32>
    %158 = arith.mulf %153, %157 : vector<8x128xf32>
    %159 = vector.extract_strided_slice %114 {offsets = [0, 0], sizes = [8, 16], strides = [1, 1]} : vector<8x128xf32> to vector<8x16xf32>
    %c24 = arith.constant 24 : index
    %c0_53 = arith.constant 0 : index
    %160 = vector.load %arg15[%c24, %c0_53] : memref<64x512xf32, #tpu.memory_space<vmem>>, vector<8x512xf32>
    %cst_54 = arith.constant dense<0.000000e+00> : vector<8x512xf32>
    %161 = tpu.matmul %159, %10, %cst_54 {dimension_numbers = #tpu.dot_dimension_numbers<[1], [0], [0], [1], [0, 0, 1, 1], [], []>} : vector<8x16xf32>, vector<16x512xf32>, vector<8x512xf32> -> vector<8x512xf32>
    %162 = arith.addf %160, %161 : vector<8x512xf32>
    %163 = vector.extract_strided_slice %162 {offsets = [0, 0], sizes = [8, 384], strides = [1, 1]} : vector<8x512xf32> to vector<8x384xf32>
    %164 = arith.negf %163 : vector<8x384xf32>
    %165 = math.exp %164 : vector<8x384xf32>
    %cst_55 = arith.constant 1.000000e+00 : f32
    %166 = vector.broadcast %cst_55 : f32 to vector<8x384xf32>
    %167 = arith.addf %166, %165 : vector<8x384xf32>
    %168 = arith.divf %166, %167 : vector<8x384xf32>
    %169 = vector.extract_strided_slice %162 {offsets = [0, 384], sizes = [8, 128], strides = [1, 1]} : vector<8x512xf32> to vector<8x128xf32>
    %170 = math.tanh %169 : vector<8x128xf32>
    %171 = vector.extract_strided_slice %168 {offsets = [0, 0], sizes = [8, 128], strides = [1, 1]} : vector<8x384xf32> to vector<8x128xf32>
    %172 = vector.extract_strided_slice %168 {offsets = [0, 128], sizes = [8, 128], strides = [1, 1]} : vector<8x384xf32> to vector<8x128xf32>
    %173 = vector.extract_strided_slice %168 {offsets = [0, 256], sizes = [8, 128], strides = [1, 1]} : vector<8x384xf32> to vector<8x128xf32>
    %174 = arith.mulf %172, %112 : vector<8x128xf32>
    %175 = arith.mulf %171, %170 : vector<8x128xf32>
    %176 = arith.addf %174, %175 : vector<8x128xf32>
    %177 = math.tanh %176 : vector<8x128xf32>
    %178 = arith.mulf %173, %177 : vector<8x128xf32>
    %179 = vector.extract_strided_slice %136 {offsets = [0, 0], sizes = [8, 16], strides = [1, 1]} : vector<8x128xf32> to vector<8x16xf32>
    %180 = vector.extract_strided_slice %114 {offsets = [0, 0], sizes = [8, 16], strides = [1, 1]} : vector<8x128xf32> to vector<8x16xf32>
    %cst_56 = arith.constant dense<0.000000e+00> : vector<8x512xf32>
    %181 = tpu.matmul %180, %16, %cst_56 {dimension_numbers = #tpu.dot_dimension_numbers<[1], [0], [0], [1], [0, 0, 1, 1], [], []>} : vector<8x16xf32>, vector<16x512xf32>, vector<8x512xf32> -> vector<8x512xf32>
    %182 = arith.addf %22, %181 : vector<8x512xf32>
    %cst_57 = arith.constant dense<0.000000e+00> : vector<8x512xf32>
    %183 = tpu.matmul %179, %12, %cst_57 {dimension_numbers = #tpu.dot_dimension_numbers<[1], [0], [0], [1], [0, 0, 1, 1], [], []>} : vector<8x16xf32>, vector<16x512xf32>, vector<8x512xf32> -> vector<8x512xf32>
    %184 = arith.addf %182, %183 : vector<8x512xf32>
    %185 = vector.extract_strided_slice %184 {offsets = [0, 0], sizes = [8, 384], strides = [1, 1]} : vector<8x512xf32> to vector<8x384xf32>
    %186 = arith.negf %185 : vector<8x384xf32>
    %187 = math.exp %186 : vector<8x384xf32>
    %cst_58 = arith.constant 1.000000e+00 : f32
    %188 = vector.broadcast %cst_58 : f32 to vector<8x384xf32>
    %189 = arith.addf %188, %187 : vector<8x384xf32>
    %190 = arith.divf %188, %189 : vector<8x384xf32>
    %191 = vector.extract_strided_slice %184 {offsets = [0, 384], sizes = [8, 128], strides = [1, 1]} : vector<8x512xf32> to vector<8x128xf32>
    %192 = math.tanh %191 : vector<8x128xf32>
    %193 = vector.extract_strided_slice %190 {offsets = [0, 0], sizes = [8, 128], strides = [1, 1]} : vector<8x384xf32> to vector<8x128xf32>
    %194 = vector.extract_strided_slice %190 {offsets = [0, 128], sizes = [8, 128], strides = [1, 1]} : vector<8x384xf32> to vector<8x128xf32>
    %195 = vector.extract_strided_slice %190 {offsets = [0, 256], sizes = [8, 128], strides = [1, 1]} : vector<8x384xf32> to vector<8x128xf32>
    %196 = arith.mulf %194, %134 : vector<8x128xf32>
    %197 = arith.mulf %193, %192 : vector<8x128xf32>
    %198 = arith.addf %196, %197 : vector<8x128xf32>
    %199 = math.tanh %198 : vector<8x128xf32>
    %200 = arith.mulf %195, %199 : vector<8x128xf32>
    %201 = vector.extract_strided_slice %158 {offsets = [0, 0], sizes = [8, 16], strides = [1, 1]} : vector<8x128xf32> to vector<8x16xf32>
    %202 = vector.extract_strided_slice %136 {offsets = [0, 0], sizes = [8, 16], strides = [1, 1]} : vector<8x128xf32> to vector<8x16xf32>
    %cst_59 = arith.constant dense<0.000000e+00> : vector<8x512xf32>
    %203 = tpu.matmul %202, %18, %cst_59 {dimension_numbers = #tpu.dot_dimension_numbers<[1], [0], [0], [1], [0, 0, 1, 1], [], []>} : vector<8x16xf32>, vector<16x512xf32>, vector<8x512xf32> -> vector<8x512xf32>
    %204 = arith.addf %26, %203 : vector<8x512xf32>
    %cst_60 = arith.constant dense<0.000000e+00> : vector<8x512xf32>
    %205 = tpu.matmul %201, %14, %cst_60 {dimension_numbers = #tpu.dot_dimension_numbers<[1], [0], [0], [1], [0, 0, 1, 1], [], []>} : vector<8x16xf32>, vector<16x512xf32>, vector<8x512xf32> -> vector<8x512xf32>
    %206 = arith.addf %204, %205 : vector<8x512xf32>
    %207 = vector.extract_strided_slice %206 {offsets = [0, 0], sizes = [8, 384], strides = [1, 1]} : vector<8x512xf32> to vector<8x384xf32>
    %208 = arith.negf %207 : vector<8x384xf32>
    %209 = math.exp %208 : vector<8x384xf32>
    %cst_61 = arith.constant 1.000000e+00 : f32
    %210 = vector.broadcast %cst_61 : f32 to vector<8x384xf32>
    %211 = arith.addf %210, %209 : vector<8x384xf32>
    %212 = arith.divf %210, %211 : vector<8x384xf32>
    %213 = vector.extract_strided_slice %206 {offsets = [0, 384], sizes = [8, 128], strides = [1, 1]} : vector<8x512xf32> to vector<8x128xf32>
    %214 = math.tanh %213 : vector<8x128xf32>
    %215 = vector.extract_strided_slice %212 {offsets = [0, 0], sizes = [8, 128], strides = [1, 1]} : vector<8x384xf32> to vector<8x128xf32>
    %216 = vector.extract_strided_slice %212 {offsets = [0, 128], sizes = [8, 128], strides = [1, 1]} : vector<8x384xf32> to vector<8x128xf32>
    %217 = vector.extract_strided_slice %212 {offsets = [0, 256], sizes = [8, 128], strides = [1, 1]} : vector<8x384xf32> to vector<8x128xf32>
    %218 = arith.mulf %216, %156 : vector<8x128xf32>
    %219 = arith.mulf %215, %214 : vector<8x128xf32>
    %220 = arith.addf %218, %219 : vector<8x128xf32>
    %221 = math.tanh %220 : vector<8x128xf32>
    %222 = arith.mulf %217, %221 : vector<8x128xf32>
    %223 = vector.extract_strided_slice %178 {offsets = [0, 0], sizes = [8, 16], strides = [1, 1]} : vector<8x128xf32> to vector<8x16xf32>
    %c32 = arith.constant 32 : index
    %c0_62 = arith.constant 0 : index
    %224 = vector.load %arg15[%c32, %c0_62] : memref<64x512xf32, #tpu.memory_space<vmem>>, vector<8x512xf32>
    %cst_63 = arith.constant dense<0.000000e+00> : vector<8x512xf32>
    %225 = tpu.matmul %223, %10, %cst_63 {dimension_numbers = #tpu.dot_dimension_numbers<[1], [0], [0], [1], [0, 0, 1, 1], [], []>} : vector<8x16xf32>, vector<16x512xf32>, vector<8x512xf32> -> vector<8x512xf32>
    %226 = arith.addf %224, %225 : vector<8x512xf32>
    %227 = vector.extract_strided_slice %226 {offsets = [0, 0], sizes = [8, 384], strides = [1, 1]} : vector<8x512xf32> to vector<8x384xf32>
    %228 = arith.negf %227 : vector<8x384xf32>
    %229 = math.exp %228 : vector<8x384xf32>
    %cst_64 = arith.constant 1.000000e+00 : f32
    %230 = vector.broadcast %cst_64 : f32 to vector<8x384xf32>
    %231 = arith.addf %230, %229 : vector<8x384xf32>
    %232 = arith.divf %230, %231 : vector<8x384xf32>
    %233 = vector.extract_strided_slice %226 {offsets = [0, 384], sizes = [8, 128], strides = [1, 1]} : vector<8x512xf32> to vector<8x128xf32>
    %234 = math.tanh %233 : vector<8x128xf32>
    %235 = vector.extract_strided_slice %232 {offsets = [0, 0], sizes = [8, 128], strides = [1, 1]} : vector<8x384xf32> to vector<8x128xf32>
    %236 = vector.extract_strided_slice %232 {offsets = [0, 128], sizes = [8, 128], strides = [1, 1]} : vector<8x384xf32> to vector<8x128xf32>
    %237 = vector.extract_strided_slice %232 {offsets = [0, 256], sizes = [8, 128], strides = [1, 1]} : vector<8x384xf32> to vector<8x128xf32>
    %238 = arith.mulf %236, %176 : vector<8x128xf32>
    %239 = arith.mulf %235, %234 : vector<8x128xf32>
    %240 = arith.addf %238, %239 : vector<8x128xf32>
    %241 = math.tanh %240 : vector<8x128xf32>
    %242 = arith.mulf %237, %241 : vector<8x128xf32>
    %243 = vector.extract_strided_slice %200 {offsets = [0, 0], sizes = [8, 16], strides = [1, 1]} : vector<8x128xf32> to vector<8x16xf32>
    %244 = vector.extract_strided_slice %178 {offsets = [0, 0], sizes = [8, 16], strides = [1, 1]} : vector<8x128xf32> to vector<8x16xf32>
    %cst_65 = arith.constant dense<0.000000e+00> : vector<8x512xf32>
    %245 = tpu.matmul %244, %16, %cst_65 {dimension_numbers = #tpu.dot_dimension_numbers<[1], [0], [0], [1], [0, 0, 1, 1], [], []>} : vector<8x16xf32>, vector<16x512xf32>, vector<8x512xf32> -> vector<8x512xf32>
    %246 = arith.addf %22, %245 : vector<8x512xf32>
    %cst_66 = arith.constant dense<0.000000e+00> : vector<8x512xf32>
    %247 = tpu.matmul %243, %12, %cst_66 {dimension_numbers = #tpu.dot_dimension_numbers<[1], [0], [0], [1], [0, 0, 1, 1], [], []>} : vector<8x16xf32>, vector<16x512xf32>, vector<8x512xf32> -> vector<8x512xf32>
    %248 = arith.addf %246, %247 : vector<8x512xf32>
    %249 = vector.extract_strided_slice %248 {offsets = [0, 0], sizes = [8, 384], strides = [1, 1]} : vector<8x512xf32> to vector<8x384xf32>
    %250 = arith.negf %249 : vector<8x384xf32>
    %251 = math.exp %250 : vector<8x384xf32>
    %cst_67 = arith.constant 1.000000e+00 : f32
    %252 = vector.broadcast %cst_67 : f32 to vector<8x384xf32>
    %253 = arith.addf %252, %251 : vector<8x384xf32>
    %254 = arith.divf %252, %253 : vector<8x384xf32>
    %255 = vector.extract_strided_slice %248 {offsets = [0, 384], sizes = [8, 128], strides = [1, 1]} : vector<8x512xf32> to vector<8x128xf32>
    %256 = math.tanh %255 : vector<8x128xf32>
    %257 = vector.extract_strided_slice %254 {offsets = [0, 0], sizes = [8, 128], strides = [1, 1]} : vector<8x384xf32> to vector<8x128xf32>
    %258 = vector.extract_strided_slice %254 {offsets = [0, 128], sizes = [8, 128], strides = [1, 1]} : vector<8x384xf32> to vector<8x128xf32>
    %259 = vector.extract_strided_slice %254 {offsets = [0, 256], sizes = [8, 128], strides = [1, 1]} : vector<8x384xf32> to vector<8x128xf32>
    %260 = arith.mulf %258, %198 : vector<8x128xf32>
    %261 = arith.mulf %257, %256 : vector<8x128xf32>
    %262 = arith.addf %260, %261 : vector<8x128xf32>
    %263 = math.tanh %262 : vector<8x128xf32>
    %264 = arith.mulf %259, %263 : vector<8x128xf32>
    %265 = vector.extract_strided_slice %222 {offsets = [0, 0], sizes = [8, 16], strides = [1, 1]} : vector<8x128xf32> to vector<8x16xf32>
    %266 = vector.extract_strided_slice %200 {offsets = [0, 0], sizes = [8, 16], strides = [1, 1]} : vector<8x128xf32> to vector<8x16xf32>
    %cst_68 = arith.constant dense<0.000000e+00> : vector<8x512xf32>
    %267 = tpu.matmul %266, %18, %cst_68 {dimension_numbers = #tpu.dot_dimension_numbers<[1], [0], [0], [1], [0, 0, 1, 1], [], []>} : vector<8x16xf32>, vector<16x512xf32>, vector<8x512xf32> -> vector<8x512xf32>
    %268 = arith.addf %26, %267 : vector<8x512xf32>
    %cst_69 = arith.constant dense<0.000000e+00> : vector<8x512xf32>
    %269 = tpu.matmul %265, %14, %cst_69 {dimension_numbers = #tpu.dot_dimension_numbers<[1], [0], [0], [1], [0, 0, 1, 1], [], []>} : vector<8x16xf32>, vector<16x512xf32>, vector<8x512xf32> -> vector<8x512xf32>
    %270 = arith.addf %268, %269 : vector<8x512xf32>
    %271 = vector.extract_strided_slice %270 {offsets = [0, 0], sizes = [8, 384], strides = [1, 1]} : vector<8x512xf32> to vector<8x384xf32>
    %272 = arith.negf %271 : vector<8x384xf32>
    %273 = math.exp %272 : vector<8x384xf32>
    %cst_70 = arith.constant 1.000000e+00 : f32
    %274 = vector.broadcast %cst_70 : f32 to vector<8x384xf32>
    %275 = arith.addf %274, %273 : vector<8x384xf32>
    %276 = arith.divf %274, %275 : vector<8x384xf32>
    %277 = vector.extract_strided_slice %270 {offsets = [0, 384], sizes = [8, 128], strides = [1, 1]} : vector<8x512xf32> to vector<8x128xf32>
    %278 = math.tanh %277 : vector<8x128xf32>
    %279 = vector.extract_strided_slice %276 {offsets = [0, 0], sizes = [8, 128], strides = [1, 1]} : vector<8x384xf32> to vector<8x128xf32>
    %280 = vector.extract_strided_slice %276 {offsets = [0, 128], sizes = [8, 128], strides = [1, 1]} : vector<8x384xf32> to vector<8x128xf32>
    %281 = vector.extract_strided_slice %276 {offsets = [0, 256], sizes = [8, 128], strides = [1, 1]} : vector<8x384xf32> to vector<8x128xf32>
    %282 = arith.mulf %280, %220 : vector<8x128xf32>
    %283 = arith.mulf %279, %278 : vector<8x128xf32>
    %284 = arith.addf %282, %283 : vector<8x128xf32>
    %285 = math.tanh %284 : vector<8x128xf32>
    %286 = arith.mulf %281, %285 : vector<8x128xf32>
    %287 = vector.extract_strided_slice %242 {offsets = [0, 0], sizes = [8, 16], strides = [1, 1]} : vector<8x128xf32> to vector<8x16xf32>
    %c40 = arith.constant 40 : index
    %c0_71 = arith.constant 0 : index
    %288 = vector.load %arg15[%c40, %c0_71] : memref<64x512xf32, #tpu.memory_space<vmem>>, vector<8x512xf32>
    %cst_72 = arith.constant dense<0.000000e+00> : vector<8x512xf32>
    %289 = tpu.matmul %287, %10, %cst_72 {dimension_numbers = #tpu.dot_dimension_numbers<[1], [0], [0], [1], [0, 0, 1, 1], [], []>} : vector<8x16xf32>, vector<16x512xf32>, vector<8x512xf32> -> vector<8x512xf32>
    %290 = arith.addf %288, %289 : vector<8x512xf32>
    %291 = vector.extract_strided_slice %290 {offsets = [0, 0], sizes = [8, 384], strides = [1, 1]} : vector<8x512xf32> to vector<8x384xf32>
    %292 = arith.negf %291 : vector<8x384xf32>
    %293 = math.exp %292 : vector<8x384xf32>
    %cst_73 = arith.constant 1.000000e+00 : f32
    %294 = vector.broadcast %cst_73 : f32 to vector<8x384xf32>
    %295 = arith.addf %294, %293 : vector<8x384xf32>
    %296 = arith.divf %294, %295 : vector<8x384xf32>
    %297 = vector.extract_strided_slice %290 {offsets = [0, 384], sizes = [8, 128], strides = [1, 1]} : vector<8x512xf32> to vector<8x128xf32>
    %298 = math.tanh %297 : vector<8x128xf32>
    %299 = vector.extract_strided_slice %296 {offsets = [0, 0], sizes = [8, 128], strides = [1, 1]} : vector<8x384xf32> to vector<8x128xf32>
    %300 = vector.extract_strided_slice %296 {offsets = [0, 128], sizes = [8, 128], strides = [1, 1]} : vector<8x384xf32> to vector<8x128xf32>
    %301 = vector.extract_strided_slice %296 {offsets = [0, 256], sizes = [8, 128], strides = [1, 1]} : vector<8x384xf32> to vector<8x128xf32>
    %302 = arith.mulf %300, %240 : vector<8x128xf32>
    %303 = arith.mulf %299, %298 : vector<8x128xf32>
    %304 = arith.addf %302, %303 : vector<8x128xf32>
    %305 = math.tanh %304 : vector<8x128xf32>
    %306 = arith.mulf %301, %305 : vector<8x128xf32>
    %307 = vector.extract_strided_slice %264 {offsets = [0, 0], sizes = [8, 16], strides = [1, 1]} : vector<8x128xf32> to vector<8x16xf32>
    %308 = vector.extract_strided_slice %242 {offsets = [0, 0], sizes = [8, 16], strides = [1, 1]} : vector<8x128xf32> to vector<8x16xf32>
    %cst_74 = arith.constant dense<0.000000e+00> : vector<8x512xf32>
    %309 = tpu.matmul %308, %16, %cst_74 {dimension_numbers = #tpu.dot_dimension_numbers<[1], [0], [0], [1], [0, 0, 1, 1], [], []>} : vector<8x16xf32>, vector<16x512xf32>, vector<8x512xf32> -> vector<8x512xf32>
    %310 = arith.addf %22, %309 : vector<8x512xf32>
    %cst_75 = arith.constant dense<0.000000e+00> : vector<8x512xf32>
    %311 = tpu.matmul %307, %12, %cst_75 {dimension_numbers = #tpu.dot_dimension_numbers<[1], [0], [0], [1], [0, 0, 1, 1], [], []>} : vector<8x16xf32>, vector<16x512xf32>, vector<8x512xf32> -> vector<8x512xf32>
    %312 = arith.addf %310, %311 : vector<8x512xf32>
    %313 = vector.extract_strided_slice %312 {offsets = [0, 0], sizes = [8, 384], strides = [1, 1]} : vector<8x512xf32> to vector<8x384xf32>
    %314 = arith.negf %313 : vector<8x384xf32>
    %315 = math.exp %314 : vector<8x384xf32>
    %cst_76 = arith.constant 1.000000e+00 : f32
    %316 = vector.broadcast %cst_76 : f32 to vector<8x384xf32>
    %317 = arith.addf %316, %315 : vector<8x384xf32>
    %318 = arith.divf %316, %317 : vector<8x384xf32>
    %319 = vector.extract_strided_slice %312 {offsets = [0, 384], sizes = [8, 128], strides = [1, 1]} : vector<8x512xf32> to vector<8x128xf32>
    %320 = math.tanh %319 : vector<8x128xf32>
    %321 = vector.extract_strided_slice %318 {offsets = [0, 0], sizes = [8, 128], strides = [1, 1]} : vector<8x384xf32> to vector<8x128xf32>
    %322 = vector.extract_strided_slice %318 {offsets = [0, 128], sizes = [8, 128], strides = [1, 1]} : vector<8x384xf32> to vector<8x128xf32>
    %323 = vector.extract_strided_slice %318 {offsets = [0, 256], sizes = [8, 128], strides = [1, 1]} : vector<8x384xf32> to vector<8x128xf32>
    %324 = arith.mulf %322, %262 : vector<8x128xf32>
    %325 = arith.mulf %321, %320 : vector<8x128xf32>
    %326 = arith.addf %324, %325 : vector<8x128xf32>
    %327 = math.tanh %326 : vector<8x128xf32>
    %328 = arith.mulf %323, %327 : vector<8x128xf32>
    %329 = vector.extract_strided_slice %286 {offsets = [0, 0], sizes = [8, 16], strides = [1, 1]} : vector<8x128xf32> to vector<8x16xf32>
    %330 = vector.extract_strided_slice %264 {offsets = [0, 0], sizes = [8, 16], strides = [1, 1]} : vector<8x128xf32> to vector<8x16xf32>
    %cst_77 = arith.constant dense<0.000000e+00> : vector<8x512xf32>
    %331 = tpu.matmul %330, %18, %cst_77 {dimension_numbers = #tpu.dot_dimension_numbers<[1], [0], [0], [1], [0, 0, 1, 1], [], []>} : vector<8x16xf32>, vector<16x512xf32>, vector<8x512xf32> -> vector<8x512xf32>
    %332 = arith.addf %26, %331 : vector<8x512xf32>
    %cst_78 = arith.constant dense<0.000000e+00> : vector<8x512xf32>
    %333 = tpu.matmul %329, %14, %cst_78 {dimension_numbers = #tpu.dot_dimension_numbers<[1], [0], [0], [1], [0, 0, 1, 1], [], []>} : vector<8x16xf32>, vector<16x512xf32>, vector<8x512xf32> -> vector<8x512xf32>
    %334 = arith.addf %332, %333 : vector<8x512xf32>
    %335 = vector.extract_strided_slice %334 {offsets = [0, 0], sizes = [8, 384], strides = [1, 1]} : vector<8x512xf32> to vector<8x384xf32>
    %336 = arith.negf %335 : vector<8x384xf32>
    %337 = math.exp %336 : vector<8x384xf32>
    %cst_79 = arith.constant 1.000000e+00 : f32
    %338 = vector.broadcast %cst_79 : f32 to vector<8x384xf32>
    %339 = arith.addf %338, %337 : vector<8x384xf32>
    %340 = arith.divf %338, %339 : vector<8x384xf32>
    %341 = vector.extract_strided_slice %334 {offsets = [0, 384], sizes = [8, 128], strides = [1, 1]} : vector<8x512xf32> to vector<8x128xf32>
    %342 = math.tanh %341 : vector<8x128xf32>
    %343 = vector.extract_strided_slice %340 {offsets = [0, 0], sizes = [8, 128], strides = [1, 1]} : vector<8x384xf32> to vector<8x128xf32>
    %344 = vector.extract_strided_slice %340 {offsets = [0, 128], sizes = [8, 128], strides = [1, 1]} : vector<8x384xf32> to vector<8x128xf32>
    %345 = vector.extract_strided_slice %340 {offsets = [0, 256], sizes = [8, 128], strides = [1, 1]} : vector<8x384xf32> to vector<8x128xf32>
    %346 = arith.mulf %344, %284 : vector<8x128xf32>
    %347 = arith.mulf %343, %342 : vector<8x128xf32>
    %348 = arith.addf %346, %347 : vector<8x128xf32>
    %349 = math.tanh %348 : vector<8x128xf32>
    %350 = arith.mulf %345, %349 : vector<8x128xf32>
    %351 = vector.extract_strided_slice %306 {offsets = [0, 0], sizes = [8, 16], strides = [1, 1]} : vector<8x128xf32> to vector<8x16xf32>
    %c48 = arith.constant 48 : index
    %c0_80 = arith.constant 0 : index
    %352 = vector.load %arg15[%c48, %c0_80] : memref<64x512xf32, #tpu.memory_space<vmem>>, vector<8x512xf32>
    %cst_81 = arith.constant dense<0.000000e+00> : vector<8x512xf32>
    %353 = tpu.matmul %351, %10, %cst_81 {dimension_numbers = #tpu.dot_dimension_numbers<[1], [0], [0], [1], [0, 0, 1, 1], [], []>} : vector<8x16xf32>, vector<16x512xf32>, vector<8x512xf32> -> vector<8x512xf32>
    %354 = arith.addf %352, %353 : vector<8x512xf32>
    %355 = vector.extract_strided_slice %354 {offsets = [0, 0], sizes = [8, 384], strides = [1, 1]} : vector<8x512xf32> to vector<8x384xf32>
    %356 = arith.negf %355 : vector<8x384xf32>
    %357 = math.exp %356 : vector<8x384xf32>
    %cst_82 = arith.constant 1.000000e+00 : f32
    %358 = vector.broadcast %cst_82 : f32 to vector<8x384xf32>
    %359 = arith.addf %358, %357 : vector<8x384xf32>
    %360 = arith.divf %358, %359 : vector<8x384xf32>
    %361 = vector.extract_strided_slice %354 {offsets = [0, 384], sizes = [8, 128], strides = [1, 1]} : vector<8x512xf32> to vector<8x128xf32>
    %362 = math.tanh %361 : vector<8x128xf32>
    %363 = vector.extract_strided_slice %360 {offsets = [0, 0], sizes = [8, 128], strides = [1, 1]} : vector<8x384xf32> to vector<8x128xf32>
    %364 = vector.extract_strided_slice %360 {offsets = [0, 128], sizes = [8, 128], strides = [1, 1]} : vector<8x384xf32> to vector<8x128xf32>
    %365 = vector.extract_strided_slice %360 {offsets = [0, 256], sizes = [8, 128], strides = [1, 1]} : vector<8x384xf32> to vector<8x128xf32>
    %366 = arith.mulf %364, %304 : vector<8x128xf32>
    %367 = arith.mulf %363, %362 : vector<8x128xf32>
    %368 = arith.addf %366, %367 : vector<8x128xf32>
    %369 = math.tanh %368 : vector<8x128xf32>
    %370 = arith.mulf %365, %369 : vector<8x128xf32>
    %371 = vector.extract_strided_slice %328 {offsets = [0, 0], sizes = [8, 16], strides = [1, 1]} : vector<8x128xf32> to vector<8x16xf32>
    %372 = vector.extract_strided_slice %306 {offsets = [0, 0], sizes = [8, 16], strides = [1, 1]} : vector<8x128xf32> to vector<8x16xf32>
    %cst_83 = arith.constant dense<0.000000e+00> : vector<8x512xf32>
    %373 = tpu.matmul %372, %16, %cst_83 {dimension_numbers = #tpu.dot_dimension_numbers<[1], [0], [0], [1], [0, 0, 1, 1], [], []>} : vector<8x16xf32>, vector<16x512xf32>, vector<8x512xf32> -> vector<8x512xf32>
    %374 = arith.addf %22, %373 : vector<8x512xf32>
    %cst_84 = arith.constant dense<0.000000e+00> : vector<8x512xf32>
    %375 = tpu.matmul %371, %12, %cst_84 {dimension_numbers = #tpu.dot_dimension_numbers<[1], [0], [0], [1], [0, 0, 1, 1], [], []>} : vector<8x16xf32>, vector<16x512xf32>, vector<8x512xf32> -> vector<8x512xf32>
    %376 = arith.addf %374, %375 : vector<8x512xf32>
    %377 = vector.extract_strided_slice %376 {offsets = [0, 0], sizes = [8, 384], strides = [1, 1]} : vector<8x512xf32> to vector<8x384xf32>
    %378 = arith.negf %377 : vector<8x384xf32>
    %379 = math.exp %378 : vector<8x384xf32>
    %cst_85 = arith.constant 1.000000e+00 : f32
    %380 = vector.broadcast %cst_85 : f32 to vector<8x384xf32>
    %381 = arith.addf %380, %379 : vector<8x384xf32>
    %382 = arith.divf %380, %381 : vector<8x384xf32>
    %383 = vector.extract_strided_slice %376 {offsets = [0, 384], sizes = [8, 128], strides = [1, 1]} : vector<8x512xf32> to vector<8x128xf32>
    %384 = math.tanh %383 : vector<8x128xf32>
    %385 = vector.extract_strided_slice %382 {offsets = [0, 0], sizes = [8, 128], strides = [1, 1]} : vector<8x384xf32> to vector<8x128xf32>
    %386 = vector.extract_strided_slice %382 {offsets = [0, 128], sizes = [8, 128], strides = [1, 1]} : vector<8x384xf32> to vector<8x128xf32>
    %387 = vector.extract_strided_slice %382 {offsets = [0, 256], sizes = [8, 128], strides = [1, 1]} : vector<8x384xf32> to vector<8x128xf32>
    %388 = arith.mulf %386, %326 : vector<8x128xf32>
    %389 = arith.mulf %385, %384 : vector<8x128xf32>
    %390 = arith.addf %388, %389 : vector<8x128xf32>
    %391 = math.tanh %390 : vector<8x128xf32>
    %392 = arith.mulf %387, %391 : vector<8x128xf32>
    %393 = vector.extract_strided_slice %350 {offsets = [0, 0], sizes = [8, 16], strides = [1, 1]} : vector<8x128xf32> to vector<8x16xf32>
    %394 = vector.extract_strided_slice %328 {offsets = [0, 0], sizes = [8, 16], strides = [1, 1]} : vector<8x128xf32> to vector<8x16xf32>
    %cst_86 = arith.constant dense<0.000000e+00> : vector<8x512xf32>
    %395 = tpu.matmul %394, %18, %cst_86 {dimension_numbers = #tpu.dot_dimension_numbers<[1], [0], [0], [1], [0, 0, 1, 1], [], []>} : vector<8x16xf32>, vector<16x512xf32>, vector<8x512xf32> -> vector<8x512xf32>
    %396 = arith.addf %26, %395 : vector<8x512xf32>
    %cst_87 = arith.constant dense<0.000000e+00> : vector<8x512xf32>
    %397 = tpu.matmul %393, %14, %cst_87 {dimension_numbers = #tpu.dot_dimension_numbers<[1], [0], [0], [1], [0, 0, 1, 1], [], []>} : vector<8x16xf32>, vector<16x512xf32>, vector<8x512xf32> -> vector<8x512xf32>
    %398 = arith.addf %396, %397 : vector<8x512xf32>
    %399 = vector.extract_strided_slice %398 {offsets = [0, 0], sizes = [8, 384], strides = [1, 1]} : vector<8x512xf32> to vector<8x384xf32>
    %400 = arith.negf %399 : vector<8x384xf32>
    %401 = math.exp %400 : vector<8x384xf32>
    %cst_88 = arith.constant 1.000000e+00 : f32
    %402 = vector.broadcast %cst_88 : f32 to vector<8x384xf32>
    %403 = arith.addf %402, %401 : vector<8x384xf32>
    %404 = arith.divf %402, %403 : vector<8x384xf32>
    %405 = vector.extract_strided_slice %398 {offsets = [0, 384], sizes = [8, 128], strides = [1, 1]} : vector<8x512xf32> to vector<8x128xf32>
    %406 = math.tanh %405 : vector<8x128xf32>
    %407 = vector.extract_strided_slice %404 {offsets = [0, 0], sizes = [8, 128], strides = [1, 1]} : vector<8x384xf32> to vector<8x128xf32>
    %408 = vector.extract_strided_slice %404 {offsets = [0, 128], sizes = [8, 128], strides = [1, 1]} : vector<8x384xf32> to vector<8x128xf32>
    %409 = vector.extract_strided_slice %404 {offsets = [0, 256], sizes = [8, 128], strides = [1, 1]} : vector<8x384xf32> to vector<8x128xf32>
    %410 = arith.mulf %408, %348 : vector<8x128xf32>
    %411 = arith.mulf %407, %406 : vector<8x128xf32>
    %412 = arith.addf %410, %411 : vector<8x128xf32>
    %413 = math.tanh %412 : vector<8x128xf32>
    %414 = arith.mulf %409, %413 : vector<8x128xf32>
    %415 = vector.extract_strided_slice %370 {offsets = [0, 0], sizes = [8, 16], strides = [1, 1]} : vector<8x128xf32> to vector<8x16xf32>
    %c56 = arith.constant 56 : index
    %c0_89 = arith.constant 0 : index
    %416 = vector.load %arg15[%c56, %c0_89] : memref<64x512xf32, #tpu.memory_space<vmem>>, vector<8x512xf32>
    %cst_90 = arith.constant dense<0.000000e+00> : vector<8x512xf32>
    %417 = tpu.matmul %415, %10, %cst_90 {dimension_numbers = #tpu.dot_dimension_numbers<[1], [0], [0], [1], [0, 0, 1, 1], [], []>} : vector<8x16xf32>, vector<16x512xf32>, vector<8x512xf32> -> vector<8x512xf32>
    %418 = arith.addf %416, %417 : vector<8x512xf32>
    %419 = vector.extract_strided_slice %418 {offsets = [0, 0], sizes = [8, 384], strides = [1, 1]} : vector<8x512xf32> to vector<8x384xf32>
    %420 = arith.negf %419 : vector<8x384xf32>
    %421 = math.exp %420 : vector<8x384xf32>
    %cst_91 = arith.constant 1.000000e+00 : f32
    %422 = vector.broadcast %cst_91 : f32 to vector<8x384xf32>
    %423 = arith.addf %422, %421 : vector<8x384xf32>
    %424 = arith.divf %422, %423 : vector<8x384xf32>
    %425 = vector.extract_strided_slice %418 {offsets = [0, 384], sizes = [8, 128], strides = [1, 1]} : vector<8x512xf32> to vector<8x128xf32>
    %426 = math.tanh %425 : vector<8x128xf32>
    %427 = vector.extract_strided_slice %424 {offsets = [0, 0], sizes = [8, 128], strides = [1, 1]} : vector<8x384xf32> to vector<8x128xf32>
    %428 = vector.extract_strided_slice %424 {offsets = [0, 128], sizes = [8, 128], strides = [1, 1]} : vector<8x384xf32> to vector<8x128xf32>
    %429 = vector.extract_strided_slice %424 {offsets = [0, 256], sizes = [8, 128], strides = [1, 1]} : vector<8x384xf32> to vector<8x128xf32>
    %430 = arith.mulf %428, %368 : vector<8x128xf32>
    %431 = arith.mulf %427, %426 : vector<8x128xf32>
    %432 = arith.addf %430, %431 : vector<8x128xf32>
    %433 = math.tanh %432 : vector<8x128xf32>
    %434 = arith.mulf %429, %433 : vector<8x128xf32>
    %435 = vector.extract_strided_slice %392 {offsets = [0, 0], sizes = [8, 16], strides = [1, 1]} : vector<8x128xf32> to vector<8x16xf32>
    %436 = vector.extract_strided_slice %370 {offsets = [0, 0], sizes = [8, 16], strides = [1, 1]} : vector<8x128xf32> to vector<8x16xf32>
    %cst_92 = arith.constant dense<0.000000e+00> : vector<8x512xf32>
    %437 = tpu.matmul %436, %16, %cst_92 {dimension_numbers = #tpu.dot_dimension_numbers<[1], [0], [0], [1], [0, 0, 1, 1], [], []>} : vector<8x16xf32>, vector<16x512xf32>, vector<8x512xf32> -> vector<8x512xf32>
    %438 = arith.addf %22, %437 : vector<8x512xf32>
    %cst_93 = arith.constant dense<0.000000e+00> : vector<8x512xf32>
    %439 = tpu.matmul %435, %12, %cst_93 {dimension_numbers = #tpu.dot_dimension_numbers<[1], [0], [0], [1], [0, 0, 1, 1], [], []>} : vector<8x16xf32>, vector<16x512xf32>, vector<8x512xf32> -> vector<8x512xf32>
    %440 = arith.addf %438, %439 : vector<8x512xf32>
    %441 = vector.extract_strided_slice %440 {offsets = [0, 0], sizes = [8, 384], strides = [1, 1]} : vector<8x512xf32> to vector<8x384xf32>
    %442 = arith.negf %441 : vector<8x384xf32>
    %443 = math.exp %442 : vector<8x384xf32>
    %cst_94 = arith.constant 1.000000e+00 : f32
    %444 = vector.broadcast %cst_94 : f32 to vector<8x384xf32>
    %445 = arith.addf %444, %443 : vector<8x384xf32>
    %446 = arith.divf %444, %445 : vector<8x384xf32>
    %447 = vector.extract_strided_slice %440 {offsets = [0, 384], sizes = [8, 128], strides = [1, 1]} : vector<8x512xf32> to vector<8x128xf32>
    %448 = math.tanh %447 : vector<8x128xf32>
    %449 = vector.extract_strided_slice %446 {offsets = [0, 0], sizes = [8, 128], strides = [1, 1]} : vector<8x384xf32> to vector<8x128xf32>
    %450 = vector.extract_strided_slice %446 {offsets = [0, 128], sizes = [8, 128], strides = [1, 1]} : vector<8x384xf32> to vector<8x128xf32>
    %451 = vector.extract_strided_slice %446 {offsets = [0, 256], sizes = [8, 128], strides = [1, 1]} : vector<8x384xf32> to vector<8x128xf32>
    %452 = arith.mulf %450, %390 : vector<8x128xf32>
    %453 = arith.mulf %449, %448 : vector<8x128xf32>
    %454 = arith.addf %452, %453 : vector<8x128xf32>
    %455 = math.tanh %454 : vector<8x128xf32>
    %456 = arith.mulf %451, %455 : vector<8x128xf32>
    %457 = vector.extract_strided_slice %414 {offsets = [0, 0], sizes = [8, 16], strides = [1, 1]} : vector<8x128xf32> to vector<8x16xf32>
    %458 = vector.extract_strided_slice %392 {offsets = [0, 0], sizes = [8, 16], strides = [1, 1]} : vector<8x128xf32> to vector<8x16xf32>
    %cst_95 = arith.constant dense<0.000000e+00> : vector<8x512xf32>
    %459 = tpu.matmul %458, %18, %cst_95 {dimension_numbers = #tpu.dot_dimension_numbers<[1], [0], [0], [1], [0, 0, 1, 1], [], []>} : vector<8x16xf32>, vector<16x512xf32>, vector<8x512xf32> -> vector<8x512xf32>
    %460 = arith.addf %26, %459 : vector<8x512xf32>
    %cst_96 = arith.constant dense<0.000000e+00> : vector<8x512xf32>
    %461 = tpu.matmul %457, %14, %cst_96 {dimension_numbers = #tpu.dot_dimension_numbers<[1], [0], [0], [1], [0, 0, 1, 1], [], []>} : vector<8x16xf32>, vector<16x512xf32>, vector<8x512xf32> -> vector<8x512xf32>
    %462 = arith.addf %460, %461 : vector<8x512xf32>
    %463 = vector.extract_strided_slice %462 {offsets = [0, 0], sizes = [8, 384], strides = [1, 1]} : vector<8x512xf32> to vector<8x384xf32>
    %464 = arith.negf %463 : vector<8x384xf32>
    %465 = math.exp %464 : vector<8x384xf32>
    %cst_97 = arith.constant 1.000000e+00 : f32
    %466 = vector.broadcast %cst_97 : f32 to vector<8x384xf32>
    %467 = arith.addf %466, %465 : vector<8x384xf32>
    %468 = arith.divf %466, %467 : vector<8x384xf32>
    %469 = vector.extract_strided_slice %462 {offsets = [0, 384], sizes = [8, 128], strides = [1, 1]} : vector<8x512xf32> to vector<8x128xf32>
    %470 = math.tanh %469 : vector<8x128xf32>
    %471 = vector.extract_strided_slice %468 {offsets = [0, 0], sizes = [8, 128], strides = [1, 1]} : vector<8x384xf32> to vector<8x128xf32>
    %472 = vector.extract_strided_slice %468 {offsets = [0, 128], sizes = [8, 128], strides = [1, 1]} : vector<8x384xf32> to vector<8x128xf32>
    %473 = vector.extract_strided_slice %468 {offsets = [0, 256], sizes = [8, 128], strides = [1, 1]} : vector<8x384xf32> to vector<8x128xf32>
    %474 = arith.mulf %472, %412 : vector<8x128xf32>
    %475 = arith.mulf %471, %470 : vector<8x128xf32>
    %476 = arith.addf %474, %475 : vector<8x128xf32>
    %477 = math.tanh %476 : vector<8x128xf32>
    %478 = arith.mulf %473, %477 : vector<8x128xf32>
    %479 = vector.extract_strided_slice %456 {offsets = [0, 0], sizes = [8, 16], strides = [1, 1]} : vector<8x128xf32> to vector<8x16xf32>
    %480 = vector.extract_strided_slice %434 {offsets = [0, 0], sizes = [8, 16], strides = [1, 1]} : vector<8x128xf32> to vector<8x16xf32>
    %cst_98 = arith.constant dense<0.000000e+00> : vector<8x512xf32>
    %481 = tpu.matmul %480, %16, %cst_98 {dimension_numbers = #tpu.dot_dimension_numbers<[1], [0], [0], [1], [0, 0, 1, 1], [], []>} : vector<8x16xf32>, vector<16x512xf32>, vector<8x512xf32> -> vector<8x512xf32>
    %482 = arith.addf %22, %481 : vector<8x512xf32>
    %cst_99 = arith.constant dense<0.000000e+00> : vector<8x512xf32>
    %483 = tpu.matmul %479, %12, %cst_99 {dimension_numbers = #tpu.dot_dimension_numbers<[1], [0], [0], [1], [0, 0, 1, 1], [], []>} : vector<8x16xf32>, vector<16x512xf32>, vector<8x512xf32> -> vector<8x512xf32>
    %484 = arith.addf %482, %483 : vector<8x512xf32>
    %485 = vector.extract_strided_slice %484 {offsets = [0, 0], sizes = [8, 384], strides = [1, 1]} : vector<8x512xf32> to vector<8x384xf32>
    %486 = arith.negf %485 : vector<8x384xf32>
    %487 = math.exp %486 : vector<8x384xf32>
    %cst_100 = arith.constant 1.000000e+00 : f32
    %488 = vector.broadcast %cst_100 : f32 to vector<8x384xf32>
    %489 = arith.addf %488, %487 : vector<8x384xf32>
    %490 = arith.divf %488, %489 : vector<8x384xf32>
    %491 = vector.extract_strided_slice %484 {offsets = [0, 384], sizes = [8, 128], strides = [1, 1]} : vector<8x512xf32> to vector<8x128xf32>
    %492 = math.tanh %491 : vector<8x128xf32>
    %493 = vector.extract_strided_slice %490 {offsets = [0, 0], sizes = [8, 128], strides = [1, 1]} : vector<8x384xf32> to vector<8x128xf32>
    %494 = vector.extract_strided_slice %490 {offsets = [0, 128], sizes = [8, 128], strides = [1, 1]} : vector<8x384xf32> to vector<8x128xf32>
    %495 = vector.extract_strided_slice %490 {offsets = [0, 256], sizes = [8, 128], strides = [1, 1]} : vector<8x384xf32> to vector<8x128xf32>
    %496 = arith.mulf %494, %454 : vector<8x128xf32>
    %497 = arith.mulf %493, %492 : vector<8x128xf32>
    %498 = arith.addf %496, %497 : vector<8x128xf32>
    %499 = math.tanh %498 : vector<8x128xf32>
    %500 = arith.mulf %495, %499 : vector<8x128xf32>
    %501 = vector.extract_strided_slice %478 {offsets = [0, 0], sizes = [8, 16], strides = [1, 1]} : vector<8x128xf32> to vector<8x16xf32>
    %502 = vector.extract_strided_slice %456 {offsets = [0, 0], sizes = [8, 16], strides = [1, 1]} : vector<8x128xf32> to vector<8x16xf32>
    %cst_101 = arith.constant dense<0.000000e+00> : vector<8x512xf32>
    %503 = tpu.matmul %502, %18, %cst_101 {dimension_numbers = #tpu.dot_dimension_numbers<[1], [0], [0], [1], [0, 0, 1, 1], [], []>} : vector<8x16xf32>, vector<16x512xf32>, vector<8x512xf32> -> vector<8x512xf32>
    %504 = arith.addf %26, %503 : vector<8x512xf32>
    %cst_102 = arith.constant dense<0.000000e+00> : vector<8x512xf32>
    %505 = tpu.matmul %501, %14, %cst_102 {dimension_numbers = #tpu.dot_dimension_numbers<[1], [0], [0], [1], [0, 0, 1, 1], [], []>} : vector<8x16xf32>, vector<16x512xf32>, vector<8x512xf32> -> vector<8x512xf32>
    %506 = arith.addf %504, %505 : vector<8x512xf32>
    %507 = vector.extract_strided_slice %506 {offsets = [0, 0], sizes = [8, 384], strides = [1, 1]} : vector<8x512xf32> to vector<8x384xf32>
    %508 = arith.negf %507 : vector<8x384xf32>
    %509 = math.exp %508 : vector<8x384xf32>
    %cst_103 = arith.constant 1.000000e+00 : f32
    %510 = vector.broadcast %cst_103 : f32 to vector<8x384xf32>
    %511 = arith.addf %510, %509 : vector<8x384xf32>
    %512 = arith.divf %510, %511 : vector<8x384xf32>
    %513 = vector.extract_strided_slice %506 {offsets = [0, 384], sizes = [8, 128], strides = [1, 1]} : vector<8x512xf32> to vector<8x128xf32>
    %514 = math.tanh %513 : vector<8x128xf32>
    %515 = vector.extract_strided_slice %512 {offsets = [0, 0], sizes = [8, 128], strides = [1, 1]} : vector<8x384xf32> to vector<8x128xf32>
    %516 = vector.extract_strided_slice %512 {offsets = [0, 128], sizes = [8, 128], strides = [1, 1]} : vector<8x384xf32> to vector<8x128xf32>
    %517 = vector.extract_strided_slice %512 {offsets = [0, 256], sizes = [8, 128], strides = [1, 1]} : vector<8x384xf32> to vector<8x128xf32>
    %518 = arith.mulf %516, %476 : vector<8x128xf32>
    %519 = arith.mulf %515, %514 : vector<8x128xf32>
    %520 = arith.addf %518, %519 : vector<8x128xf32>
    %521 = math.tanh %520 : vector<8x128xf32>
    %522 = arith.mulf %517, %521 : vector<8x128xf32>
    %523 = vector.extract_strided_slice %522 {offsets = [0, 0], sizes = [8, 16], strides = [1, 1]} : vector<8x128xf32> to vector<8x16xf32>
    %524 = vector.extract_strided_slice %500 {offsets = [0, 0], sizes = [8, 16], strides = [1, 1]} : vector<8x128xf32> to vector<8x16xf32>
    %cst_104 = arith.constant dense<0.000000e+00> : vector<8x512xf32>
    %525 = tpu.matmul %524, %18, %cst_104 {dimension_numbers = #tpu.dot_dimension_numbers<[1], [0], [0], [1], [0, 0, 1, 1], [], []>} : vector<8x16xf32>, vector<16x512xf32>, vector<8x512xf32> -> vector<8x512xf32>
    %526 = arith.addf %26, %525 : vector<8x512xf32>
    %cst_105 = arith.constant dense<0.000000e+00> : vector<8x512xf32>
    %527 = tpu.matmul %523, %14, %cst_105 {dimension_numbers = #tpu.dot_dimension_numbers<[1], [0], [0], [1], [0, 0, 1, 1], [], []>} : vector<8x16xf32>, vector<16x512xf32>, vector<8x512xf32> -> vector<8x512xf32>
    %528 = arith.addf %526, %527 : vector<8x512xf32>
    %529 = vector.extract_strided_slice %528 {offsets = [0, 0], sizes = [8, 384], strides = [1, 1]} : vector<8x512xf32> to vector<8x384xf32>
    %530 = arith.negf %529 : vector<8x384xf32>
    %531 = math.exp %530 : vector<8x384xf32>
    %cst_106 = arith.constant 1.000000e+00 : f32
    %532 = vector.broadcast %cst_106 : f32 to vector<8x384xf32>
    %533 = arith.addf %532, %531 : vector<8x384xf32>
    %534 = arith.divf %532, %533 : vector<8x384xf32>
    %535 = vector.extract_strided_slice %528 {offsets = [0, 384], sizes = [8, 128], strides = [1, 1]} : vector<8x512xf32> to vector<8x128xf32>
    %536 = math.tanh %535 : vector<8x128xf32>
    %537 = vector.extract_strided_slice %534 {offsets = [0, 0], sizes = [8, 128], strides = [1, 1]} : vector<8x384xf32> to vector<8x128xf32>
    %538 = vector.extract_strided_slice %534 {offsets = [0, 128], sizes = [8, 128], strides = [1, 1]} : vector<8x384xf32> to vector<8x128xf32>
    %539 = vector.extract_strided_slice %534 {offsets = [0, 256], sizes = [8, 128], strides = [1, 1]} : vector<8x384xf32> to vector<8x128xf32>
    %540 = arith.mulf %538, %520 : vector<8x128xf32>
    %541 = arith.mulf %537, %536 : vector<8x128xf32>
    %542 = arith.addf %540, %541 : vector<8x128xf32>
    %543 = math.tanh %542 : vector<8x128xf32>
    %544 = arith.mulf %539, %543 : vector<8x128xf32>
    %545 = vector.extract_strided_slice %544 {offsets = [0, 0], sizes = [2, 16], strides = [1, 1]} : vector<8x128xf32> to vector<2x16xf32>
    %c0_107 = arith.constant 0 : index
    %c0_108 = arith.constant 0 : index
    %546 = vector.load %arg4[%c0_107, %c0_108] : memref<16x20xf32, #tpu.memory_space<vmem>>, vector<16x20xf32>
    %cst_109 = arith.constant dense<0.000000e+00> : vector<2x20xf32>
    %547 = tpu.matmul %545, %546, %cst_109 {dimension_numbers = #tpu.dot_dimension_numbers<[1], [0], [0], [1], [0, 0, 1, 1], [], []>} : vector<2x16xf32>, vector<16x20xf32>, vector<2x20xf32> -> vector<2x20xf32>
    %c0_110 = arith.constant 0 : index
    %c0_111 = arith.constant 0 : index
    %548 = vector.load %arg5[%c0_110, %c0_111] : memref<1x20xf32, #tpu.memory_space<vmem>>, vector<1x20xf32>
    %549 = vector.broadcast %548 : vector<1x20xf32> to vector<2x20xf32>
    %550 = arith.addf %547, %549 : vector<2x20xf32>
    %cst_112 = arith.constant 0.000000e+00 : f32
    %551 = vector.broadcast %cst_112 : f32 to vector<2x20xf32>
    %552 = arith.maximumf %550, %551 : vector<2x20xf32>
    %c0_113 = arith.constant 0 : index
    %c0_114 = arith.constant 0 : index
    %553 = vector.load %arg6[%c0_113, %c0_114] : memref<1x20xf32, #tpu.memory_space<vmem>>, vector<1x20xf32>
    %c0_115 = arith.constant 0 : index
    %c0_116 = arith.constant 0 : index
    %554 = vector.load %arg7[%c0_115, %c0_116] : memref<1x20xf32, #tpu.memory_space<vmem>>, vector<1x20xf32>
    %cst_117 = arith.constant dense<0.000000e+00> : vector<20xf32>
    %555 = vector.multi_reduction <add>, %552, %cst_117 [0] : vector<2x20xf32> to vector<20xf32>
    %556 = vector.shape_cast %555 : vector<20xf32> to vector<1x20xf32>
    %cst_118 = arith.constant 2.000000e+00 : f32
    %557 = vector.broadcast %cst_118 : f32 to vector<1x20xf32>
    %558 = arith.divf %556, %557 : vector<1x20xf32>
    %559 = vector.broadcast %558 : vector<1x20xf32> to vector<2x20xf32>
    %560 = arith.subf %552, %559 : vector<2x20xf32>
    %561 = arith.mulf %560, %560 : vector<2x20xf32>
    %cst_119 = arith.constant dense<0.000000e+00> : vector<20xf32>
    %562 = vector.multi_reduction <add>, %561, %cst_119 [0] : vector<2x20xf32> to vector<20xf32>
    %563 = vector.shape_cast %562 : vector<20xf32> to vector<1x20xf32>
    %cst_120 = arith.constant 2.000000e+00 : f32
    %564 = vector.broadcast %cst_120 : f32 to vector<1x20xf32>
    %565 = arith.divf %563, %564 : vector<1x20xf32>
    %566 = vector.broadcast %558 : vector<1x20xf32> to vector<2x20xf32>
    %567 = arith.subf %552, %566 : vector<2x20xf32>
    %cst_121 = arith.constant 9.99999974E-6 : f32
    %568 = vector.broadcast %cst_121 : f32 to vector<1x20xf32>
    %569 = arith.addf %565, %568 : vector<1x20xf32>
    %570 = math.rsqrt %569 : vector<1x20xf32>
    %571 = vector.broadcast %570 : vector<1x20xf32> to vector<2x20xf32>
    %572 = arith.mulf %567, %571 : vector<2x20xf32>
    %573 = vector.broadcast %553 : vector<1x20xf32> to vector<2x20xf32>
    %574 = arith.mulf %572, %573 : vector<2x20xf32>
    %575 = vector.broadcast %554 : vector<1x20xf32> to vector<2x20xf32>
    %576 = arith.addf %574, %575 : vector<2x20xf32>
    %c0_122 = arith.constant 0 : index
    %c0_123 = arith.constant 0 : index
    %577 = vector.load %arg8[%c0_122, %c0_123] : memref<20x10xf32, #tpu.memory_space<vmem>>, vector<20x10xf32>
    %cst_124 = arith.constant dense<0.000000e+00> : vector<2x10xf32>
    %578 = tpu.matmul %576, %577, %cst_124 {dimension_numbers = #tpu.dot_dimension_numbers<[1], [0], [0], [1], [0, 0, 1, 1], [], []>} : vector<2x20xf32>, vector<20x10xf32>, vector<2x10xf32> -> vector<2x10xf32>
    %c0_125 = arith.constant 0 : index
    %c0_126 = arith.constant 0 : index
    %579 = vector.load %arg9[%c0_125, %c0_126] : memref<1x10xf32, #tpu.memory_space<vmem>>, vector<1x10xf32>
    %580 = vector.broadcast %579 : vector<1x10xf32> to vector<2x10xf32>
    %581 = arith.addf %578, %580 : vector<2x10xf32>
    %cst_127 = arith.constant 0.000000e+00 : f32
    %582 = vector.broadcast %cst_127 : f32 to vector<2x10xf32>
    %583 = arith.maximumf %581, %582 : vector<2x10xf32>
    %c0_128 = arith.constant 0 : index
    %c0_129 = arith.constant 0 : index
    %584 = vector.load %arg10[%c0_128, %c0_129] : memref<1x10xf32, #tpu.memory_space<vmem>>, vector<1x10xf32>
    %c0_130 = arith.constant 0 : index
    %c0_131 = arith.constant 0 : index
    %585 = vector.load %arg11[%c0_130, %c0_131] : memref<1x10xf32, #tpu.memory_space<vmem>>, vector<1x10xf32>
    %cst_132 = arith.constant dense<0.000000e+00> : vector<10xf32>
    %586 = vector.multi_reduction <add>, %583, %cst_132 [0] : vector<2x10xf32> to vector<10xf32>
    %587 = vector.shape_cast %586 : vector<10xf32> to vector<1x10xf32>
    %cst_133 = arith.constant 2.000000e+00 : f32
    %588 = vector.broadcast %cst_133 : f32 to vector<1x10xf32>
    %589 = arith.divf %587, %588 : vector<1x10xf32>
    %590 = vector.broadcast %589 : vector<1x10xf32> to vector<2x10xf32>
    %591 = arith.subf %583, %590 : vector<2x10xf32>
    %592 = arith.mulf %591, %591 : vector<2x10xf32>
    %cst_134 = arith.constant dense<0.000000e+00> : vector<10xf32>
    %593 = vector.multi_reduction <add>, %592, %cst_134 [0] : vector<2x10xf32> to vector<10xf32>
    %594 = vector.shape_cast %593 : vector<10xf32> to vector<1x10xf32>
    %cst_135 = arith.constant 2.000000e+00 : f32
    %595 = vector.broadcast %cst_135 : f32 to vector<1x10xf32>
    %596 = arith.divf %594, %595 : vector<1x10xf32>
    %597 = vector.broadcast %589 : vector<1x10xf32> to vector<2x10xf32>
    %598 = arith.subf %583, %597 : vector<2x10xf32>
    %cst_136 = arith.constant 9.99999974E-6 : f32
    %599 = vector.broadcast %cst_136 : f32 to vector<1x10xf32>
    %600 = arith.addf %596, %599 : vector<1x10xf32>
    %601 = math.rsqrt %600 : vector<1x10xf32>
    %602 = vector.broadcast %601 : vector<1x10xf32> to vector<2x10xf32>
    %603 = arith.mulf %598, %602 : vector<2x10xf32>
    %604 = vector.broadcast %584 : vector<1x10xf32> to vector<2x10xf32>
    %605 = arith.mulf %603, %604 : vector<2x10xf32>
    %606 = vector.broadcast %585 : vector<1x10xf32> to vector<2x10xf32>
    %607 = arith.addf %605, %606 : vector<2x10xf32>
    %c0_137 = arith.constant 0 : index
    %c0_138 = arith.constant 0 : index
    %608 = vector.load %arg12[%c0_137, %c0_138] : memref<10x3xf32, #tpu.memory_space<vmem>>, vector<10x3xf32>
    %cst_139 = arith.constant dense<0.000000e+00> : vector<2x3xf32>
    %609 = tpu.matmul %607, %608, %cst_139 {dimension_numbers = #tpu.dot_dimension_numbers<[1], [0], [0], [1], [0, 0, 1, 1], [], []>} : vector<2x10xf32>, vector<10x3xf32>, vector<2x3xf32> -> vector<2x3xf32>
    %c0_140 = arith.constant 0 : index
    %c0_141 = arith.constant 0 : index
    %610 = vector.load %arg13[%c0_140, %c0_141] : memref<1x3xf32, #tpu.memory_space<vmem>>, vector<1x3xf32>
    %611 = vector.broadcast %610 : vector<1x3xf32> to vector<2x3xf32>
    %612 = arith.addf %609, %611 : vector<2x3xf32>
    %cst_142 = arith.constant dense<0xFF800000> : vector<2xf32>
    %613 = vector.multi_reduction <maximumf>, %612, %cst_142 [1] : vector<2x3xf32> to vector<2xf32>
    %614 = vector.shape_cast %613 : vector<2xf32> to vector<2x1xf32>
    %615 = vector.broadcast %614 : vector<2x1xf32> to vector<2x3xf32>
    %616 = arith.subf %612, %615 : vector<2x3xf32>
    %617 = math.exp %616 : vector<2x3xf32>
    %cst_143 = arith.constant dense<0.000000e+00> : vector<2xf32>
    %618 = vector.multi_reduction <add>, %617, %cst_143 [1] : vector<2x3xf32> to vector<2xf32>
    %619 = vector.shape_cast %618 : vector<2xf32> to vector<2x1xf32>
    %620 = vector.broadcast %619 : vector<2x1xf32> to vector<2x3xf32>
    %621 = arith.divf %617, %620 : vector<2x3xf32>
    %c0_144 = arith.constant 0 : index
    %c0_145 = arith.constant 0 : index
    %622 = vector.load %arg14[%c0_144, %c0_145] : memref<2x3xf32, #tpu.memory_space<vmem>>, vector<2x3xf32>
    tpu.vector_store %arg14[%c0_144, %c0_145], %621 {strides = array<i32>} : memref<2x3xf32, #tpu.memory_space<vmem>>, vector<2x3xf32>,
    return
  }
}

</mosaic_0001>

<bundles_post_ra>
// kernel: lstm_model_forward.1
= control target key start
LH: loop header
LB: loop body
LE: loop exit
PB: predicated region body
PF: predicated region fallthrough
CT: control target
= control target key end

     0   :  { %19 = vsyncpa [#allocation4], 0  ;;  %s8274_s0 = inlined_call_operand.vmem [shape: f32[64,16], index: 0, kind: input, shape index: {}]   ;;  %s8275_s1 = inlined_call_operand.hbm [shape: f32[3,16,512], index: 1, kind: input, shape index: {}]   ;;  %s8276_s2 = inlined_call_operand.hbm [shape: f32[3,16,512], index: 2, kind: input, shape index: {}]   ;;  %s8277_s3 = inlined_call_operand.vmem [shape: f32[3,1,512], index: 3, kind: input, shape index: {}]   ;;  %s8278_s4 = inlined_call_operand.vmem [shape: f32[16,20], index: 4, kind: input, shape index: {}]   ;;  %s8279_s5 = inlined_call_operand.vmem [shape: f32[1,20], index: 5, kind: input, shape index: {}]   ;;  %s8280_s6 = inlined_call_operand.vmem [shape: f32[1,20], index: 6, kind: input, shape index: {}]   ;;  %s8281_s7 = inlined_call_operand.vmem [shape: f32[1,20], index: 7, kind: input, shape index: {}]   ;;  %s8282_s8 = inlined_call_operand.vmem [shape: f32[20,10], index: 8, kind: input, shape index: {}]   ;;  %s8283_s9 = inlined_call_operand.vmem [shape: f32[1,10], index: 9, kind: input, shape index: {}]   ;;  %s8284_s10 = inlined_call_operand.vmem [shape: f32[1,10], index: 10, kind: input, shape index: {}]   ;;  %s8285_s11 = inlined_call_operand.vmem [shape: f32[1,10], index: 11, kind: input, shape index: {}]   ;;  %s8286_s12 = inlined_call_operand.vmem [shape: f32[10,3], index: 12, kind: input, shape index: {}]   ;;  %s8287_s13 = inlined_call_operand.vmem [shape: f32[1,3], index: 13, kind: input, shape index: {}]   ;;  %s8288_s14 = inlined_call_operand.hbm [shape: f32[2,3], index: 14, kind: output, shape index: {}]  }
   0x1   :  { %20 = vsyncpa [#allocation7], 0 }
   0x2   :  { %21 = vsyncpa [#allocation5], 0  ;;  %s28_s15 = sshll.u32 %s8275_s1, 4  ;;  %s6451_s16 = smov [#allocation3]   ;;  %s29_s15 = int_to_ptr.hbm [resolvable:$true] %s28_s15 }
   0x3   :  { %s30_s17 = sshll.u32 %s6451_s16, 4  ;;  %s41_s20 = sshll.u32 %s8276_s2, 4  ;;  %s31_s17 = int_to_ptr.vmem [resolvable:$true] %s30_s17  ;;  %s42_s20 = int_to_ptr.hbm [resolvable:$true] %s41_s20 }
   0x4   :  { %s6452_s21 = smov 512   ;;  %s6453_s22 = smov 32  }
   0x5   :  { %36 = dma.hbm_to_vmem [thread:$0]  %s29_s15, 3072, %s31_s17, [#allocation4], %s6452_s21, %s6452_s21, %s6453_s22  }
   0x6   :  { %s6454_s23 = smov [#allocation6]  }
   0x7   :  { %s43_s24 = sshll.u32 %s6454_s23, 4  ;;  %s44_s24 = int_to_ptr.vmem [resolvable:$true] %s43_s24 }
   0x8   :  { %49 = dma.hbm_to_vmem [thread:$0]  %s42_s20, 3072, %s44_s24, [#allocation7], %s6452_s21, %s6452_s21, %s6453_s22  }
   0x9   :  { %6445 = dma.done.wait [#allocation4], 3072  }
   0xa   :  { %6446 = vsyncadd [#allocation4], 4294964224 }
   0xb   :  { %6447 = dma.done.wait [#allocation7], 3072  }
   0xc   :  { %6448 = vsyncadd [#allocation7], 4294964224  ;;  %v92_v0 = vld [vmem:[#allocation3 + $0x20] sm:$0xff]  ;;  %v93_v1 = vld [vmem:[#allocation3 + $0x28] sm:$0xff]  ;;  %vm106_vm0 = vcmask 130048   ;;  %v8289_v24 = vmov 0.0  }
   0xd   :  { %v94_v2 = vld [vmem:[#allocation3 + $0x30] sm:$0xff]  ;;  %145 = vmatpush.msra.mxu0 %v92_v0  ;;  %186 = vmatpush.msra.mxu1 %v93_v1  ;;  %v95_v3 = vld [vmem:[#allocation3 + $0x38] sm:$0xff]  ;;  %v88_v4 = vld [vmem:[#allocation3] sm:$0xff]  ;;  %s5591_s27 = sshll.u32 %s8288_s14, 4  ;;  %s5592_s27 = int_to_ptr.hbm [resolvable:$true] %s5591_s27 }
   0xe   :  { %v89_v5 = vld [vmem:[#allocation3 + $0x8] sm:$0xff]  ;;  %227 = vmatpush.msra.mxu2 %v94_v2  ;;  %268 = vmatpush.msra.mxu3 %v95_v3  ;;  %v90_v6 = vld [vmem:[#allocation3 + $0x10] sm:$0xff]  ;;  %v91_v7 = vld [vmem:[#allocation3 + $0x18] sm:$0xff] }
   0xf   :  { %v80_v8 = vld [vmem:[%s8274_s0] sm:$0xff]  ;;  %146 = vmatpush.msra.mxu0 %v88_v4  ;;  %187 = vmatpush.msra.mxu1 %v89_v5  ;;  %v6544_v10 = vld [vmem:[#allocation6 + $0x28] sm:$0xff]  ;;  %v6548_v11 = vld [vmem:[#allocation6 + $0x30] sm:$0xff] }
  0x10   :  { %228 = vmatpush.msra.mxu2 %v90_v6  ;;  %269 = vmatpush.msra.mxu3 %v91_v7  ;;  %v6542_v9 = vld [vmem:[#allocation6 + $0x20] sm:$0xff]  ;;  %v6550_v12 = vld [vmem:[#allocation6 + $0x38] sm:$0xff]  ;;  %v6556_v14 = vld [vmem:[#allocation6 + $0x8] sm:$0xff] }
  0x11   :  { %5602 = vmatmul.msk.f32.vlgmr.msra.gmra.mxu0 %vm106_vm0, %v80_v8  ;;  %5610 = vmatmul.msk.f32.vlgmr.msra.gmra.mxu1 %vm106_vm0, %v80_v8  ;;  %v6554_v13 = vld [vmem:[#allocation6] sm:$0xff]  ;;  %v6560_v15 = vld [vmem:[#allocation6 + $0x10] sm:$0xff]  ;;  %v81_v16 = vld [vmem:[%s8274_s0 + $0x8] sm:$0xff] }
  0x12   :  { %5618 = vmatmul.msk.f32.vlgmr.msra.gmra.mxu2 %vm106_vm0, %v80_v8  ;;  %5626 = vmatmul.msk.f32.vlgmr.msra.gmra.mxu3 %vm106_vm0, %v80_v8  ;;  %v6578_v17 = vld [vmem:[#allocation6 + $0x18] sm:$0xff]  ;;  %v82_v18 = vld [vmem:[%s8274_s0 + $0x10] sm:$0xff]  ;;  %v84_v20 = vld [vmem:[%s8274_s0 + $0x20] sm:$0xff] }
  0x13   :  { %414 = vmatpush.msrb.mxu0 %v6542_v9  ;;  %434 = vmatpush.msrb.mxu1 %v6544_v10  ;;  %v83_v19 = vld [vmem:[%s8274_s0 + $0x18] sm:$0xff]  ;;  %v85_v21 = vld [vmem:[%s8274_s0 + $0x28] sm:$0xff]  ;;  %v86_v22 = vld [vmem:[%s8274_s0 + $0x30] sm:$0xff] }
  0x14   :  { %454 = vmatpush.msrb.mxu2 %v6548_v11  ;;  %474 = vmatpush.msrb.mxu3 %v6550_v12  ;;  %v87_v23 = vld [vmem:[%s8274_s0 + $0x38] sm:$0xff]  ;;  %v96_v52 = vld [vmem:[%s8277_s3] sm:$0xf] }
  0x15   :  { %415 = vmatpush.msrb.mxu0 %v6554_v13  ;;  %435 = vmatpush.msrb.mxu1 %v6556_v14  ;;  %v6686_v55 = vperm.slane %v96_v52, 0  ;;  %v6688_v56 = vperm.slane %v96_v52, 1  ;;  %v6696_v1 = vperm.slane %v96_v52, 2 }
  0x16   :  { %455 = vmatpush.msrb.mxu2 %v6560_v15  ;;  %475 = vmatpush.msrb.mxu3 %v6578_v17 }
  0x17   :  { %568 = vmatpush.msra.mxu0 %v6542_v9  ;;  %588 = vmatpush.msra.mxu1 %v6544_v10 }
  0x18   :  { %608 = vmatpush.msra.mxu2 %v6548_v11  ;;  %628 = vmatpush.msra.mxu3 %v6550_v12 }
  0x19   :  { %569 = vmatpush.msra.mxu0 %v6554_v13  ;;  %5611 = vmatmul.msk.f32.gmra.mxu1 %vm106_vm0, %v81_v16 }
  0x1a   :  { %5603 = vmatmul.msk.f32.gmra.mxu0 %vm106_vm0, %v81_v16  ;;  %5619 = vmatmul.msk.f32.gmra.mxu2 %vm106_vm0, %v81_v16 }
  0x1b   :  { %5627 = vmatmul.msk.f32.gmra.mxu3 %vm106_vm0, %v81_v16  ;;  %589 = vmatpush.msra.mxu1 %v6556_v14 }
  0x1c   :  { %609 = vmatpush.msra.mxu2 %v6560_v15  ;;  %629 = vmatpush.msra.mxu3 %v6578_v17 }
  0x21   :  { %5612 = vmatmul.msk.f32.gmra.mxu1 %vm106_vm0, %v82_v18 }
  0x22   :  { %5604 = vmatmul.msk.f32.gmra.mxu0 %vm106_vm0, %v82_v18  ;;  %5620 = vmatmul.msk.f32.gmra.mxu2 %vm106_vm0, %v82_v18 }
  0x23   :  { %5628 = vmatmul.msk.f32.gmra.mxu3 %vm106_vm0, %v82_v18 }
  0x29   :  { %5613 = vmatmul.msk.f32.gmra.mxu1 %vm106_vm0, %v83_v19 }
  0x2a   :  { %5605 = vmatmul.msk.f32.gmra.mxu0 %vm106_vm0, %v83_v19  ;;  %5621 = vmatmul.msk.f32.gmra.mxu2 %vm106_vm0, %v83_v19 }
  0x2b   :  { %5629 = vmatmul.msk.f32.gmra.mxu3 %vm106_vm0, %v83_v19 }
  0x31   :  { %5614 = vmatmul.msk.f32.gmra.mxu1 %vm106_vm0, %v84_v20 }
  0x32   :  { %5606 = vmatmul.msk.f32.gmra.mxu0 %vm106_vm0, %v84_v20  ;;  %5622 = vmatmul.msk.f32.gmra.mxu2 %vm106_vm0, %v84_v20 }
  0x33   :  { %5630 = vmatmul.msk.f32.gmra.mxu3 %vm106_vm0, %v84_v20 }
  0x39   :  { %5615 = vmatmul.msk.f32.gmra.mxu1 %vm106_vm0, %v85_v21 }
  0x3a   :  { %5607 = vmatmul.msk.f32.gmra.mxu0 %vm106_vm0, %v85_v21  ;;  %5623 = vmatmul.msk.f32.gmra.mxu2 %vm106_vm0, %v85_v21 }
  0x3b   :  { %5631 = vmatmul.msk.f32.gmra.mxu3 %vm106_vm0, %v85_v21  ;;  %v6701_v21 = vperm.slane %v96_v52, 3  ;;  %v6719_v52 = vld [vmem:[#allocation3 + $0x50] sm:$0xff] }
  0x41   :  { %5616 = vmatmul.msk.f32.gmra.mxu1 %vm106_vm0, %v86_v22 }
  0x42   :  { %5608 = vmatmul.msk.f32.gmra.mxu0 %vm106_vm0, %v86_v22  ;;  %5624 = vmatmul.msk.f32.gmra.mxu2 %vm106_vm0, %v86_v22 }
  0x43   :  { %5632 = vmatmul.msk.f32.gmra.mxu3 %vm106_vm0, %v86_v22  ;;  %v6703_v22 = vld [vmem:[#allocation3 + $0x60] sm:$0xff] }
  0x49   :  { %5617 = vmatmul.msk.f32.gmra.mxu1 %vm106_vm0, %v87_v23 }
  0x4a   :  { %5609 = vmatmul.msk.f32.gmra.mxu0 %vm106_vm0, %v87_v23  ;;  %5625 = vmatmul.msk.f32.gmra.mxu2 %vm106_vm0, %v87_v23 }
  0x4b   :  { %5633 = vmatmul.msk.f32.gmra.mxu3 %vm106_vm0, %v87_v23  ;;  %v6705_v23 = vld [vmem:[#allocation3 + $0x68] sm:$0xff] }
  0x51   :  { %436 = vmatmul.f32.vlgmr.msrb.gmra.mxu1 %v8289_v24 }
  0x52   :  { %416 = vmatmul.f32.vlgmr.msrb.gmra.mxu0 %v8289_v24  ;;  %456 = vmatmul.f32.vlgmr.msrb.gmra.mxu2 %v8289_v24 }
  0x53   :  { %476 = vmatmul.f32.vlgmr.msrb.gmra.mxu3 %v8289_v24  ;;  %715 = vmatpush.msrb.mxu0 %v6703_v22 }
  0x54   :  { %735 = vmatpush.msrb.mxu1 %v6705_v23 }
  0x8e   :  { %v148_v25 = vpop.f32.mrf.mxu0  ;;  %v189_v26 = vpop.f32.mrf.mxu1 }
  0x8f   :  { %v149_v58 = vadd.f32 %v148_v25, %v6686_v55  ;;  %v190_v59 = vadd.f32 %v189_v26, %v6688_v56  ;;  %v6707_v25 = vld [vmem:[#allocation3 + $0x40] sm:$0xff]  ;;  %v6711_v26 = vld [vmem:[#allocation3 + $0x48] sm:$0xff] }
  0x90   :  { %716 = vmatpush.msrb.mxu0 %v6707_v25  ;;  %736 = vmatpush.msrb.mxu1 %v6711_v26 }
  0x95   :  { %v230_v27 = vpop.f32.mrf.mxu2  ;;  %v6631_v28 = vpop.f32.mrf.mxu3 }
  0x96   :  { %v6635_v30 = vpop.f32.mrf.mxu1  ;;  %v231_v4 = vadd.f32 %v230_v27, %v6696_v1  ;;  %v6713_v27 = vld [vmem:[#allocation3 + $0x70] sm:$0xff] }
  0x97   :  { %v6633_v29 = vpop.f32.mrf.mxu0  ;;  %755 = vmatpush.msrb.mxu2 %v6713_v27 }
  0x99   :  { %756 = vmatpush.msrb.mxu2 %v6719_v52 }
  0x9d   :  { %v6637_v31 = vpop.f32.mrf.mxu2 }
  0x9e   :  { %v6639_v32 = vpop.f32.mrf.mxu3  ;;  %v6643_v34 = vpop.f32.mrf.mxu1 }
  0x9f   :  { %v6641_v33 = vpop.f32.mrf.mxu0 }
  0xa5   :  { %v6645_v35 = vpop.f32.mrf.mxu2 }
  0xa6   :  { %v6647_v36 = vpop.f32.mrf.mxu3  ;;  %v6651_v38 = vpop.f32.mrf.mxu1 }
  0xa7   :  { %v6649_v37 = vpop.f32.mrf.mxu0  ;;  %8314 = vst [vmem:[#allocation13_spill] sm:$0xff] %v6651_v38 }
  0xa8   :  { %8313 = vst [vmem:[#allocation12_spill] sm:$0xff] %v6649_v37 }
  0xad   :  { %v6653_v39 = vpop.f32.mrf.mxu2 }
  0xae   :  { %8315 = vst [vmem:[#allocation14_spill] sm:$0xff] %v6653_v39  ;;  %v6655_v40 = vpop.f32.mrf.mxu3  ;;  %v6659_v42 = vpop.f32.mrf.mxu1 }
  0xaf   :  { %8316 = vst [vmem:[#allocation15_spill] sm:$0xff] %v6655_v40  ;;  %v6657_v41 = vpop.f32.mrf.mxu0 }
  0xb0   :  { %8317 = vst [vmem:[#allocation16_spill] sm:$0xff] %v6657_v41 }
  0xb1   :  { %8318 = vst [vmem:[#allocation17_spill] sm:$0xff] %v6659_v42 }
  0xb5   :  { %v6661_v43 = vpop.f32.mrf.mxu2 }
  0xb6   :  { %8319 = vst [vmem:[#allocation18_spill] sm:$0xff] %v6661_v43  ;;  %v6665_v45 = vpop.f32.mrf.mxu1  ;;  %v6667_v46 = vpop.f32.mrf.mxu3 }
  0xb7   :  { %v6663_v44 = vpop.f32.mrf.mxu0  ;;  %8321 = vst [vmem:[#allocation20_spill] sm:$0xff] %v6665_v45 }
  0xb8   :  { %8320 = vst [vmem:[#allocation19_spill] sm:$0xff] %v6663_v44 }
  0xb9   :  { %8322 = vst [vmem:[#allocation21_spill] sm:$0xff] %v6667_v46 }
  0xbd   :  { %v6669_v47 = vpop.f32.mrf.mxu2 }
  0xbe   :  { %8323 = vst [vmem:[#allocation22_spill] sm:$0xff] %v6669_v47  ;;  %v6673_v49 = vpop.f32.mrf.mxu1  ;;  %v6675_v50 = vpop.f32.mrf.mxu3 }
  0xbf   :  { %v6671_v48 = vpop.f32.mrf.mxu0  ;;  %8325 = vst [vmem:[#allocation24_spill] sm:$0xff] %v6673_v49 }
  0xc0   :  { %8324 = vst [vmem:[#allocation23_spill] sm:$0xff] %v6671_v48 }
  0xc1   :  { %8326 = vst [vmem:[#allocation25_spill] sm:$0xff] %v6675_v50 }
  0xc5   :  { %v6677_v51 = vpop.f32.mrf.mxu2 }
  0xc6   :  { %8327 = vst [vmem:[#allocation26_spill] sm:$0xff] %v6677_v51  ;;  %v6684_v54 = vpop.f32.mrf.mxu1  ;;  %v6690_v57 = vpop.f32.mrf.mxu3 }
  0xc7   :  { %v6682_v53 = vpop.f32.mrf.mxu0  ;;  %8329 = vst [vmem:[#allocation28_spill] sm:$0xff] %v6684_v54 }
  0xc8   :  { %8328 = vst [vmem:[#allocation27_spill] sm:$0xff] %v6682_v53 }
  0xc9   :  { %8330 = vst [vmem:[#allocation29_spill] sm:$0xff] %v6690_v57 }
  0xcd   :  { %v6694_v60 = vpop.f32.mrf.mxu2 }
  0xce   :  { %8331 = vst [vmem:[#allocation30_spill] sm:$0xff] %v6694_v60  ;;  %v437_v62 = vpop.f32.mrf.mxu1  ;;  %v6699_v5 = vpop.f32.mrf.mxu3 }
  0xcf   :  { %v417_v61 = vpop.f32.mrf.mxu0  ;;  %v481_v0 = vadd.f32 %v437_v62, %v190_v59  ;;  %8332 = vst [vmem:[#allocation31_spill] sm:$0xff] %v6699_v5  ;;  %v6721_v59 = vld [vmem:[#allocation3 + $0x58] sm:$0xff] }
  0xd0   :  { %v480_v63 = vadd.f32 %v417_v61, %v149_v58  ;;  %v6715_v58 = vld [vmem:[#allocation3 + $0x78] sm:$0xff] }
  0xd1   :  { %v5637_v3 = vmul.f32 -1.442695, %v481_v0  ;;  %775 = vmatpush.msrb.mxu3 %v6715_v58 }
  0xd2   :  { %v5636_v2 = vmul.f32 -1.442695, %v480_v63  ;;  %v272_v63 = vadd.f32 %v6631_v28, %v6701_v21 }
  0xd3   :  { %776 = vmatpush.msrb.mxu3 %v6721_v59 }
  0xd4   :  { %5875 = vpow2.f32 %v5636_v2 }
  0xd5   :  { %5877 = vpow2.f32 %v5637_v3  ;;  %v457_v6 = vpop.f32.mrf.mxu2 }
  0xd6   :  { %v482_v7 = vadd.f32 %v457_v6, %v231_v4  ;;  %v477_v61 = vpop.f32.mrf.mxu3 }
  0xd7   :  { %v483_v3 = vadd.f32 %v477_v61, %v272_v63 }
  0xd8   :  { %v5638_v8 = vmul.f32 -1.442695, %v482_v7 }
  0xda   :  { %v5876_v16 = vpop.eup %5875  ;;  %5879 = vpow2.f32 %v5638_v8 }
  0xdb   :  { %v5878_v18 = vpop.eup %5877  ;;  %v493_v19 = vadd.f32 1.0, %v5876_v16 }
  0xdc   :  { %v494_v20 = vadd.f32 1.0, %v5878_v18 }
  0xdd   :  { %5881 = vrcp.f32 %v493_v19  ;;  %v507_v18 = vand.u32 2147483648, %v493_v19  ;;  %v505_v60 = vand.u32 2147483647, %v493_v19  ;;  %vm501_vm3 = vweird.f32 %v493_v19 }
  0xde   :  { %5883 = vrcp.f32 %v494_v20  ;;  %v522_v24 = vand.u32 2147483648, %v494_v20  ;;  %v520_v54 = vand.u32 2147483647, %v494_v20  ;;  %vm516_vm4 = vweird.f32 %v494_v20 }
  0xdf   :  { %vm506_vm6 = vcmp.eq.f32.partialorder %v505_v60, 8.507059e+37 }
  0xe0   :  { %v5880_v62 = vpop.eup %5879  ;;  %v523_v51 = vor.u32 1.1754944e-38, %v522_v24  ;;  %vm521_vm8 = vcmp.eq.f32.partialorder %v520_v54, 8.507059e+37 }
  0xe1   :  { %v495_v0 = vadd.f32 1.0, %v5880_v62  ;;  %v508_v62 = vor.u32 1.1754944e-38, %v507_v18  ;;  %v6752_v18 = vld [vmem:[#allocation6 + $0x58] sm:$0xff] }
  0xe3   :  { %v5882_v2 = vpop.eup %5881  ;;  %5885 = vrcp.f32 %v495_v0  ;;  %vm531_vm10 = vweird.f32 %v495_v0  ;;  %v535_v24 = vand.u32 2147483647, %v495_v0 }
  0xe4   :  { %v5884_v4 = vpop.eup %5883  ;;  %v497_v6 = vmul.f32 %v5882_v2, %v493_v19  ;;  %5887 = vtanh.f32 %v483_v3  ;;  %vm502_vm1 = vweird.f32 %v5882_v2 }
  0xe5   :  { %v512_v7 = vmul.f32 %v5884_v4, %v494_v20  ;;  %vm517_vm2 = vweird.f32 %v5884_v4  ;;  %vm503_vm5 = vmor %vm501_vm3, %vm502_vm1  ;;  %v537_v20 = vand.u32 2147483648, %v495_v0  ;;  %vm536_vm12 = vcmp.eq.f32.partialorder %v535_v24, 8.507059e+37 }
  0xe6   :  { %v498_v8 = vsub.f32 1.0, %v497_v6  ;;  %vm518_vm7 = vmor %vm516_vm4, %vm517_vm2 }
  0xe7   :  { %v513_v16 = vsub.f32 1.0, %v512_v7  ;;  %v538_v60 = vor.u32 1.1754944e-38, %v537_v20 }
  0xe8   :  { %v499_v5 = vmul.f32 %v5882_v2, %v498_v8 }
  0xe9   :  { %v514_v28 = vmul.f32 %v5884_v4, %v513_v16  ;;  %v5886_v53 = vpop.eup %5885 }
  0xea   :  { %v500_v57 = vadd.f32 %v5882_v2, %v499_v5  ;;  %v527_v61 = vmul.f32 %v5886_v53, %v495_v0  ;;  %v5888_v3 = vpop.eup %5887  ;;  %vm532_vm9 = vweird.f32 %v5886_v53  ;;  %v6750_v0 = vld [vmem:[#allocation6 + $0x50] sm:$0xff] }
  0xeb   :  { %v515_v63 = vadd.f32 %v5884_v4, %v514_v28  ;;  %vm533_vm11 = vmor %vm531_vm10, %vm532_vm9  ;;  %v8333_v28 = vmov 0.0  }
  0xec   :  { %v504_v6 = vsel %vm503_vm5, %v5882_v2, %v500_v57  ;;  %v528_v7 = vsub.f32 1.0, %v527_v61  ;;  %v152_v61 = vadd.f32 %v6633_v29, %v6686_v55  ;;  %v6793_v29 = vld [vmem:[%s8277_s3 + $0x4] sm:$0xf] }
  0xed   :  { %v509_v8 = vsel %vm506_vm6, %v508_v62, %v504_v6  ;;  %v519_v49 = vsel %vm518_vm7, %v5884_v4, %v515_v63  ;;  %v193_v62 = vadd.f32 %v6635_v30, %v6688_v56 }
  0xee   :  { %v524_v16 = vsel %vm521_vm8, %v523_v51, %v519_v49  ;;  %v543_v48 = vmul.f32 %v5888_v3, %v509_v8  ;;  %v529_v50 = vmul.f32 %v5886_v53, %v528_v7  ;;  %v6732_v49 = vld [vmem:[#allocation6 + $0x60] sm:$0xff]  ;;  %v6734_v51 = vld [vmem:[#allocation6 + $0x68] sm:$0xff] }
  0xef   :  { %v542_v47 = vmul.f32 0.0, %v524_v16 }
  0xf0   :  { %v530_v19 = vadd.f32 %v5886_v53, %v529_v50  ;;  %v6744_v50 = vld [vmem:[#allocation6 + $0x40] sm:$0xff] }
  0xf1   :  { %v6729_v5 = vadd.f32 %v543_v48, %v542_v47  ;;  %v6738_v47 = vld [vmem:[#allocation6 + $0x70] sm:$0xff]  ;;  %v6740_v48 = vld [vmem:[#allocation6 + $0x78] sm:$0xff] }
  0xf2   :  { %v534_v57 = vsel %vm533_vm11, %v5886_v53, %v530_v19  ;;  %v6746_v53 = vld [vmem:[#allocation6 + $0x48] sm:$0xff]  ;;  %v234_v19 = vadd.f32 %v6637_v31, %v6696_v1 }
  0xf3   :  { %5889 = vtanh.f32 %v6729_v5  ;;  %v539_v4 = vsel %vm536_vm12, %v538_v60, %v534_v57 }
  0xf9   :  { %v5890_v2 = vpop.eup %5889 }
  0xfa   :  { %v546_v54 = vmul.f32 %v5890_v2, %v539_v4  ;;  %v6796_v4 = vperm.slane %v6793_v29, 0 }
  0xfc   :  { %5639 = vmatmul.msk.f32.vlgmr.msra.gmra.mxu0 %vm106_vm0, %v546_v54  ;;  %5640 = vmatmul.msk.f32.vlgmr.msra.gmra.mxu1 %vm106_vm0, %v546_v54 }
  0xfd   :  { %5641 = vmatmul.msk.f32.vlgmr.msra.gmra.mxu2 %vm106_vm0, %v546_v54  ;;  %5642 = vmatmul.msk.f32.vlgmr.msra.gmra.mxu3 %vm106_vm0, %v546_v54 }
  0xfe   :  { %799 = vmatpush.msra.mxu0 %v6732_v49  ;;  %819 = vmatpush.msra.mxu1 %v6734_v51 }
  0xff   :  { %839 = vmatpush.msra.mxu2 %v6738_v47  ;;  %859 = vmatpush.msra.mxu3 %v6740_v48 }
 0x100   :  { %800 = vmatpush.msra.mxu0 %v6744_v50  ;;  %820 = vmatpush.msra.mxu1 %v6746_v53 }
 0x101   :  { %840 = vmatpush.msra.mxu2 %v6750_v0  ;;  %860 = vmatpush.msra.mxu3 %v6752_v18 }
 0x104   :  { %5646 = vmatmul.msk.f32.vlgmr.msrb.gmra.mxu0 %vm106_vm0, %v546_v54  ;;  %5647 = vmatmul.msk.f32.vlgmr.msrb.gmra.mxu1 %vm106_vm0, %v546_v54 }
 0x105   :  { %5648 = vmatmul.msk.f32.vlgmr.msrb.gmra.mxu2 %vm106_vm0, %v546_v54  ;;  %5649 = vmatmul.msk.f32.vlgmr.msrb.gmra.mxu3 %vm106_vm0, %v546_v54  ;;  %v6799_v54 = vperm.slane %v6793_v29, 1 }
 0x106   :  { %953 = vmatpush.msrb.mxu0 %v6542_v9  ;;  %973 = vmatpush.msrb.mxu1 %v6544_v10 }
 0x107   :  { %993 = vmatpush.msrb.mxu2 %v6548_v11  ;;  %1013 = vmatpush.msrb.mxu3 %v6550_v12  ;;  %8334 = vst [vmem:[#allocation32_spill] sm:$0xff] %v6799_v54 }
 0x108   :  { %954 = vmatpush.msrb.mxu0 %v6554_v13  ;;  %974 = vmatpush.msrb.mxu1 %v6556_v14 }
 0x109   :  { %994 = vmatpush.msrb.mxu2 %v6560_v15  ;;  %1014 = vmatpush.msrb.mxu3 %v6578_v17 }
 0x10c   :  { %801 = vmatmul.f32.vlgmr.msra.gmra.mxu0 %v8333_v28  ;;  %821 = vmatmul.f32.vlgmr.msra.gmra.mxu1 %v8333_v28 }
 0x10d   :  { %841 = vmatmul.f32.vlgmr.msra.gmra.mxu2 %v8333_v28  ;;  %861 = vmatmul.f32.vlgmr.msra.gmra.mxu3 %v8333_v28 }
 0x10e   :  { %1100 = vmatpush.msra.mxu0 %v6703_v22  ;;  %1120 = vmatpush.msra.mxu1 %v6705_v23 }
 0x10f   :  { %1140 = vmatpush.msra.mxu2 %v6713_v27  ;;  %1160 = vmatpush.msra.mxu3 %v6715_v58 }
 0x110   :  { %1101 = vmatpush.msra.mxu0 %v6707_v25  ;;  %1121 = vmatpush.msra.mxu1 %v6711_v26 }
 0x111   :  { %1141 = vmatpush.msra.mxu2 %v6719_v52  ;;  %1161 = vmatpush.msra.mxu3 %v6721_v59 }
 0x179   :  { %v571_v63 = vpop.f32.mrf.mxu0  ;;  %v591_v6 = vpop.f32.mrf.mxu1 }
 0x17a   :  { %v634_v3 = vadd.f32 %v571_v63, %v152_v61  ;;  %v635_v7 = vadd.f32 %v591_v6, %v193_v62 }
 0x17c   :  { %v5643_v8 = vmul.f32 -1.442695, %v634_v3  ;;  %v5644_v16 = vmul.f32 -1.442695, %v635_v7 }
 0x17e   :  { %5891 = vpow2.f32 %v5643_v8  ;;  %v275_v8 = vadd.f32 %v6639_v32, %v6701_v21 }
 0x17f   :  { %5893 = vpow2.f32 %v5644_v16 }
 0x180   :  { %v611_v20 = vpop.f32.mrf.mxu2  ;;  %v631_v63 = vpop.f32.mrf.mxu3 }
 0x181   :  { %v636_v24 = vadd.f32 %v611_v20, %v234_v19  ;;  %v718_v57 = vpop.f32.mrf.mxu0  ;;  %v738_v30 = vpop.f32.mrf.mxu1  ;;  %v637_v44 = vadd.f32 %v631_v63, %v275_v8 }
 0x182   :  { %v781_v6 = vadd.f32 %v718_v57, %v6796_v4  ;;  %v782_v3 = vadd.f32 %v738_v30, %v6799_v54 }
 0x183   :  { %v5645_v60 = vmul.f32 -1.442695, %v636_v24 }
 0x184   :  { %v5892_v2 = vpop.eup %5891 }
 0x185   :  { %v5894_v61 = vpop.eup %5893  ;;  %v647_v31 = vadd.f32 1.0, %v5892_v2  ;;  %5895 = vpow2.f32 %v5645_v60  ;;  %v6806_v60 = vperm.slane %v6793_v29, 2 }
 0x186   :  { %v648_v62 = vadd.f32 1.0, %v5894_v61 }
 0x187   :  { %5897 = vrcp.f32 %v647_v31  ;;  %8335 = vst [vmem:[#allocation33_spill] sm:$0xff] %v6806_v60  ;;  %vm655_vm1 = vweird.f32 %v647_v31 }
 0x188   :  { %5899 = vrcp.f32 %v648_v62  ;;  %v758_v7 = vpop.f32.mrf.mxu2  ;;  %vm670_vm15 = vweird.f32 %v648_v62 }
 0x189   :  { %v802_v16 = vpop.f32.mrf.mxu0  ;;  %v822_v19 = vpop.f32.mrf.mxu1  ;;  %v783_v32 = vadd.f32 %v758_v7, %v6806_v60  ;;  %v6814_v60 = vperm.slane %v6793_v29, 3 }
 0x18a   :  { %v865_v20 = vadd.f32 %v802_v16, %v781_v6  ;;  %v866_v24 = vadd.f32 %v822_v19, %v782_v3  ;;  %v659_v3 = vand.u32 2147483647, %v647_v31  ;;  %v661_v16 = vand.u32 2147483648, %v647_v31  ;;  %v778_v19 = vpop.f32.mrf.mxu3 }
 0x18b   :  { %v5896_v45 = vpop.eup %5895 }
 0x18c   :  { %v6808_v2 = vadd.f32 1.0, %v5896_v45  ;;  %v5650_v61 = vmul.f32 -1.442695, %v865_v20  ;;  %v5651_v57 = vmul.f32 -1.442695, %v866_v24  ;;  %v676_v20 = vand.u32 2147483648, %v648_v62 }
 0x18d   :  { %v5898_v46 = vpop.eup %5897  ;;  %v674_v24 = vand.u32 2147483647, %v648_v62  ;;  %vm660_vm4 = vcmp.eq.f32.partialorder %v659_v3, 8.507059e+37 }
 0x18e   :  { %v5900_v43 = vpop.eup %5899  ;;  %v651_v30 = vmul.f32 %v5898_v46, %v647_v31  ;;  %5901 = vrcp.f32 %v6808_v2  ;;  %vm656_vm13 = vweird.f32 %v5898_v46  ;;  %v691_v29 = vand.u32 2147483648, %v6808_v2 }
 0x18f   :  { %v666_v42 = vmul.f32 %v5900_v43, %v648_v62  ;;  %5903 = vtanh.f32 %v637_v44  ;;  %vm671_vm14 = vweird.f32 %v5900_v43  ;;  %vm657_vm2 = vmor %vm655_vm1, %vm656_vm13  ;;  %vm675_vm5 = vcmp.eq.f32.partialorder %v674_v24, 8.507059e+37 }
 0x190   :  { %v652_v6 = vsub.f32 1.0, %v651_v30  ;;  %5905 = vpow2.f32 %v5650_v61  ;;  %v842_v63 = vpop.f32.mrf.mxu2  ;;  %vm672_vm3 = vmor %vm670_vm15, %vm671_vm14  ;;  %vm685_vm7 = vweird.f32 %v6808_v2 }
 0x191   :  { %v667_v8 = vsub.f32 1.0, %v666_v42  ;;  %5907 = vpow2.f32 %v5651_v57  ;;  %v867_v45 = vadd.f32 %v842_v63, %v783_v32  ;;  %v662_v42 = vor.u32 1.1754944e-38, %v661_v16 }
 0x192   :  { %v653_v41 = vmul.f32 %v5898_v46, %v652_v6  ;;  %v677_v32 = vor.u32 1.1754944e-38, %v676_v20  ;;  %v862_v16 = vpop.f32.mrf.mxu3 }
 0x193   :  { %v668_v40 = vmul.f32 %v5900_v43, %v667_v8  ;;  %v5652_v39 = vmul.f32 -1.442695, %v867_v45 }
 0x194   :  { %v5902_v38 = vpop.eup %5901  ;;  %v654_v44 = vadd.f32 %v5898_v46, %v653_v41 }
 0x195   :  { %v5904_v7 = vpop.eup %5903  ;;  %v681_v61 = vmul.f32 %v5902_v38, %v6808_v2  ;;  %v669_v30 = vadd.f32 %v5900_v43, %v668_v40  ;;  %5909 = vpow2.f32 %v5652_v39  ;;  %vm686_vm6 = vweird.f32 %v5902_v38 }
 0x196   :  { %v5906_v57 = vpop.eup %5905  ;;  %v658_v6 = vsel %vm657_vm2, %v5898_v46, %v654_v44  ;;  %vm687_vm8 = vmor %vm685_vm7, %vm686_vm6 }
 0x197   :  { %v5908_v63 = vpop.eup %5907  ;;  %v682_v8 = vsub.f32 1.0, %v681_v61  ;;  %v663_v45 = vsel %vm660_vm4, %v662_v42, %v658_v6  ;;  %v673_v37 = vsel %vm672_vm3, %v5900_v43, %v669_v30  ;;  %v878_v62 = vadd.f32 1.0, %v5906_v57 }
 0x198   :  { %v678_v41 = vsel %vm675_vm5, %v677_v32, %v673_v37  ;;  %v697_v31 = vmul.f32 %v5904_v7, %v663_v45  ;;  %v6816_v54 = vadd.f32 1.0, %v5908_v63  ;;  %v784_v37 = vadd.f32 %v778_v19, %v6814_v60 }
 0x199   :  { %v683_v40 = vmul.f32 %v5902_v38, %v682_v8  ;;  %v696_v39 = vmul.f32 %v678_v41, %v6729_v5  ;;  %5911 = vrcp.f32 %v878_v62  ;;  %v689_v5 = vand.u32 2147483647, %v6808_v2 }
 0x19a   :  { %5913 = vrcp.f32 %v6816_v54  ;;  %v868_v24 = vadd.f32 %v862_v16, %v784_v37  ;;  %v692_v30 = vor.u32 1.1754944e-38, %v691_v29  ;;  %v907_v8 = vand.u32 2147483648, %v6816_v54 }
 0x19b   :  { %v5910_v46 = vpop.eup %5909  ;;  %v6820_v3 = vadd.f32 %v697_v31, %v696_v39  ;;  %v684_v20 = vadd.f32 %v5902_v38, %v683_v40  ;;  %vm690_vm9 = vcmp.eq.f32.partialorder %v689_v5, 8.507059e+37  ;;  %v892_v2 = vand.u32 2147483648, %v878_v62 }
 0x19c   :  { %v6823_v43 = vadd.f32 1.0, %v5910_v46  ;;  %v890_v40 = vand.u32 2147483647, %v878_v62  ;;  %v905_v46 = vand.u32 2147483647, %v6816_v54  ;;  %vm886_vm12 = vweird.f32 %v878_v62 }
 0x19d   :  { %5915 = vtanh.f32 %v6820_v3  ;;  %v688_v61 = vsel %vm687_vm8, %v5902_v38, %v684_v20  ;;  %vm901_vm13 = vweird.f32 %v6816_v54  ;;  %v893_v37 = vor.u32 1.1754944e-38, %v892_v2 }
 0x19e   :  { %5917 = vrcp.f32 %v6823_v43  ;;  %v693_v6 = vsel %vm690_vm9, %v692_v30, %v688_v61  ;;  %vm891_vm15 = vcmp.eq.f32.partialorder %v890_v40, 8.507059e+37  ;;  %vm906_vm2 = vcmp.eq.f32.partialorder %v905_v46, 8.507059e+37  ;;  %v6872_v40 = vld [vmem:[#allocation3 + $0x88] sm:$0xff]  ;;  %v6880_v46 = vld [vmem:[#allocation3 + $0x98] sm:$0xff] }
 0x19f   :  { %v5912_v44 = vpop.eup %5911  ;;  %5919 = vtanh.f32 %v868_v24  ;;  %v908_v24 = vor.u32 1.1754944e-38, %v907_v8  ;;  %v6864_v8 = vld [vmem:[#allocation3 + $0xb8] sm:$0xff]  ;;  %v922_v2 = vand.u32 2147483648, %v6823_v43  ;;  %vm916_vm4 = vweird.f32 %v6823_v43 }
 0x1a0   :  { %v5914_v7 = vpop.eup %5913  ;;  %v882_v42 = vmul.f32 %v5912_v44, %v878_v62  ;;  %vm887_vm10 = vweird.f32 %v5912_v44 }
 0x1a1   :  { %v897_v19 = vmul.f32 %v5914_v7, %v6816_v54  ;;  %vm902_vm11 = vweird.f32 %v5914_v7  ;;  %vm888_vm14 = vmor %vm886_vm12, %vm887_vm10 }
 0x1a2   :  { %v883_v57 = vsub.f32 1.0, %v882_v42  ;;  %vm903_vm1 = vmor %vm901_vm13, %vm902_vm11 }
 0x1a3   :  { %v5916_v32 = vpop.eup %5915  ;;  %v898_v63 = vsub.f32 1.0, %v897_v19 }
 0x1a4   :  { %v6832_v45 = vpop.eup %5917  ;;  %v700_v41 = vmul.f32 %v5916_v32, %v693_v6  ;;  %v884_v31 = vmul.f32 %v5912_v44, %v883_v57  ;;  %v6856_v32 = vld [vmem:[#allocation3 + $0xa8] sm:$0xff] }
 0x1a5   :  { %v899_v38 = vmul.f32 %v5914_v7, %v898_v63  ;;  %v912_v39 = vmul.f32 %v6832_v45, %v6823_v43  ;;  %v5920_v5 = vpop.eup %5919  ;;  %vm917_vm3 = vweird.f32 %v6832_v45  ;;  %v6862_v63 = vld [vmem:[#allocation3 + $0xb0] sm:$0xff] }
 0x1a6   :  { %v885_v16 = vadd.f32 %v5912_v44, %v884_v31  ;;  %5653 = vmatmul.msk.f32.vlgmr.msrb.gmra.mxu0 %vm106_vm0, %v700_v41  ;;  %5654 = vmatmul.msk.f32.vlgmr.msrb.gmra.mxu1 %vm106_vm0, %v700_v41  ;;  %v6870_v31 = vld [vmem:[#allocation3 + $0x80] sm:$0xff]  ;;  %vm918_vm5 = vmor %vm916_vm4, %vm917_vm3 }
 0x1a7   :  { %v913_v20 = vsub.f32 1.0, %v912_v39  ;;  %v900_v29 = vadd.f32 %v5914_v7, %v899_v38  ;;  %5655 = vmatmul.msk.f32.vlgmr.msrb.gmra.mxu2 %vm106_vm0, %v700_v41  ;;  %5656 = vmatmul.msk.f32.vlgmr.msrb.gmra.mxu3 %vm106_vm0, %v700_v41  ;;  %v920_v38 = vand.u32 2147483647, %v6823_v43  ;;  %v6878_v39 = vld [vmem:[#allocation3 + $0x90] sm:$0xff]  ;;  %v923_v43 = vor.u32 1.1754944e-38, %v922_v2 }
 0x1a8   :  { %v889_v61 = vsel %vm888_vm14, %v5912_v44, %v885_v16  ;;  %1187 = vmatpush.msrb.mxu0 %v6732_v49  ;;  %1207 = vmatpush.msrb.mxu1 %v6734_v51 }
 0x1a9   :  { %v894_v62 = vsel %vm891_vm15, %v893_v37, %v889_v61  ;;  %v904_v54 = vsel %vm903_vm1, %v5914_v7, %v900_v29  ;;  %1227 = vmatpush.msrb.mxu2 %v6738_v47  ;;  %1247 = vmatpush.msrb.mxu3 %v6740_v48  ;;  %v914_v42 = vmul.f32 %v6832_v45, %v913_v20  ;;  %v6854_v7 = vld [vmem:[#allocation3 + $0xa0] sm:$0xff]  ;;  %vm921_vm6 = vcmp.eq.f32.partialorder %v920_v38, 8.507059e+37 }
 0x1aa   :  { %v909_v30 = vsel %vm906_vm2, %v908_v24, %v904_v54  ;;  %v928_v19 = vmul.f32 %v5920_v5, %v894_v62  ;;  %1188 = vmatpush.msrb.mxu0 %v6744_v50  ;;  %1208 = vmatpush.msrb.mxu1 %v6746_v53  ;;  %v6891_v29 = vld [vmem:[#allocation6 + $0xa0] sm:$0xff]  ;;  %v6893_v5 = vld [vmem:[#allocation6 + $0xa8] sm:$0xff]  ;;  %v6899_v24 = vld [vmem:[#allocation6 + $0xb8] sm:$0xff] }
 0x1ab   :  { %v927_v44 = vmul.f32 0.0, %v909_v30  ;;  %1228 = vmatpush.msrb.mxu2 %v6750_v0  ;;  %1248 = vmatpush.msrb.mxu3 %v6752_v18  ;;  %v915_v6 = vadd.f32 %v6832_v45, %v914_v42  ;;  %v6903_v61 = vld [vmem:[#allocation6 + $0x80] sm:$0xff]  ;;  %v6905_v62 = vld [vmem:[#allocation6 + $0x88] sm:$0xff]  ;;  %v6909_v54 = vld [vmem:[#allocation6 + $0x90] sm:$0xff] }
 0x1ac   :  { %v6911_v42 = vld [vmem:[#allocation6 + $0x98] sm:$0xff] }
 0x1ad   :  { %v6852_v57 = vadd.f32 %v928_v19, %v927_v44  ;;  %v278_v19 = vadd.f32 %v6647_v36, %v6701_v21  ;;  %v8336_v44 = vld [vmem:[#allocation32_spill] sm:$0xff] }
 0x1ae   :  { %5660 = vmatmul.msk.f32.vlgmr.msra.gmra.mxu0 %vm106_vm0, %v700_v41  ;;  %5661 = vmatmul.msk.f32.vlgmr.msra.gmra.mxu1 %vm106_vm0, %v700_v41 }
 0x1af   :  { %5921 = vtanh.f32 %v6852_v57  ;;  %5662 = vmatmul.msk.f32.vlgmr.msra.gmra.mxu2 %vm106_vm0, %v700_v41  ;;  %5663 = vmatmul.msk.f32.vlgmr.msra.gmra.mxu3 %vm106_vm0, %v700_v41  ;;  %v919_v41 = vsel %vm918_vm5, %v6832_v45, %v915_v6  ;;  %v6897_v45 = vld [vmem:[#allocation6 + $0xb0] sm:$0xff] }
 0x1b0   :  { %1334 = vmatpush.msra.mxu0 %v6854_v7  ;;  %1354 = vmatpush.msra.mxu1 %v6856_v32  ;;  %v924_v20 = vsel %vm921_vm6, %v923_v43, %v919_v41 }
 0x1b1   :  { %1374 = vmatpush.msra.mxu2 %v6862_v63  ;;  %1394 = vmatpush.msra.mxu3 %v6864_v8 }
 0x1b2   :  { %1335 = vmatpush.msra.mxu0 %v6870_v31  ;;  %1355 = vmatpush.msra.mxu1 %v6872_v40 }
 0x1b3   :  { %1375 = vmatpush.msra.mxu2 %v6878_v39  ;;  %1395 = vmatpush.msra.mxu3 %v6880_v46 }
 0x1b5   :  { %v5922_v16 = vpop.eup %5921 }
 0x1b6   :  { %v931_v37 = vmul.f32 %v5922_v16, %v924_v20 }
 0x1b8   :  { %5664 = vmatmul.msk.f32.vlgmr.msrb.gmra.mxu0 %vm106_vm0, %v931_v37  ;;  %5665 = vmatmul.msk.f32.vlgmr.msrb.gmra.mxu1 %vm106_vm0, %v931_v37 }
 0x1b9   :  { %5666 = vmatmul.msk.f32.vlgmr.msrb.gmra.mxu2 %vm106_vm0, %v931_v37  ;;  %5667 = vmatmul.msk.f32.vlgmr.msrb.gmra.mxu3 %vm106_vm0, %v931_v37 }
 0x1ba   :  { %1418 = vmatpush.msrb.mxu0 %v6891_v29  ;;  %1438 = vmatpush.msrb.mxu1 %v6893_v5 }
 0x1bb   :  { %1458 = vmatpush.msrb.mxu2 %v6897_v45  ;;  %1478 = vmatpush.msrb.mxu3 %v6899_v24 }
 0x1bc   :  { %1419 = vmatpush.msrb.mxu0 %v6903_v61  ;;  %1439 = vmatpush.msrb.mxu1 %v6905_v62 }
 0x1bd   :  { %1459 = vmatpush.msrb.mxu2 %v6909_v54  ;;  %1479 = vmatpush.msrb.mxu3 %v6911_v42 }
 0x1c0   :  { %5671 = vmatmul.msk.f32.vlgmr.msra.gmra.mxu0 %vm106_vm0, %v931_v37  ;;  %5672 = vmatmul.msk.f32.vlgmr.msra.gmra.mxu1 %vm106_vm0, %v931_v37 }
 0x1c1   :  { %5673 = vmatmul.msk.f32.vlgmr.msra.gmra.mxu2 %vm106_vm0, %v931_v37  ;;  %5674 = vmatmul.msk.f32.vlgmr.msra.gmra.mxu3 %vm106_vm0, %v931_v37 }
 0x1c2   :  { %1572 = vmatpush.msra.mxu0 %v6542_v9  ;;  %1592 = vmatpush.msra.mxu1 %v6544_v10  ;;  %v155_v9 = vadd.f32 %v6641_v33, %v6686_v55  ;;  %v196_v10 = vadd.f32 %v6643_v34, %v6688_v56 }
 0x1c3   :  { %1612 = vmatpush.msra.mxu2 %v6548_v11  ;;  %1632 = vmatpush.msra.mxu3 %v6550_v12 }
 0x1c4   :  { %1573 = vmatpush.msra.mxu0 %v6554_v13  ;;  %1593 = vmatpush.msra.mxu1 %v6556_v14 }
 0x1c5   :  { %1613 = vmatpush.msra.mxu2 %v6560_v15  ;;  %1633 = vmatpush.msra.mxu3 %v6578_v17 }
 0x1c8   :  { %1420 = vmatmul.f32.vlgmr.msrb.gmra.mxu0 %v8333_v28  ;;  %1440 = vmatmul.f32.vlgmr.msrb.gmra.mxu1 %v8333_v28 }
 0x1c9   :  { %1460 = vmatmul.f32.vlgmr.msrb.gmra.mxu2 %v8333_v28  ;;  %1480 = vmatmul.f32.vlgmr.msrb.gmra.mxu3 %v8333_v28 }
 0x1ca   :  { %1719 = vmatpush.msrb.mxu0 %v6703_v22  ;;  %1739 = vmatpush.msrb.mxu1 %v6705_v23  ;;  %v237_v22 = vadd.f32 %v6645_v35, %v6696_v1 }
 0x1cb   :  { %1759 = vmatpush.msrb.mxu2 %v6713_v27  ;;  %1779 = vmatpush.msrb.mxu3 %v6715_v58 }
 0x1cc   :  { %1720 = vmatpush.msrb.mxu0 %v6707_v25  ;;  %1740 = vmatpush.msrb.mxu1 %v6711_v26 }
 0x1cd   :  { %1760 = vmatpush.msrb.mxu2 %v6719_v52  ;;  %1780 = vmatpush.msrb.mxu3 %v6721_v59 }
 0x223   :  { %v956_v11 = vpop.f32.mrf.mxu0  ;;  %v976_v12 = vpop.f32.mrf.mxu1 }
 0x224   :  { %v1019_v13 = vadd.f32 %v956_v11, %v155_v9  ;;  %v1020_v14 = vadd.f32 %v976_v12, %v196_v10 }
 0x226   :  { %v5657_v15 = vmul.f32 -1.442695, %v1019_v13  ;;  %v5658_v17 = vmul.f32 -1.442695, %v1020_v14 }
 0x228   :  { %5923 = vpow2.f32 %v5657_v15 }
 0x229   :  { %5925 = vpow2.f32 %v5658_v17 }
 0x22a   :  { %v996_v23 = vpop.f32.mrf.mxu2  ;;  %v1016_v28 = vpop.f32.mrf.mxu3 }
 0x22b   :  { %v1021_v25 = vadd.f32 %v996_v23, %v237_v22  ;;  %v1103_v26 = vpop.f32.mrf.mxu0  ;;  %v1123_v27 = vpop.f32.mrf.mxu1  ;;  %v1022_v16 = vadd.f32 %v1016_v28, %v278_v19 }
 0x22c   :  { %v1166_v35 = vadd.f32 %v1103_v26, %v6796_v4  ;;  %v1167_v6 = vadd.f32 %v1123_v27, %v8336_v44 }
 0x22d   :  { %v5659_v58 = vmul.f32 -1.442695, %v1021_v25  ;;  %v8337_v25 = vld [vmem:[#allocation33_spill] sm:$0xff] }
 0x22e   :  { %v5924_v33 = vpop.eup %5923 }
 0x22f   :  { %v5926_v52 = vpop.eup %5925  ;;  %v1032_v59 = vadd.f32 1.0, %v5924_v33  ;;  %5927 = vpow2.f32 %v5659_v58 }
 0x230   :  { %v1033_v34 = vadd.f32 1.0, %v5926_v52 }
 0x231   :  { %5929 = vrcp.f32 %v1032_v59  ;;  %v1044_v13 = vand.u32 2147483647, %v1032_v59  ;;  %v1046_v23 = vand.u32 2147483648, %v1032_v59  ;;  %vm1040_vm10 = vweird.f32 %v1032_v59 }
 0x232   :  { %5931 = vrcp.f32 %v1033_v34  ;;  %v1143_v30 = vpop.f32.mrf.mxu2  ;;  %v1061_v22 = vand.u32 2147483648, %v1033_v34  ;;  %v1163_v27 = vpop.f32.mrf.mxu3  ;;  %v1059_v33 = vand.u32 2147483647, %v1033_v34  ;;  %vm1055_vm9 = vweird.f32 %v1033_v34 }
 0x233   :  { %v1168_v26 = vadd.f32 %v1143_v30, %v8337_v25  ;;  %vm1045_vm13 = vcmp.eq.f32.partialorder %v1044_v13, 8.507059e+37 }
 0x234   :  { %vm1060_vm14 = vcmp.eq.f32.partialorder %v1059_v33, 8.507059e+37 }
 0x235   :  { %v5928_v2 = vpop.eup %5927  ;;  %v1190_v38 = vpop.f32.mrf.mxu0 }
 0x236   :  { %v1210_v41 = vpop.f32.mrf.mxu1  ;;  %v6953_v43 = vadd.f32 1.0, %v5928_v2  ;;  %v1253_v20 = vadd.f32 %v1190_v38, %v1166_v35 }
 0x237   :  { %v1254_v37 = vadd.f32 %v1210_v41, %v1167_v6  ;;  %v5930_v9 = vpop.eup %5929  ;;  %v1047_v41 = vor.u32 1.1754944e-38, %v1046_v23  ;;  %v6966_v23 = vld [vmem:[%s8277_s3 + $0x8] sm:$0xf] }
 0x238   :  { %v5932_v10 = vpop.eup %5931  ;;  %v1036_v11 = vmul.f32 %v5930_v9, %v1032_v59  ;;  %5933 = vrcp.f32 %v6953_v43  ;;  %v5668_v14 = vmul.f32 -1.442695, %v1253_v20  ;;  %vm1041_vm7 = vweird.f32 %v5930_v9 }
 0x239   :  { %v1051_v12 = vmul.f32 %v5932_v10, %v1033_v34  ;;  %5935 = vtanh.f32 %v1022_v16  ;;  %v5669_v15 = vmul.f32 -1.442695, %v1254_v37  ;;  %vm1056_vm8 = vweird.f32 %v5932_v10  ;;  %vm1042_vm11 = vmor %vm1040_vm10, %vm1041_vm7 }
 0x23a   :  { %v1037_v36 = vsub.f32 1.0, %v1036_v11  ;;  %5937 = vpow2.f32 %v5668_v14  ;;  %vm1057_vm12 = vmor %vm1055_vm9, %vm1056_vm8  ;;  %v1062_v11 = vor.u32 1.1754944e-38, %v1061_v22  ;;  %vm1070_vm1 = vweird.f32 %v6953_v43 }
 0x23b   :  { %v1052_v17 = vsub.f32 1.0, %v1051_v12  ;;  %5939 = vpow2.f32 %v5669_v15 }
 0x23c   :  { %v1038_v58 = vmul.f32 %v5930_v9, %v1037_v36  ;;  %v1230_v52 = vpop.f32.mrf.mxu2 }
 0x23d   :  { %v1053_v28 = vmul.f32 %v5932_v10, %v1052_v17  ;;  %v1255_v19 = vadd.f32 %v1230_v52, %v1168_v26  ;;  %v1337_v2 = vpop.f32.mrf.mxu0  ;;  %v1250_v52 = vpop.f32.mrf.mxu3 }
 0x23e   :  { %v6957_v35 = vpop.eup %5933  ;;  %v1039_v6 = vadd.f32 %v5930_v9, %v1038_v58  ;;  %v1357_v38 = vpop.f32.mrf.mxu1 }
 0x23f   :  { %v1066_v30 = vmul.f32 %v6957_v35, %v6953_v43  ;;  %v1054_v16 = vadd.f32 %v5932_v10, %v1053_v28  ;;  %v5670_v20 = vmul.f32 -1.442695, %v1255_v19  ;;  %v5936_v37 = vpop.eup %5935  ;;  %v6978_v28 = vperm.slane %v6966_v23, 0 }
 0x240   :  { %v1043_v12 = vsel %vm1042_vm11, %v5930_v9, %v1039_v6  ;;  %v5938_v14 = vpop.eup %5937  ;;  %v6981_v19 = vperm.slane %v6966_v23, 1  ;;  %vm1071_vm15 = vweird.f32 %v6957_v35 }
 0x241   :  { %v1067_v34 = vsub.f32 1.0, %v1066_v30  ;;  %v1048_v36 = vsel %vm1045_vm13, %v1047_v41, %v1043_v12  ;;  %v1058_v59 = vsel %vm1057_vm12, %v5932_v10, %v1054_v16  ;;  %5941 = vpow2.f32 %v5670_v20  ;;  %v5940_v26 = vpop.eup %5939  ;;  %vm6996_vm2 = vmor %vm1070_vm1, %vm1071_vm15 }
 0x242   :  { %v1063_v15 = vsel %vm1060_vm14, %v1062_v11, %v1058_v59  ;;  %v1082_v17 = vmul.f32 %v5936_v37, %v1048_v36  ;;  %v6970_v9 = vadd.f32 1.0, %v5938_v14  ;;  %v6972_v13 = vadd.f32 1.0, %v5940_v26  ;;  %8338 = vst [vmem:[#allocation32_spill] sm:$0xff] %v6981_v19 }
 0x243   :  { %v1068_v58 = vmul.f32 %v6957_v35, %v1067_v34  ;;  %v1081_v22 = vmul.f32 %v1063_v15, %v6820_v3  ;;  %v1169_v3 = vadd.f32 %v1163_v27, %v6814_v60  ;;  %v1076_v41 = vand.u32 2147483648, %v6953_v43 }
 0x244   :  { %v1377_v33 = vpop.f32.mrf.mxu2  ;;  %5943 = vrcp.f32 %v6970_v9  ;;  %v6990_v16 = vperm.slane %v6966_v23, 2  ;;  %v1074_v20 = vand.u32 2147483647, %v6953_v43  ;;  %v1400_v36 = vadd.f32 %v1337_v2, %v6978_v28 }
 0x245   :  { %v6974_v10 = vadd.f32 %v1082_v17, %v1081_v22  ;;  %v1069_v6 = vadd.f32 %v6957_v35, %v1068_v58  ;;  %5945 = vrcp.f32 %v6972_v13  ;;  %v1256_v11 = vadd.f32 %v1250_v52, %v1169_v3  ;;  %v1421_v12 = vpop.f32.mrf.mxu0 }
 0x246   :  { %v1441_v34 = vpop.f32.mrf.mxu1  ;;  %v1401_v59 = vadd.f32 %v1357_v38, %v6981_v19  ;;  %v1077_v15 = vor.u32 1.1754944e-38, %v1076_v41  ;;  %v1484_v17 = vadd.f32 %v1421_v12, %v1400_v36  ;;  %vm1075_vm3 = vcmp.eq.f32.partialorder %v1074_v20, 8.507059e+37 }
 0x247   :  { %v5942_v30 = vpop.eup %5941  ;;  %5947 = vtanh.f32 %v6974_v10  ;;  %v1073_v14 = vsel %vm6996_vm2, %v6957_v35, %v1069_v6  ;;  %v1402_v52 = vadd.f32 %v1377_v33, %v6990_v16  ;;  %v1295_v41 = vand.u32 2147483648, %v6972_v13 }
 0x248   :  { %v6994_v37 = vadd.f32 1.0, %v5942_v30  ;;  %v1485_v26 = vadd.f32 %v1441_v34, %v1401_v59  ;;  %v1078_v38 = vsel %vm1075_vm3, %v1077_v15, %v1073_v14  ;;  %v5675_v27 = vmul.f32 -1.442695, %v1484_v17  ;;  %v1397_v59 = vpop.f32.mrf.mxu3 }
 0x249   :  { %v1278_v20 = vand.u32 2147483647, %v6970_v9  ;;  %v1280_v36 = vand.u32 2147483648, %v6970_v9  ;;  %vm1274_vm6 = vweird.f32 %v6970_v9  ;;  %vm1289_vm7 = vweird.f32 %v6972_v13 }
 0x24a   :  { %5949 = vrcp.f32 %v6994_v37  ;;  %v5944_v43 = vpop.eup %5943  ;;  %v5676_v35 = vmul.f32 -1.442695, %v1485_v26  ;;  %v1293_v26 = vand.u32 2147483647, %v6972_v13  ;;  %vm1304_vm13 = vweird.f32 %v6994_v37 }
 0x24b   :  { %v5946_v58 = vpop.eup %5945  ;;  %v1270_v22 = vmul.f32 %v5944_v43, %v6970_v9  ;;  %5951 = vtanh.f32 %v1256_v11  ;;  %vm1275_vm4 = vweird.f32 %v5944_v43  ;;  %vm1279_vm10 = vcmp.eq.f32.partialorder %v1278_v20, 8.507059e+37 }
 0x24c   :  { %v1461_v2 = vpop.f32.mrf.mxu2  ;;  %v1285_v30 = vmul.f32 %v5946_v58, %v6972_v13  ;;  %5953 = vpow2.f32 %v5675_v27  ;;  %vm1290_vm5 = vweird.f32 %v5946_v58  ;;  %vm1276_vm8 = vmor %vm1274_vm6, %vm1275_vm4  ;;  %vm1294_vm11 = vcmp.eq.f32.partialorder %v1293_v26, 8.507059e+37 }
 0x24d   :  { %v5948_v3 = vpop.eup %5947  ;;  %v1271_v19 = vsub.f32 1.0, %v1270_v22  ;;  %v1486_v12 = vadd.f32 %v1461_v2, %v1402_v52  ;;  %5955 = vpow2.f32 %v5676_v35  ;;  %v1281_v2 = vor.u32 1.1754944e-38, %v1280_v36  ;;  %vm1291_vm9 = vmor %vm1289_vm7, %vm1290_vm5 }
 0x24e   :  { %v1085_v6 = vmul.f32 %v5948_v3, %v1078_v38  ;;  %v1286_v34 = vsub.f32 1.0, %v1285_v30  ;;  %v1296_v38 = vor.u32 1.1754944e-38, %v1295_v41  ;;  %v1310_v41 = vand.u32 2147483648, %v6994_v37 }
 0x24f   :  { %v1272_v33 = vmul.f32 %v5944_v43, %v1271_v19  ;;  %v5677_v14 = vmul.f32 -1.442695, %v1486_v12 }
 0x250   :  { %v7012_v11 = vpop.eup %5949  ;;  %5678 = vmatmul.msk.f32.vlgmr.msra.gmra.mxu0 %vm106_vm0, %v1085_v6  ;;  %5679 = vmatmul.msk.f32.vlgmr.msra.gmra.mxu1 %vm106_vm0, %v1085_v6  ;;  %v1287_v15 = vmul.f32 %v5946_v58, %v1286_v34  ;;  %v1311_v34 = vor.u32 1.1754944e-38, %v1310_v41 }
 0x251   :  { %v1300_v17 = vmul.f32 %v7012_v11, %v6994_v37  ;;  %5680 = vmatmul.msk.f32.vlgmr.msra.gmra.mxu2 %vm106_vm0, %v1085_v6  ;;  %5681 = vmatmul.msk.f32.vlgmr.msra.gmra.mxu3 %vm106_vm0, %v1085_v6  ;;  %v5952_v19 = vpop.eup %5951  ;;  %v1273_v22 = vadd.f32 %v5944_v43, %v1272_v33  ;;  %5957 = vpow2.f32 %v5677_v14  ;;  %vm1305_vm12 = vweird.f32 %v7012_v11 }
 0x252   :  { %1806 = vmatpush.msra.mxu0 %v6732_v49  ;;  %1826 = vmatpush.msra.mxu1 %v6734_v51  ;;  %v1288_v3 = vadd.f32 %v5946_v58, %v1287_v15  ;;  %v5954_v49 = vpop.eup %5953  ;;  %vm1306_vm14 = vmor %vm1304_vm13, %vm1305_vm12 }
 0x253   :  { %v1301_v52 = vsub.f32 1.0, %v1300_v17  ;;  %1846 = vmatpush.msra.mxu2 %v6738_v47  ;;  %1866 = vmatpush.msra.mxu3 %v6740_v48  ;;  %v1277_v9 = vsel %vm1276_vm8, %v5944_v43, %v1273_v22  ;;  %v5956_v47 = vpop.eup %5955  ;;  %v7034_v35 = vadd.f32 1.0, %v5954_v49 }
 0x254   :  { %1807 = vmatpush.msra.mxu0 %v6744_v50  ;;  %1827 = vmatpush.msra.mxu1 %v6746_v53  ;;  %v1282_v51 = vsel %vm1279_vm10, %v1281_v2, %v1277_v9  ;;  %v1292_v13 = vsel %vm1291_vm9, %v5946_v58, %v1288_v3  ;;  %v7038_v50 = vperm.slane %v6966_v23, 3  ;;  %v7040_v53 = vadd.f32 1.0, %v5956_v47  ;;  %v1481_v23 = vpop.f32.mrf.mxu3 }
 0x255   :  { %1847 = vmatpush.msra.mxu2 %v6750_v0  ;;  %1867 = vmatpush.msra.mxu3 %v6752_v18  ;;  %v1302_v48 = vmul.f32 %v7012_v11, %v1301_v52  ;;  %v1297_v30 = vsel %vm1294_vm11, %v1296_v38, %v1292_v13  ;;  %v1316_v27 = vmul.f32 %v5952_v19, %v1282_v51  ;;  %5959 = vrcp.f32 %v7034_v35 }
 0x256   :  { %v1315_v43 = vmul.f32 %v1297_v30, %v6852_v57  ;;  %8341 = vst [vmem:[#allocation33_spill] sm:$0xff] %v7038_v50  ;;  %5961 = vrcp.f32 %v7040_v53  ;;  %v1403_v12 = vadd.f32 %v1397_v59, %v7038_v50  ;;  %v1511_v14 = vand.u32 2147483648, %v7034_v35 }
 0x257   :  { %v5958_v58 = vpop.eup %5957  ;;  %v1303_v18 = vadd.f32 %v7012_v11, %v1302_v48  ;;  %v1524_v19 = vand.u32 2147483647, %v7040_v53  ;;  %vm1505_vm3 = vweird.f32 %v7034_v35  ;;  %vm1520_vm4 = vweird.f32 %v7040_v53 }
 0x258   :  { %5685 = vmatmul.msk.f32.vlgmr.msrb.gmra.mxu0 %vm106_vm0, %v1085_v6  ;;  %5686 = vmatmul.msk.f32.vlgmr.msrb.gmra.mxu1 %vm106_vm0, %v1085_v6  ;;  %v7045_v0 = vadd.f32 %v1316_v27, %v1315_v43  ;;  %v7052_v57 = vadd.f32 1.0, %v5958_v58  ;;  %v1512_v2 = vor.u32 1.1754944e-38, %v1511_v14  ;;  %v7118_v27 = vld [vmem:[#allocation6 + $0x38] sm:$0xff]  ;;  %v7124_v43 = vld [vmem:[#allocation6 + $0x8] sm:$0xff]  ;;  %v7128_v58 = vld [vmem:[#allocation6 + $0x10] sm:$0xff] }
 0x259   :  { %5687 = vmatmul.msk.f32.vlgmr.msrb.gmra.mxu2 %vm106_vm0, %v1085_v6  ;;  %5688 = vmatmul.msk.f32.vlgmr.msrb.gmra.mxu3 %vm106_vm0, %v1085_v6  ;;  %v1308_v6 = vand.u32 2147483647, %v6994_v37  ;;  %vm1525_vm8 = vcmp.eq.f32.partialorder %v1524_v19, 8.507059e+37 }
 0x25a   :  { %1953 = vmatpush.msrb.mxu0 %v6854_v7  ;;  %1973 = vmatpush.msrb.mxu1 %v6856_v32  ;;  %5963 = vtanh.f32 %v7045_v0  ;;  %v1487_v7 = vadd.f32 %v1481_v23, %v1403_v12  ;;  %vm1535_vm10 = vweird.f32 %v7052_v57 }
 0x25b   :  { %1993 = vmatpush.msrb.mxu2 %v6862_v63  ;;  %2013 = vmatpush.msrb.mxu3 %v6864_v8  ;;  %5965 = vrcp.f32 %v7052_v57  ;;  %v5960_v32 = vpop.eup %5959  ;;  %v1307_v63 = vsel %vm1306_vm14, %v7012_v11, %v1303_v18  ;;  %vm1309_vm15 = vcmp.eq.f32.partialorder %v1308_v6, 8.507059e+37  ;;  %v1526_v11 = vand.u32 2147483648, %v7040_v53  ;;  %v7131_v18 = vld [vmem:[#allocation6 + $0x18] sm:$0xff]  ;;  %v7138_v6 = vld [vmem:[#allocation3 + $0x60] sm:$0xff] }
 0x25c   :  { %1954 = vmatpush.msrb.mxu0 %v6870_v31  ;;  %1974 = vmatpush.msrb.mxu1 %v6872_v40  ;;  %v5962_v8 = vpop.eup %5961  ;;  %v1501_v37 = vmul.f32 %v5960_v32, %v7034_v35  ;;  %v1312_v40 = vsel %vm1309_vm15, %v1311_v34, %v1307_v63  ;;  %5967 = vtanh.f32 %v1487_v7  ;;  %vm1506_vm1 = vweird.f32 %v5960_v32  ;;  %v7141_v7 = vld [vmem:[#allocation3 + $0x68] sm:$0xff]  ;;  %v7147_v63 = vld [vmem:[#allocation3 + $0x78] sm:$0xff] }
 0x25d   :  { %1994 = vmatpush.msrb.mxu2 %v6878_v39  ;;  %2014 = vmatpush.msrb.mxu3 %v6880_v46  ;;  %v1516_v31 = vmul.f32 %v5962_v8, %v7040_v53  ;;  %v1509_v46 = vand.u32 2147483647, %v7034_v35  ;;  %vm1521_vm2 = vweird.f32 %v5962_v8  ;;  %vm1507_vm5 = vmor %vm1505_vm3, %vm1506_vm1  ;;  %v1527_v9 = vor.u32 1.1754944e-38, %v1526_v11  ;;  %v7121_v35 = vld [vmem:[#allocation6] sm:$0xff]  ;;  %v7153_v34 = vld [vmem:[#allocation3 + $0x48] sm:$0xff] }
 0x25e   :  { %v1502_v36 = vsub.f32 1.0, %v1501_v37  ;;  %vm1522_vm7 = vmor %vm1520_vm4, %vm1521_vm2  ;;  %v7156_v37 = vld [vmem:[#allocation3 + $0x50] sm:$0xff] }
 0x25f   :  { %v1517_v39 = vsub.f32 1.0, %v1516_v31  ;;  %vm1510_vm6 = vcmp.eq.f32.partialorder %v1509_v46, 8.507059e+37  ;;  %v7159_v31 = vld [vmem:[#allocation3 + $0x58] sm:$0xff] }
 0x260   :  { %v5964_v20 = vpop.eup %5963  ;;  %v1503_v17 = vmul.f32 %v5960_v32, %v1502_v36  ;;  %v8343_v36 = vld [vmem:[#allocation13_spill] sm:$0xff] }
 0x261   :  { %v7073_v33 = vpop.eup %5965  ;;  %v1319_v59 = vmul.f32 %v5964_v20, %v1312_v40  ;;  %v1518_v26 = vmul.f32 %v5962_v8, %v1517_v39  ;;  %v8342_v20 = vld [vmem:[#allocation12_spill] sm:$0xff] }
 0x262   :  { %v1531_v15 = vmul.f32 %v7073_v33, %v7052_v57  ;;  %v1504_v52 = vadd.f32 %v5960_v32, %v1503_v17  ;;  %v5968_v38 = vpop.eup %5967  ;;  %vm1536_vm9 = vweird.f32 %v7073_v33  ;;  %v158_v40 = vadd.f32 %v8342_v20, %v6686_v55  ;;  %v8344_v17 = vld [vmem:[#allocation14_spill] sm:$0xff] }
 0x263   :  { %5689 = vmatmul.msk.f32.vlgmr.msra.gmra.mxu0 %vm106_vm0, %v1319_v59  ;;  %5690 = vmatmul.msk.f32.vlgmr.msra.gmra.mxu1 %vm106_vm0, %v1319_v59  ;;  %v1519_v3 = vadd.f32 %v5962_v8, %v1518_v26  ;;  %vm1537_vm11 = vmor %vm1535_vm10, %vm1536_vm9  ;;  %v240_v26 = vadd.f32 %v8344_v17, %v6696_v1 }
 0x264   :  { %v1532_v22 = vsub.f32 1.0, %v1531_v15  ;;  %5691 = vmatmul.msk.f32.vlgmr.msra.gmra.mxu2 %vm106_vm0, %v1319_v59  ;;  %5692 = vmatmul.msk.f32.vlgmr.msra.gmra.mxu3 %vm106_vm0, %v1319_v59  ;;  %v1508_v49 = vsel %vm1507_vm5, %v5960_v32, %v1504_v52  ;;  %v7144_v32 = vld [vmem:[#allocation3 + $0x70] sm:$0xff] }
 0x265   :  { %2040 = vmatpush.msra.mxu0 %v6891_v29  ;;  %2060 = vmatpush.msra.mxu1 %v6893_v5  ;;  %v1513_v51 = vsel %vm1510_vm6, %v1512_v2, %v1508_v49  ;;  %v1523_v13 = vsel %vm1522_vm7, %v5962_v8, %v1519_v3  ;;  %v7150_v8 = vld [vmem:[#allocation3 + $0x40] sm:$0xff] }
 0x266   :  { %2080 = vmatpush.msra.mxu2 %v6897_v45  ;;  %2100 = vmatpush.msra.mxu3 %v6899_v24  ;;  %v1533_v29 = vmul.f32 %v7073_v33, %v1532_v22  ;;  %v1528_v5 = vsel %vm1525_vm8, %v1527_v9, %v1523_v13  ;;  %v1547_v47 = vmul.f32 %v5968_v38, %v1513_v51  ;;  %v1541_v24 = vand.u32 2147483648, %v7052_v57 }
 0x267   :  { %2041 = vmatpush.msra.mxu0 %v6903_v61  ;;  %2061 = vmatpush.msra.mxu1 %v6905_v62  ;;  %v1546_v48 = vmul.f32 0.0, %v1528_v5  ;;  %v7107_v61 = vld [vmem:[#allocation6 + $0x20] sm:$0xff]  ;;  %v7110_v62 = vld [vmem:[#allocation6 + $0x28] sm:$0xff] }
 0x268   :  { %2081 = vmatpush.msra.mxu2 %v6909_v54  ;;  %2101 = vmatpush.msra.mxu3 %v6911_v42  ;;  %v1534_v45 = vadd.f32 %v7073_v33, %v1533_v29  ;;  %v1539_v54 = vand.u32 2147483647, %v7052_v57  ;;  %v7115_v42 = vld [vmem:[#allocation6 + $0x30] sm:$0xff]  ;;  %v1542_v57 = vor.u32 1.1754944e-38, %v1541_v24  ;;  %v8345_v29 = vld [vmem:[#allocation15_spill] sm:$0xff] }
 0x269   :  { %v7097_v30 = vadd.f32 %v1547_v47, %v1546_v48  ;;  %v281_v5 = vadd.f32 %v8345_v29, %v6701_v21 }
 0x26a   :  { %v1538_v53 = vsel %vm1537_vm11, %v7073_v33, %v1534_v45  ;;  %vm1540_vm12 = vcmp.eq.f32.partialorder %v1539_v54, 8.507059e+37  ;;  %v199_v33 = vadd.f32 %v8343_v36, %v6688_v56 }
 0x26b   :  { %5696 = vmatmul.msk.f32.vlgmr.msrb.gmra.mxu0 %vm106_vm0, %v1319_v59  ;;  %5697 = vmatmul.msk.f32.vlgmr.msrb.gmra.mxu1 %vm106_vm0, %v1319_v59  ;;  %5969 = vtanh.f32 %v7097_v30  ;;  %v1543_v41 = vsel %vm1540_vm12, %v1542_v57, %v1538_v53 }
 0x26c   :  { %5698 = vmatmul.msk.f32.vlgmr.msrb.gmra.mxu2 %vm106_vm0, %v1319_v59  ;;  %5699 = vmatmul.msk.f32.vlgmr.msrb.gmra.mxu3 %vm106_vm0, %v1319_v59 }
 0x26d   :  { %2194 = vmatpush.msrb.mxu0 %v7107_v61  ;;  %2214 = vmatpush.msrb.mxu1 %v7110_v62 }
 0x26e   :  { %2234 = vmatpush.msrb.mxu2 %v7115_v42  ;;  %2254 = vmatpush.msrb.mxu3 %v7118_v27 }
 0x26f   :  { %2195 = vmatpush.msrb.mxu0 %v7121_v35  ;;  %2215 = vmatpush.msrb.mxu1 %v7124_v43 }
 0x270   :  { %2235 = vmatpush.msrb.mxu2 %v7128_v58  ;;  %2255 = vmatpush.msrb.mxu3 %v7131_v18 }
 0x271   :  { %v5970_v23 = vpop.eup %5969 }
 0x272   :  { %v1550_v12 = vmul.f32 %v5970_v23, %v1543_v41 }
 0x274   :  { %5700 = vmatmul.msk.f32.vlgmr.msra.gmra.mxu0 %vm106_vm0, %v1550_v12  ;;  %5701 = vmatmul.msk.f32.vlgmr.msra.gmra.mxu1 %vm106_vm0, %v1550_v12 }
 0x275   :  { %5702 = vmatmul.msk.f32.vlgmr.msra.gmra.mxu2 %vm106_vm0, %v1550_v12  ;;  %5703 = vmatmul.msk.f32.vlgmr.msra.gmra.mxu3 %vm106_vm0, %v1550_v12 }
 0x276   :  { %2341 = vmatpush.msra.mxu0 %v7138_v6  ;;  %2361 = vmatpush.msra.mxu1 %v7141_v7 }
 0x277   :  { %2381 = vmatpush.msra.mxu2 %v7144_v32  ;;  %2401 = vmatpush.msra.mxu3 %v7147_v63 }
 0x278   :  { %2342 = vmatpush.msra.mxu0 %v7150_v8  ;;  %2362 = vmatpush.msra.mxu1 %v7153_v34 }
 0x279   :  { %2382 = vmatpush.msra.mxu2 %v7156_v37  ;;  %2402 = vmatpush.msra.mxu3 %v7159_v31 }
 0x2cd   :  { %v1575_v59 = vpop.f32.mrf.mxu0  ;;  %v1595_v39 = vpop.f32.mrf.mxu1 }
 0x2ce   :  { %v1638_v46 = vadd.f32 %v1575_v59, %v158_v40  ;;  %v1639_v14 = vadd.f32 %v1595_v39, %v199_v33 }
 0x2d0   :  { %v5682_v11 = vmul.f32 -1.442695, %v1638_v46  ;;  %v5683_v15 = vmul.f32 -1.442695, %v1639_v14 }
 0x2d2   :  { %5971 = vpow2.f32 %v5682_v11 }
 0x2d3   :  { %5973 = vpow2.f32 %v5683_v15 }
 0x2d4   :  { %v1615_v19 = vpop.f32.mrf.mxu2  ;;  %v1635_v13 = vpop.f32.mrf.mxu3 }
 0x2d5   :  { %v1640_v22 = vadd.f32 %v1615_v19, %v240_v26  ;;  %v1722_v2 = vpop.f32.mrf.mxu0  ;;  %v1742_v3 = vpop.f32.mrf.mxu1  ;;  %v1641_v24 = vadd.f32 %v1635_v13, %v281_v5 }
 0x2d6   :  { %v1785_v12 = vadd.f32 %v1722_v2, %v6796_v4  ;;  %v1786_v20 = vadd.f32 %v1742_v3, %v8336_v44 }
 0x2d7   :  { %v5684_v52 = vmul.f32 -1.442695, %v1640_v22 }
 0x2d8   :  { %v5972_v38 = vpop.eup %5971 }
 0x2d9   :  { %v5974_v9 = vpop.eup %5973  ;;  %v1651_v49 = vadd.f32 1.0, %v5972_v38  ;;  %5975 = vpow2.f32 %v5684_v52 }
 0x2da   :  { %v1652_v51 = vadd.f32 1.0, %v5974_v9 }
 0x2db   :  { %5977 = vrcp.f32 %v1651_v49  ;;  %v1663_v14 = vand.u32 2147483647, %v1651_v49  ;;  %v1665_v11 = vand.u32 2147483648, %v1651_v49  ;;  %vm1659_vm15 = vweird.f32 %v1651_v49 }
 0x2dc   :  { %5979 = vrcp.f32 %v1652_v51  ;;  %v1762_v47 = vpop.f32.mrf.mxu2  ;;  %v1680_v46 = vand.u32 2147483648, %v1652_v51  ;;  %v1678_v22 = vand.u32 2147483647, %v1652_v51  ;;  %vm1674_vm1 = vweird.f32 %v1652_v51  ;;  %v1782_v38 = vpop.f32.mrf.mxu3 }
 0x2dd   :  { %v1787_v3 = vadd.f32 %v1762_v47, %v8337_v25  ;;  %v1666_v29 = vor.u32 1.1754944e-38, %v1665_v11  ;;  %vm1664_vm4 = vcmp.eq.f32.partialorder %v1663_v14, 8.507059e+37 }
 0x2de   :  { %vm1679_vm5 = vcmp.eq.f32.partialorder %v1678_v22, 8.507059e+37  ;;  %v1788_v22 = vadd.f32 %v1782_v38, %v6814_v60 }
 0x2df   :  { %v5976_v48 = vpop.eup %5975 }
 0x2e0   :  { %v7170_v45 = vadd.f32 1.0, %v5976_v48  ;;  %v1809_v53 = vpop.f32.mrf.mxu0  ;;  %v1829_v57 = vpop.f32.mrf.mxu1 }
 0x2e1   :  { %v5978_v54 = vpop.eup %5977  ;;  %v1872_v33 = vadd.f32 %v1809_v53, %v1785_v12  ;;  %v1873_v59 = vadd.f32 %v1829_v57, %v1786_v20 }
 0x2e2   :  { %v5980_v23 = vpop.eup %5979  ;;  %v1655_v41 = vmul.f32 %v5978_v54, %v1651_v49  ;;  %5981 = vrcp.f32 %v7170_v45  ;;  %vm1660_vm13 = vweird.f32 %v5978_v54  ;;  %v1681_v49 = vor.u32 1.1754944e-38, %v1680_v46 }
 0x2e3   :  { %v1670_v40 = vmul.f32 %v5980_v23, %v1652_v51  ;;  %5983 = vtanh.f32 %v1641_v24  ;;  %v5693_v17 = vmul.f32 -1.442695, %v1872_v33  ;;  %v5694_v26 = vmul.f32 -1.442695, %v1873_v59  ;;  %vm1661_vm2 = vmor %vm1659_vm15, %vm1660_vm13 }
 0x2e4   :  { %v1656_v36 = vsub.f32 1.0, %v1655_v41  ;;  %vm1675_vm14 = vweird.f32 %v5980_v23  ;;  %vm1689_vm7 = vweird.f32 %v7170_v45 }
 0x2e5   :  { %v1671_v39 = vsub.f32 1.0, %v1670_v40  ;;  %5985 = vpow2.f32 %v5693_v17  ;;  %vm1676_vm3 = vmor %vm1674_vm1, %vm1675_vm14 }
 0x2e6   :  { %v1657_v15 = vmul.f32 %v5978_v54, %v1656_v36  ;;  %5987 = vpow2.f32 %v5694_v26 }
 0x2e7   :  { %v1672_v19 = vmul.f32 %v5980_v23, %v1671_v39  ;;  %v1849_v9 = vpop.f32.mrf.mxu2  ;;  %v1869_v26 = vpop.f32.mrf.mxu3 }
 0x2e8   :  { %v5982_v52 = vpop.eup %5981  ;;  %v1658_v2 = vadd.f32 %v5978_v54, %v1657_v15  ;;  %v1874_v51 = vadd.f32 %v1849_v9, %v1787_v3  ;;  %v1956_v53 = vpop.f32.mrf.mxu0 }
 0x2e9   :  { %v1685_v13 = vmul.f32 %v5982_v52, %v7170_v45  ;;  %v1673_v5 = vadd.f32 %v5980_v23, %v1672_v19  ;;  %v5984_v48 = vpop.eup %5983  ;;  %v1976_v57 = vpop.f32.mrf.mxu1  ;;  %vm1690_vm6 = vweird.f32 %v5982_v52  ;;  %v7230_v19 = vld [vmem:[#allocation6 + $0x68] sm:$0xff] }
 0x2ea   :  { %v1662_v24 = vsel %vm1661_vm2, %v5978_v54, %v1658_v2  ;;  %v5695_v36 = vmul.f32 -1.442695, %v1874_v51  ;;  %vm7191_vm8 = vmor %vm1689_vm7, %vm1690_vm6  ;;  %v2019_v2 = vadd.f32 %v1956_v53, %v6978_v28 }
 0x2eb   :  { %v1686_v47 = vsub.f32 1.0, %v1685_v13  ;;  %v1667_v41 = vsel %vm1664_vm4, %v1666_v29, %v1662_v24  ;;  %v1677_v12 = vsel %vm1676_vm3, %v5980_v23, %v1673_v5  ;;  %v5986_v39 = vpop.eup %5985  ;;  %v1695_v23 = vand.u32 2147483648, %v7170_v45  ;;  %v8348_v13 = vld [vmem:[#allocation32_spill] sm:$0xff] }
 0x2ec   :  { %v1682_v20 = vsel %vm1679_vm5, %v1681_v49, %v1677_v12  ;;  %v1701_v40 = vmul.f32 %v5984_v48, %v1667_v41  ;;  %5989 = vpow2.f32 %v5695_v36  ;;  %v5988_v11 = vpop.eup %5987  ;;  %v7182_v54 = vadd.f32 1.0, %v5986_v39 }
 0x2ed   :  { %v1687_v33 = vmul.f32 %v5982_v52, %v1686_v47  ;;  %v1700_v59 = vmul.f32 %v1682_v20, %v6974_v10  ;;  %v7184_v14 = vadd.f32 1.0, %v5988_v11  ;;  %v1693_v10 = vand.u32 2147483647, %v7170_v45 }
 0x2ee   :  { %v2020_v29 = vadd.f32 %v1976_v57, %v8348_v13  ;;  %v1696_v48 = vor.u32 1.1754944e-38, %v1695_v23  ;;  %v1875_v24 = vadd.f32 %v1869_v26, %v1788_v22  ;;  %v1899_v23 = vand.u32 2147483648, %v7182_v54  ;;  %v7227_v26 = vld [vmem:[#allocation6 + $0x60] sm:$0xff] }
 0x2ef   :  { %v7180_v15 = vadd.f32 %v1701_v40, %v1700_v59  ;;  %v1688_v46 = vadd.f32 %v5982_v52, %v1687_v33  ;;  %v1996_v17 = vpop.f32.mrf.mxu2  ;;  %vm1694_vm9 = vcmp.eq.f32.partialorder %v1693_v10, 8.507059e+37  ;;  %vm1908_vm12 = vweird.f32 %v7184_v14 }
 0x2f0   :  { %v2021_v33 = vadd.f32 %v1996_v17, %v6990_v16  ;;  %v7225_v17 = vpop.f32.mrf.mxu3  ;;  %vm1893_vm13 = vweird.f32 %v7182_v54 }
 0x2f1   :  { %5991 = vtanh.f32 %v7180_v15  ;;  %v1692_v9 = vsel %vm7191_vm8, %v5982_v52, %v1688_v46  ;;  %v2043_v45 = vpop.f32.mrf.mxu0  ;;  %v2063_v5 = vpop.f32.mrf.mxu1  ;;  %v1897_v46 = vand.u32 2147483647, %v7182_v54 }
 0x2f2   :  { %5993 = vrcp.f32 %v7182_v54  ;;  %v5990_v3 = vpop.eup %5989  ;;  %v2106_v51 = vadd.f32 %v2043_v45, %v2019_v2  ;;  %v2107_v47 = vadd.f32 %v2063_v5, %v2020_v29  ;;  %v1697_v41 = vsel %vm1694_vm9, %v1696_v48, %v1692_v9  ;;  %v7239_v29 = vld [vmem:[#allocation6 + $0x70] sm:$0xff]  ;;  %v7242_v45 = vld [vmem:[#allocation6 + $0x78] sm:$0xff] }
 0x2f3   :  { %5995 = vrcp.f32 %v7184_v14  ;;  %v7201_v49 = vadd.f32 1.0, %v5990_v3  ;;  %v1914_v2 = vand.u32 2147483648, %v7184_v14  ;;  %v1912_v9 = vand.u32 2147483647, %v7184_v14 }
 0x2f4   :  { %v5704_v52 = vmul.f32 -1.442695, %v2106_v51  ;;  %v5705_v20 = vmul.f32 -1.442695, %v2107_v47  ;;  %v7249_v51 = vld [vmem:[#allocation6 + $0x40] sm:$0xff]  ;;  %v7252_v47 = vld [vmem:[#allocation6 + $0x48] sm:$0xff] }
 0x2f5   :  { %5997 = vrcp.f32 %v7201_v49  ;;  %vm1898_vm1 = vcmp.eq.f32.partialorder %v1897_v46, 8.507059e+37  ;;  %vm1913_vm2 = vcmp.eq.f32.partialorder %v1912_v9, 8.507059e+37  ;;  %v7290_v46 = vld [vmem:[#allocation3 + $0xa8] sm:$0xff]  ;;  %v7293_v9 = vld [vmem:[#allocation3 + $0xb0] sm:$0xff]  ;;  %vm1923_vm4 = vweird.f32 %v7201_v49 }
 0x2f6   :  { %5999 = vtanh.f32 %v1875_v24 }
 0x2f7   :  { %v5992_v38 = vpop.eup %5991  ;;  %6001 = vpow2.f32 %v5704_v52  ;;  %v7258_v52 = vld [vmem:[#allocation6 + $0x50] sm:$0xff] }
 0x2f8   :  { %v7204_v53 = vpop.eup %5993  ;;  %v7206_v12 = vmul.f32 %v5992_v38, %v1697_v41  ;;  %6003 = vpow2.f32 %v5705_v20  ;;  %v2083_v39 = vpop.f32.mrf.mxu2  ;;  %v7261_v20 = vld [vmem:[#allocation6 + $0x58] sm:$0xff] }
 0x2f9   :  { %v7208_v57 = vpop.eup %5995  ;;  %v1889_v40 = vmul.f32 %v7204_v53, %v7182_v54  ;;  %v2108_v10 = vadd.f32 %v2083_v39, %v2021_v33  ;;  %vm1894_vm10 = vweird.f32 %v7204_v53  ;;  %v1900_v33 = vor.u32 1.1754944e-38, %v1899_v23 }
 0x2fa   :  { %v1904_v36 = vmul.f32 %v7208_v57, %v7184_v14  ;;  %5707 = vmatmul.msk.f32.vlgmr.msrb.gmra.mxu0 %vm106_vm0, %v7206_v12  ;;  %5708 = vmatmul.msk.f32.vlgmr.msrb.gmra.mxu1 %vm106_vm0, %v7206_v12  ;;  %vm1909_vm11 = vweird.f32 %v7208_v57  ;;  %vm1895_vm14 = vmor %vm1893_vm13, %vm1894_vm10  ;;  %v1915_v54 = vor.u32 1.1754944e-38, %v1914_v2 }
 0x2fb   :  { %v1890_v59 = vsub.f32 1.0, %v1889_v40  ;;  %5709 = vmatmul.msk.f32.vlgmr.msrb.gmra.mxu2 %vm106_vm0, %v7206_v12  ;;  %5710 = vmatmul.msk.f32.vlgmr.msrb.gmra.mxu3 %vm106_vm0, %v7206_v12  ;;  %v7233_v22 = vpop.eup %5997  ;;  %v5706_v24 = vmul.f32 -1.442695, %v2108_v10  ;;  %vm1910_vm15 = vmor %vm1908_vm12, %vm1909_vm11 }
 0x2fc   :  { %v1905_v11 = vsub.f32 1.0, %v1904_v36  ;;  %2428 = vmatpush.msrb.mxu0 %v7227_v26  ;;  %2448 = vmatpush.msrb.mxu1 %v7230_v19  ;;  %v1919_v48 = vmul.f32 %v7233_v22, %v7201_v49  ;;  %v6000_v38 = vpop.eup %5999  ;;  %vm1924_vm3 = vweird.f32 %v7233_v22 }
 0x2fd   :  { %v1891_v3 = vmul.f32 %v7204_v53, %v1890_v59  ;;  %2468 = vmatpush.msrb.mxu2 %v7239_v29  ;;  %2488 = vmatpush.msrb.mxu3 %v7242_v45  ;;  %v6002_v40 = vpop.eup %6001  ;;  %6005 = vpow2.f32 %v5706_v24  ;;  %v7296_v24 = vld [vmem:[#allocation3 + $0xb8] sm:$0xff]  ;;  %vm1925_vm5 = vmor %vm1923_vm4, %vm1924_vm3 }
 0x2fe   :  { %v1906_v5 = vmul.f32 %v7208_v57, %v1905_v11  ;;  %2429 = vmatpush.msrb.mxu0 %v7249_v51  ;;  %2449 = vmatpush.msrb.mxu1 %v7252_v47  ;;  %v1920_v36 = vsub.f32 1.0, %v1919_v48  ;;  %v6004_v59 = vpop.eup %6003  ;;  %v7270_v11 = vadd.f32 1.0, %v6002_v40  ;;  %8349 = vst [vmem:[#allocation12_spill] sm:$0xff] %v7296_v24  ;;  %v7304_v40 = vld [vmem:[#allocation3 + $0x88] sm:$0xff] }
 0x2ff   :  { %v1892_v41 = vadd.f32 %v7204_v53, %v1891_v3  ;;  %2469 = vmatpush.msrb.mxu2 %v7258_v52  ;;  %2489 = vmatpush.msrb.mxu3 %v7261_v20  ;;  %v7273_v48 = vadd.f32 1.0, %v6004_v59  ;;  %8351 = vst [vmem:[#allocation14_spill] sm:$0xff] %v7304_v40  ;;  %v7313_v59 = vld [vmem:[#allocation3 + $0x90] sm:$0xff] }
 0x300   :  { %v1907_v14 = vadd.f32 %v7208_v57, %v1906_v5  ;;  %v1921_v23 = vmul.f32 %v7233_v22, %v1920_v36  ;;  %6007 = vrcp.f32 %v7270_v11  ;;  %8352 = vst [vmem:[#allocation15_spill] sm:$0xff] %v7313_v59  ;;  %vm2127_vm9 = vweird.f32 %v7270_v11 }
 0x301   :  { %v1896_v39 = vsel %vm1895_vm14, %v7204_v53, %v1892_v41  ;;  %6009 = vrcp.f32 %v7273_v48  ;;  %v7301_v41 = vld [vmem:[#allocation3 + $0x80] sm:$0xff]  ;;  %vm2142_vm10 = vweird.f32 %v7273_v48 }
 0x302   :  { %v1901_v10 = vsel %vm1898_vm1, %v1900_v33, %v1896_v39  ;;  %v1911_v3 = vsel %vm1910_vm15, %v7208_v57, %v1907_v14  ;;  %5714 = vmatmul.msk.f32.vlgmr.msra.gmra.mxu0 %vm106_vm0, %v7206_v12  ;;  %5715 = vmatmul.msk.f32.vlgmr.msra.gmra.mxu1 %vm106_vm0, %v7206_v12  ;;  %v7287_v57 = vld [vmem:[#allocation3 + $0xa0] sm:$0xff]  ;;  %8350 = vst [vmem:[#allocation13_spill] sm:$0xff] %v7301_v41  ;;  %v1927_v39 = vand.u32 2147483647, %v7201_v49 }
 0x303   :  { %v1916_v2 = vsel %vm1913_vm2, %v1915_v54, %v1911_v3  ;;  %v1935_v5 = vmul.f32 %v6000_v38, %v1901_v10  ;;  %5716 = vmatmul.msk.f32.vlgmr.msra.gmra.mxu2 %vm106_vm0, %v7206_v12  ;;  %5717 = vmatmul.msk.f32.vlgmr.msra.gmra.mxu3 %vm106_vm0, %v7206_v12  ;;  %v6006_v12 = vpop.eup %6005  ;;  %v2103_v38 = vpop.f32.mrf.mxu3  ;;  %v1922_v36 = vadd.f32 %v7233_v22, %v1921_v23  ;;  %v7316_v54 = vld [vmem:[#allocation3 + $0x98] sm:$0xff]  ;;  %v1929_v10 = vand.u32 2147483648, %v7201_v49 }
 0x304   :  { %v1934_v53 = vmul.f32 %v1916_v2, %v7045_v0  ;;  %2575 = vmatpush.msra.mxu0 %v7287_v57  ;;  %2595 = vmatpush.msra.mxu1 %v7290_v46  ;;  %v2022_v33 = vadd.f32 %v7225_v17, %v7038_v50  ;;  %v7311_v14 = vadd.f32 1.0, %v6006_v12  ;;  %8353 = vst [vmem:[#allocation32_spill] sm:$0xff] %v7316_v54  ;;  %vm1928_vm6 = vcmp.eq.f32.partialorder %v1927_v39, 8.507059e+37 }
 0x305   :  { %2615 = vmatpush.msra.mxu2 %v7293_v9  ;;  %2635 = vmatpush.msra.mxu3 %v7296_v24  ;;  %v1930_v12 = vor.u32 1.1754944e-38, %v1929_v10  ;;  %v2148_v50 = vand.u32 2147483648, %v7273_v48  ;;  %v2133_v49 = vand.u32 2147483648, %v7270_v11  ;;  %v2146_v39 = vand.u32 2147483647, %v7273_v48 }
 0x306   :  { %v7299_v0 = vadd.f32 %v1935_v5, %v1934_v53  ;;  %2576 = vmatpush.msra.mxu0 %v7301_v41  ;;  %2596 = vmatpush.msra.mxu1 %v7304_v40  ;;  %v6008_v3 = vpop.eup %6007  ;;  %v2109_v17 = vadd.f32 %v2103_v38, %v2022_v33  ;;  %v1926_v5 = vsel %vm1925_vm5, %v7233_v22, %v1922_v36  ;;  %v2131_v41 = vand.u32 2147483647, %v7270_v11 }
 0x307   :  { %2616 = vmatpush.msra.mxu2 %v7313_v59  ;;  %2636 = vmatpush.msra.mxu3 %v7316_v54  ;;  %v6010_v23 = vpop.eup %6009  ;;  %v2123_v2 = vmul.f32 %v6008_v3, %v7270_v11  ;;  %v1931_v33 = vsel %vm1928_vm6, %v1930_v12, %v1926_v5  ;;  %vm2128_vm7 = vweird.f32 %v6008_v3  ;;  %v2149_v5 = vor.u32 1.1754944e-38, %v2148_v50 }
 0x308   :  { %6011 = vtanh.f32 %v7299_v0  ;;  %v2138_v53 = vmul.f32 %v6010_v23, %v7273_v48  ;;  %vm2143_vm8 = vweird.f32 %v6010_v23  ;;  %vm2129_vm11 = vmor %vm2127_vm9, %vm2128_vm7  ;;  %vm2132_vm13 = vcmp.eq.f32.partialorder %v2131_v41, 8.507059e+37 }
 0x309   :  { %6013 = vrcp.f32 %v7311_v14  ;;  %v2124_v54 = vsub.f32 1.0, %v2123_v2  ;;  %vm7341_vm12 = vmor %vm2142_vm10, %vm2143_vm8  ;;  %vm2147_vm14 = vcmp.eq.f32.partialorder %v2146_v39, 8.507059e+37  ;;  %v7363_v39 = vld [vmem:[#allocation6 + $0x80] sm:$0xff]  ;;  %vm2157_vm1 = vweird.f32 %v7311_v14 }
 0x30a   :  { %v2139_v59 = vsub.f32 1.0, %v2138_v53  ;;  %6015 = vtanh.f32 %v2109_v17 }
 0x30b   :  { %v2125_v40 = vmul.f32 %v6008_v3, %v2124_v54  ;;  %v2134_v54 = vor.u32 1.1754944e-38, %v2133_v49  ;;  %v7349_v49 = vld [vmem:[#allocation6 + $0xa0] sm:$0xff] }
 0x30c   :  { %v2140_v36 = vmul.f32 %v6010_v23, %v2139_v59  ;;  %v2163_v59 = vand.u32 2147483648, %v7311_v14 }
 0x30d   :  { %v2126_v2 = vadd.f32 %v6008_v3, %v2125_v40 }
 0x30e   :  { %v6012_v38 = vpop.eup %6011  ;;  %v2141_v17 = vadd.f32 %v6010_v23, %v2140_v36  ;;  %v7359_v36 = vld [vmem:[#allocation6 + $0xb8] sm:$0xff] }
 0x30f   :  { %v7332_v24 = vpop.eup %6013  ;;  %v1938_v22 = vmul.f32 %v6012_v38, %v1931_v33  ;;  %v2130_v12 = vsel %vm2129_vm11, %v6008_v3, %v2126_v2  ;;  %v7352_v38 = vld [vmem:[#allocation6 + $0xa8] sm:$0xff]  ;;  %v7356_v33 = vld [vmem:[#allocation6 + $0xb0] sm:$0xff] }
 0x310   :  { %v2153_v10 = vmul.f32 %v7332_v24, %v7311_v14  ;;  %v6016_v11 = vpop.eup %6015  ;;  %v2135_v48 = vsel %vm2132_vm13, %v2134_v54, %v2130_v12  ;;  %v2145_v40 = vsel %vm7341_vm12, %v6010_v23, %v2141_v17  ;;  %v7369_v2 = vld [vmem:[#allocation6 + $0x90] sm:$0xff]  ;;  %v7372_v54 = vld [vmem:[#allocation6 + $0x98] sm:$0xff]  ;;  %vm2158_vm15 = vweird.f32 %v7332_v24 }
 0x311   :  { %5718 = vmatmul.msk.f32.vlgmr.msrb.gmra.mxu0 %vm106_vm0, %v1938_v22  ;;  %5719 = vmatmul.msk.f32.vlgmr.msrb.gmra.mxu1 %vm106_vm0, %v1938_v22  ;;  %v2150_v41 = vsel %vm2147_vm14, %v2149_v5, %v2145_v40  ;;  %v2169_v3 = vmul.f32 %v6016_v11, %v2135_v48  ;;  %v2161_v5 = vand.u32 2147483647, %v7311_v14  ;;  %vm2159_vm2 = vmor %vm2157_vm1, %vm2158_vm15  ;;  %v2164_v12 = vor.u32 1.1754944e-38, %v2163_v59 }
 0x312   :  { %v2154_v53 = vsub.f32 1.0, %v2153_v10  ;;  %5720 = vmatmul.msk.f32.vlgmr.msrb.gmra.mxu2 %vm106_vm0, %v1938_v22  ;;  %5721 = vmatmul.msk.f32.vlgmr.msrb.gmra.mxu3 %vm106_vm0, %v1938_v22  ;;  %v2168_v23 = vmul.f32 %v2150_v41, %v7097_v30  ;;  %v7366_v10 = vld [vmem:[#allocation6 + $0x88] sm:$0xff] }
 0x313   :  { %2662 = vmatpush.msrb.mxu0 %v7349_v49  ;;  %2682 = vmatpush.msrb.mxu1 %v7352_v38  ;;  %vm2162_vm3 = vcmp.eq.f32.partialorder %v2161_v5, 8.507059e+37 }
 0x314   :  { %v2155_v50 = vmul.f32 %v7332_v24, %v2154_v53  ;;  %2702 = vmatpush.msrb.mxu2 %v7356_v33  ;;  %2722 = vmatpush.msrb.mxu3 %v7359_v36  ;;  %v7375_v17 = vadd.f32 %v2169_v3, %v2168_v23  ;;  %v8359_v23 = vld [vmem:[#allocation21_spill] sm:$0xff] }
 0x315   :  { %2663 = vmatpush.msrb.mxu0 %v7363_v39  ;;  %2683 = vmatpush.msrb.mxu1 %v7366_v10 }
 0x316   :  { %2703 = vmatpush.msrb.mxu2 %v7369_v2  ;;  %2723 = vmatpush.msrb.mxu3 %v7372_v54  ;;  %v2156_v30 = vadd.f32 %v7332_v24, %v2155_v50  ;;  %6017 = vtanh.f32 %v7375_v17 }
 0x318   :  { %v2160_v53 = vsel %vm2159_vm2, %v7332_v24, %v2156_v30  ;;  %v284_v30 = vadd.f32 %v8359_v23, %v6701_v21 }
 0x319   :  { %5725 = vmatmul.msk.f32.vlgmr.msra.gmra.mxu0 %vm106_vm0, %v1938_v22  ;;  %5726 = vmatmul.msk.f32.vlgmr.msra.gmra.mxu1 %vm106_vm0, %v1938_v22 }
 0x31a   :  { %5727 = vmatmul.msk.f32.vlgmr.msra.gmra.mxu2 %vm106_vm0, %v1938_v22  ;;  %5728 = vmatmul.msk.f32.vlgmr.msra.gmra.mxu3 %vm106_vm0, %v1938_v22 }
 0x31b   :  { %2816 = vmatpush.msra.mxu0 %v7107_v61  ;;  %2836 = vmatpush.msra.mxu1 %v7110_v62  ;;  %v2165_v61 = vsel %vm2162_vm3, %v2164_v12, %v2160_v53  ;;  %v8356_v62 = vld [vmem:[#allocation16_spill] sm:$0xff] }
 0x31c   :  { %2856 = vmatpush.msra.mxu2 %v7115_v42  ;;  %2876 = vmatpush.msra.mxu3 %v7118_v27  ;;  %v6018_v14 = vpop.eup %6017  ;;  %v161_v42 = vadd.f32 %v8356_v62, %v6686_v55  ;;  %v8357_v27 = vld [vmem:[#allocation17_spill] sm:$0xff] }
 0x31d   :  { %2817 = vmatpush.msra.mxu0 %v7121_v35  ;;  %2837 = vmatpush.msra.mxu1 %v7124_v43  ;;  %v2172_v22 = vmul.f32 %v6018_v14, %v2165_v61  ;;  %v202_v35 = vadd.f32 %v8357_v27, %v6688_v56 }
 0x31e   :  { %2857 = vmatpush.msra.mxu2 %v7128_v58  ;;  %2877 = vmatpush.msra.mxu3 %v7131_v18 }
 0x321   :  { %5729 = vmatmul.msk.f32.vlgmr.msrb.gmra.mxu0 %vm106_vm0, %v2172_v22  ;;  %5730 = vmatmul.msk.f32.vlgmr.msrb.gmra.mxu1 %vm106_vm0, %v2172_v22 }
 0x322   :  { %5731 = vmatmul.msk.f32.vlgmr.msrb.gmra.mxu2 %vm106_vm0, %v2172_v22  ;;  %5732 = vmatmul.msk.f32.vlgmr.msrb.gmra.mxu3 %vm106_vm0, %v2172_v22 }
 0x323   :  { %2963 = vmatpush.msrb.mxu0 %v7138_v6  ;;  %2983 = vmatpush.msrb.mxu1 %v7141_v7 }
 0x324   :  { %3003 = vmatpush.msrb.mxu2 %v7144_v32  ;;  %3023 = vmatpush.msrb.mxu3 %v7147_v63  ;;  %v8358_v63 = vld [vmem:[#allocation18_spill] sm:$0xff] }
 0x325   :  { %2964 = vmatpush.msrb.mxu0 %v7150_v8  ;;  %2984 = vmatpush.msrb.mxu1 %v7153_v34  ;;  %v243_v8 = vadd.f32 %v8358_v63, %v6696_v1 }
 0x326   :  { %3004 = vmatpush.msrb.mxu2 %v7156_v37  ;;  %3024 = vmatpush.msrb.mxu3 %v7159_v31 }
 0x377   :  { %v2197_v43 = vpop.f32.mrf.mxu0  ;;  %v2217_v58 = vpop.f32.mrf.mxu1 }
 0x378   :  { %v2260_v18 = vadd.f32 %v2197_v43, %v161_v42  ;;  %v2261_v6 = vadd.f32 %v2217_v58, %v202_v35 }
 0x37a   :  { %v5711_v7 = vmul.f32 -1.442695, %v2260_v18  ;;  %v5712_v32 = vmul.f32 -1.442695, %v2261_v6 }
 0x37c   :  { %6019 = vpow2.f32 %v5711_v7 }
 0x37d   :  { %6021 = vpow2.f32 %v5712_v32 }
 0x37e   :  { %v2237_v34 = vpop.f32.mrf.mxu2  ;;  %v2257_v3 = vpop.f32.mrf.mxu3 }
 0x37f   :  { %v2262_v37 = vadd.f32 %v2237_v34, %v243_v8  ;;  %v2344_v50 = vpop.f32.mrf.mxu0  ;;  %v2364_v41 = vpop.f32.mrf.mxu1  ;;  %v2263_v53 = vadd.f32 %v2257_v3, %v284_v30 }
 0x380   :  { %v2407_v42 = vadd.f32 %v2344_v50, %v6796_v4  ;;  %v2408_v27 = vadd.f32 %v2364_v41, %v8336_v44 }
 0x381   :  { %v5713_v31 = vmul.f32 -1.442695, %v2262_v37 }
 0x382   :  { %v6020_v24 = vpop.eup %6019 }
 0x383   :  { %v6022_v11 = vpop.eup %6021  ;;  %v2273_v48 = vadd.f32 1.0, %v6020_v24  ;;  %6023 = vpow2.f32 %v5713_v31 }
 0x384   :  { %v2274_v40 = vadd.f32 1.0, %v6022_v11 }
 0x385   :  { %6025 = vrcp.f32 %v2273_v48  ;;  %v2285_v43 = vand.u32 2147483647, %v2273_v48  ;;  %v2287_v7 = vand.u32 2147483648, %v2273_v48  ;;  %vm2281_vm7 = vweird.f32 %v2273_v48 }
 0x386   :  { %6027 = vrcp.f32 %v2274_v40  ;;  %v2384_v14 = vpop.f32.mrf.mxu2  ;;  %v2302_v8 = vand.u32 2147483648, %v2274_v40  ;;  %v2300_v37 = vand.u32 2147483647, %v2274_v40  ;;  %vm2296_vm6 = vweird.f32 %v2274_v40  ;;  %v2404_v3 = vpop.f32.mrf.mxu3 }
 0x387   :  { %vm2286_vm8 = vcmp.eq.f32.partialorder %v2285_v43, 8.507059e+37  ;;  %v2288_v30 = vor.u32 1.1754944e-38, %v2287_v7 }
 0x388   :  { %vm2301_vm11 = vcmp.eq.f32.partialorder %v2300_v37, 8.507059e+37 }
 0x389   :  { %v6024_v59 = vpop.eup %6023 }
 0x38a   :  { %v7416_v5 = vadd.f32 1.0, %v6024_v59 }
 0x38b   :  { %v6026_v12 = vpop.eup %6025 }
 0x38c   :  { %v6028_v61 = vpop.eup %6027  ;;  %v2277_v22 = vmul.f32 %v6026_v12, %v2273_v48  ;;  %6029 = vrcp.f32 %v7416_v5  ;;  %vm2282_vm4 = vweird.f32 %v6026_v12  ;;  %vm2311_vm13 = vweird.f32 %v7416_v5 }
 0x38d   :  { %v2292_v62 = vmul.f32 %v6028_v61, %v2274_v40  ;;  %6031 = vtanh.f32 %v2263_v53  ;;  %vm2297_vm5 = vweird.f32 %v6028_v61  ;;  %vm2283_vm9 = vmor %vm2281_vm7, %vm2282_vm4 }
 0x38e   :  { %v2278_v35 = vsub.f32 1.0, %v2277_v22  ;;  %v2431_v58 = vpop.f32.mrf.mxu0  ;;  %v2451_v18 = vpop.f32.mrf.mxu1  ;;  %vm2298_vm10 = vmor %vm2296_vm6, %vm2297_vm5  ;;  %v2303_v22 = vor.u32 1.1754944e-38, %v2302_v8 }
 0x38f   :  { %v2293_v6 = vsub.f32 1.0, %v2292_v62  ;;  %v2494_v32 = vadd.f32 %v2431_v58, %v2407_v42  ;;  %v2495_v63 = vadd.f32 %v2451_v18, %v2408_v27  ;;  %v2409_v42 = vadd.f32 %v2384_v14, %v8337_v25 }
 0x390   :  { %v2279_v34 = vmul.f32 %v6026_v12, %v2278_v35 }
 0x391   :  { %v2294_v31 = vmul.f32 %v6028_v61, %v2293_v6  ;;  %v5722_v24 = vmul.f32 -1.442695, %v2494_v32  ;;  %v5723_v11 = vmul.f32 -1.442695, %v2495_v63 }
 0x392   :  { %v6030_v50 = vpop.eup %6029  ;;  %v2280_v41 = vadd.f32 %v6026_v12, %v2279_v34 }
 0x393   :  { %v2307_v23 = vmul.f32 %v6030_v50, %v7416_v5  ;;  %v2295_v59 = vadd.f32 %v6028_v61, %v2294_v31  ;;  %6033 = vpow2.f32 %v5722_v24  ;;  %v6032_v53 = vpop.eup %6031  ;;  %vm2312_vm12 = vweird.f32 %v6030_v50 }
 0x394   :  { %v2284_v62 = vsel %vm2283_vm9, %v6026_v12, %v2280_v41  ;;  %6035 = vpow2.f32 %v5723_v11  ;;  %vm7436_vm14 = vmor %vm2311_vm13, %vm2312_vm12 }
 0x395   :  { %v2308_v27 = vsub.f32 1.0, %v2307_v23  ;;  %v2289_v40 = vsel %vm2286_vm8, %v2288_v30, %v2284_v62  ;;  %v2299_v35 = vsel %vm2298_vm10, %v6028_v61, %v2295_v59  ;;  %v2471_v48 = vpop.f32.mrf.mxu2  ;;  %v2317_v61 = vand.u32 2147483648, %v7416_v5  ;;  %v2491_v11 = vpop.f32.mrf.mxu3 }
 0x396   :  { %v2304_v43 = vsel %vm2301_vm11, %v2303_v22, %v2299_v35  ;;  %v2323_v58 = vmul.f32 %v6032_v53, %v2289_v40  ;;  %v2496_v18 = vadd.f32 %v2471_v48, %v2409_v42  ;;  %v2578_v6 = vpop.f32.mrf.mxu0  ;;  %v2598_v7 = vpop.f32.mrf.mxu1  ;;  %v2410_v59 = vadd.f32 %v2404_v3, %v6814_v60 }
 0x397   :  { %v2309_v32 = vmul.f32 %v6030_v50, %v2308_v27  ;;  %v2322_v63 = vmul.f32 %v2304_v43, %v7180_v15  ;;  %v2315_v15 = vand.u32 2147483647, %v7416_v5  ;;  %v2641_v53 = vadd.f32 %v2578_v6, %v6978_v28 }
 0x398   :  { %v5724_v34 = vmul.f32 -1.442695, %v2496_v18  ;;  %v2642_v22 = vadd.f32 %v2598_v7, %v8348_v13  ;;  %v2318_v5 = vor.u32 1.1754944e-38, %v2317_v61  ;;  %v2497_v40 = vadd.f32 %v2491_v11, %v2410_v59 }
 0x399   :  { %v6034_v31 = vpop.eup %6033  ;;  %v7425_v8 = vadd.f32 %v2323_v58, %v2322_v63  ;;  %v2310_v14 = vadd.f32 %v6030_v50, %v2309_v32  ;;  %vm2316_vm15 = vcmp.eq.f32.partialorder %v2315_v15, 8.507059e+37 }
 0x39a   :  { %v6036_v12 = vpop.eup %6035  ;;  %v7427_v24 = vadd.f32 1.0, %v6034_v31  ;;  %6037 = vpow2.f32 %v5724_v34 }
 0x39b   :  { %6039 = vtanh.f32 %v7425_v8  ;;  %v7431_v37 = vadd.f32 1.0, %v6036_v12  ;;  %v2314_v30 = vsel %vm7436_vm14, %v6030_v50, %v2310_v14 }
 0x39c   :  { %6041 = vrcp.f32 %v7427_v24  ;;  %v2319_v58 = vsel %vm2316_vm15, %v2318_v5, %v2314_v30  ;;  %v2519_v12 = vand.u32 2147483647, %v7427_v24  ;;  %v2521_v11 = vand.u32 2147483648, %v7427_v24 }
 0x39d   :  { %6043 = vrcp.f32 %v7431_v37  ;;  %v2618_v23 = vpop.f32.mrf.mxu2  ;;  %v2536_v15 = vand.u32 2147483648, %v7431_v37  ;;  %v2638_v41 = vpop.f32.mrf.mxu3  ;;  %v2534_v59 = vand.u32 2147483647, %v7431_v37  ;;  %vm2530_vm3 = vweird.f32 %v7431_v37 }
 0x39e   :  { %v2665_v62 = vpop.f32.mrf.mxu0  ;;  %v2685_v42 = vpop.f32.mrf.mxu1  ;;  %v2643_v14 = vadd.f32 %v2618_v23, %v6990_v16  ;;  %vm2515_vm4 = vweird.f32 %v7427_v24  ;;  %vm2520_vm6 = vcmp.eq.f32.partialorder %v2519_v12, 8.507059e+37  ;;  %v8367_v12 = vld [vmem:[#allocation32_spill] sm:$0xff] }
 0x39f   :  { %v2728_v35 = vadd.f32 %v2665_v62, %v2641_v53  ;;  %v2729_v48 = vadd.f32 %v2685_v42, %v2642_v22  ;;  %vm2535_vm8 = vcmp.eq.f32.partialorder %v2534_v59, 8.507059e+37 }
 0x3a0   :  { %v6038_v27 = vpop.eup %6037 }
 0x3a1   :  { %v6040_v43 = vpop.eup %6039  ;;  %v7446_v18 = vadd.f32 1.0, %v6038_v27  ;;  %v5733_v3 = vmul.f32 -1.442695, %v2728_v35  ;;  %v5734_v63 = vmul.f32 -1.442695, %v2729_v48 }
 0x3a2   :  { %v6042_v32 = vpop.eup %6041  ;;  %v7448_v50 = vmul.f32 %v6040_v43, %v2319_v58 }
 0x3a3   :  { %v6044_v6 = vpop.eup %6043  ;;  %v2511_v7 = vmul.f32 %v6042_v32, %v7427_v24  ;;  %6045 = vrcp.f32 %v7446_v18  ;;  %vm2516_vm1 = vweird.f32 %v6042_v32  ;;  %v2537_v24 = vor.u32 1.1754944e-38, %v2536_v15 }
 0x3a4   :  { %v2526_v34 = vmul.f32 %v6044_v6, %v7431_v37  ;;  %6047 = vtanh.f32 %v2497_v40  ;;  %5736 = vmatmul.msk.f32.vlgmr.msra.gmra.mxu0 %vm106_vm0, %v7448_v50  ;;  %5737 = vmatmul.msk.f32.vlgmr.msra.gmra.mxu1 %vm106_vm0, %v7448_v50  ;;  %vm2531_vm2 = vweird.f32 %v6044_v6  ;;  %vm2517_vm5 = vmor %vm2515_vm4, %vm2516_vm1  ;;  %vm2545_vm10 = vweird.f32 %v7446_v18 }
 0x3a5   :  { %v2512_v31 = vsub.f32 1.0, %v2511_v7  ;;  %6049 = vpow2.f32 %v5733_v3  ;;  %5738 = vmatmul.msk.f32.vlgmr.msra.gmra.mxu2 %vm106_vm0, %v7448_v50  ;;  %5739 = vmatmul.msk.f32.vlgmr.msra.gmra.mxu3 %vm106_vm0, %v7448_v50  ;;  %v2705_v30 = vpop.f32.mrf.mxu2  ;;  %vm2532_vm7 = vmor %vm2530_vm3, %vm2531_vm2  ;;  %v8362_v3 = vld [vmem:[#allocation12_spill] sm:$0xff]  ;;  %v8364_v7 = vld [vmem:[#allocation14_spill] sm:$0xff] }
 0x3a6   :  { %v2527_v61 = vsub.f32 1.0, %v2526_v34  ;;  %6051 = vpow2.f32 %v5734_v63  ;;  %3050 = vmatpush.msra.mxu0 %v7227_v26  ;;  %3070 = vmatpush.msra.mxu1 %v7230_v19  ;;  %v2730_v53 = vadd.f32 %v2705_v30, %v2643_v14 }
 0x3a7   :  { %v2513_v23 = vmul.f32 %v6042_v32, %v2512_v31  ;;  %3090 = vmatpush.msra.mxu2 %v7239_v29  ;;  %3110 = vmatpush.msra.mxu3 %v7242_v45  ;;  %v8366_v31 = vld [vmem:[#allocation15_spill] sm:$0xff] }
 0x3a8   :  { %v2528_v22 = vmul.f32 %v6044_v6, %v2527_v61  ;;  %3051 = vmatpush.msra.mxu0 %v7249_v51  ;;  %3071 = vmatpush.msra.mxu1 %v7252_v47  ;;  %v5735_v19 = vmul.f32 -1.442695, %v2730_v53  ;;  %v2522_v51 = vor.u32 1.1754944e-38, %v2521_v11  ;;  %v2549_v61 = vand.u32 2147483647, %v7446_v18 }
 0x3a9   :  { %v7472_v5 = vpop.eup %6045  ;;  %v2514_v26 = vadd.f32 %v6042_v32, %v2513_v23  ;;  %3091 = vmatpush.msra.mxu2 %v7258_v52  ;;  %3111 = vmatpush.msra.mxu3 %v7261_v20 }
 0x3aa   :  { %v6048_v29 = vpop.eup %6047  ;;  %v2541_v45 = vmul.f32 %v7472_v5, %v7446_v18  ;;  %v2529_v47 = vadd.f32 %v6044_v6, %v2528_v22  ;;  %6053 = vpow2.f32 %v5735_v19  ;;  %vm2546_vm9 = vweird.f32 %v7472_v5 }
 0x3ab   :  { %v6050_v62 = vpop.eup %6049  ;;  %v2518_v42 = vsel %vm2517_vm5, %v6042_v32, %v2514_v26  ;;  %vm2547_vm11 = vmor %vm2545_vm10, %vm2546_vm9  ;;  %vm2550_vm12 = vcmp.eq.f32.partialorder %v2549_v61, 8.507059e+37 }
 0x3ac   :  { %v6052_v37 = vpop.eup %6051  ;;  %v2542_v52 = vsub.f32 1.0, %v2541_v45  ;;  %v2523_v27 = vsel %vm2520_vm6, %v2522_v51, %v2518_v42  ;;  %v2533_v20 = vsel %vm2532_vm7, %v6044_v6, %v2529_v47  ;;  %v7482_v40 = vadd.f32 1.0, %v6050_v62  ;;  %5743 = vmatmul.msk.f32.vlgmr.msrb.gmra.mxu0 %vm106_vm0, %v7448_v50  ;;  %5744 = vmatmul.msk.f32.vlgmr.msrb.gmra.mxu1 %vm106_vm0, %v7448_v50  ;;  %v2725_v6 = vpop.f32.mrf.mxu3 }
 0x3ad   :  { %v2538_v35 = vsel %vm2535_vm8, %v2537_v24, %v2533_v20  ;;  %v2557_v48 = vmul.f32 %v6048_v29, %v2523_v27  ;;  %v7488_v43 = vadd.f32 1.0, %v6052_v37  ;;  %5745 = vmatmul.msk.f32.vlgmr.msrb.gmra.mxu2 %vm106_vm0, %v7448_v50  ;;  %5746 = vmatmul.msk.f32.vlgmr.msrb.gmra.mxu3 %vm106_vm0, %v7448_v50  ;;  %v8363_v50 = vld [vmem:[#allocation13_spill] sm:$0xff] }
 0x3ae   :  { %v2543_v58 = vmul.f32 %v7472_v5, %v2542_v52  ;;  %v2556_v32 = vmul.f32 %v2538_v35, %v7299_v0  ;;  %6055 = vrcp.f32 %v7482_v40  ;;  %3197 = vmatpush.msrb.mxu0 %v7287_v57  ;;  %3217 = vmatpush.msrb.mxu1 %v7290_v46  ;;  %v8365_v57 = vld [vmem:[#allocation33_spill] sm:$0xff]  ;;  %v2755_v45 = vand.u32 2147483648, %v7482_v40 }
 0x3af   :  { %6057 = vrcp.f32 %v7488_v43  ;;  %3237 = vmatpush.msrb.mxu2 %v7293_v9  ;;  %3257 = vmatpush.msrb.mxu3 %v8362_v3  ;;  %v2644_v46 = vadd.f32 %v2638_v41, %v8365_v57  ;;  %v2551_v9 = vand.u32 2147483648, %v7446_v18  ;;  %v2770_v18 = vand.u32 2147483648, %v7488_v43 }
 0x3b0   :  { %v7502_v63 = vadd.f32 %v2557_v48, %v2556_v32  ;;  %3198 = vmatpush.msrb.mxu0 %v8363_v50  ;;  %3218 = vmatpush.msrb.mxu1 %v8364_v7  ;;  %v6054_v0 = vpop.eup %6053  ;;  %v2544_v34 = vadd.f32 %v7472_v5, %v2543_v58  ;;  %v2768_v24 = vand.u32 2147483647, %v7488_v43  ;;  %vm2749_vm15 = vweird.f32 %v7482_v40 }
 0x3b1   :  { %3238 = vmatpush.msrb.mxu2 %v8366_v31  ;;  %3258 = vmatpush.msrb.mxu3 %v8367_v12  ;;  %v7513_v14 = vadd.f32 1.0, %v6054_v0  ;;  %v2731_v15 = vadd.f32 %v2725_v6, %v2644_v46  ;;  %v2552_v59 = vor.u32 1.1754944e-38, %v2551_v9  ;;  %vm2764_vm1 = vweird.f32 %v7488_v43  ;;  %v7579_v46 = vld [vmem:[#allocation6 + $0x8] sm:$0xff]  ;;  %v7582_v12 = vld [vmem:[#allocation6 + $0x10] sm:$0xff]  ;;  %v7585_v9 = vld [vmem:[#allocation6 + $0x18] sm:$0xff] }
 0x3b2   :  { %6059 = vtanh.f32 %v7502_v63  ;;  %v2548_v30 = vsel %vm2547_vm11, %v7472_v5, %v2544_v34  ;;  %v2753_v5 = vand.u32 2147483647, %v7482_v40  ;;  %v2756_v27 = vor.u32 1.1754944e-38, %v2755_v45  ;;  %v7576_v34 = vld [vmem:[#allocation6] sm:$0xff] }
 0x3b3   :  { %6061 = vrcp.f32 %v7513_v14  ;;  %v2553_v19 = vsel %vm2550_vm12, %v2552_v59, %v2548_v30  ;;  %v2771_v48 = vor.u32 1.1754944e-38, %v2770_v18  ;;  %vm2769_vm5 = vcmp.eq.f32.partialorder %v2768_v24, 8.507059e+37  ;;  %v7598_v30 = vld [vmem:[#allocation3 + $0x70] sm:$0xff]  ;;  %v7604_v59 = vld [vmem:[#allocation3 + $0x40] sm:$0xff] }
 0x3b4   :  { %v6056_v11 = vpop.eup %6055  ;;  %6063 = vtanh.f32 %v2731_v15  ;;  %vm2754_vm4 = vcmp.eq.f32.partialorder %v2753_v5, 8.507059e+37  ;;  %vm2779_vm7 = vweird.f32 %v7513_v14  ;;  %v8371_v18 = vld [vmem:[#allocation20_spill] sm:$0xff] }
 0x3b5   :  { %v6058_v41 = vpop.eup %6057  ;;  %v2745_v23 = vmul.f32 %v6056_v11, %v7482_v40  ;;  %vm2750_vm13 = vweird.f32 %v6056_v11  ;;  %v205_v45 = vadd.f32 %v8371_v18, %v6688_v56 }
 0x3b6   :  { %v2760_v53 = vmul.f32 %v6058_v41, %v7488_v43  ;;  %vm2765_vm14 = vweird.f32 %v6058_v41  ;;  %vm2751_vm2 = vmor %vm2749_vm15, %vm2750_vm13 }
 0x3b7   :  { %v2746_v22 = vsub.f32 1.0, %v2745_v23  ;;  %vm2766_vm3 = vmor %vm2764_vm1, %vm2765_vm14  ;;  %v7601_v23 = vld [vmem:[#allocation3 + $0x78] sm:$0xff] }
 0x3b8   :  { %v6060_v26 = vpop.eup %6059  ;;  %v2761_v29 = vsub.f32 1.0, %v2760_v53  ;;  %v7607_v53 = vld [vmem:[#allocation3 + $0x48] sm:$0xff] }
 0x3b9   :  { %v2560_v51 = vmul.f32 %v6060_v26, %v2553_v19  ;;  %v2747_v47 = vmul.f32 %v6056_v11, %v2746_v22  ;;  %v7524_v62 = vpop.eup %6061  ;;  %v7610_v22 = vld [vmem:[#allocation3 + $0x50] sm:$0xff]  ;;  %v7613_v26 = vld [vmem:[#allocation3 + $0x58] sm:$0xff] }
 0x3ba   :  { %v2762_v42 = vmul.f32 %v6058_v41, %v2761_v29  ;;  %v2775_v37 = vmul.f32 %v7524_v62, %v7513_v14  ;;  %v6064_v35 = vpop.eup %6063  ;;  %vm2780_vm6 = vweird.f32 %v7524_v62  ;;  %v8370_v19 = vld [vmem:[#allocation19_spill] sm:$0xff] }
 0x3bb   :  { %v2748_v52 = vadd.f32 %v6056_v11, %v2747_v47  ;;  %5747 = vmatmul.msk.f32.vlgmr.msra.gmra.mxu0 %vm106_vm0, %v2560_v51  ;;  %5748 = vmatmul.msk.f32.vlgmr.msra.gmra.mxu1 %vm106_vm0, %v2560_v51  ;;  %vm7563_vm8 = vmor %vm2779_vm7, %vm2780_vm6  ;;  %v164_v29 = vadd.f32 %v8370_v19, %v6686_v55 }
 0x3bc   :  { %v2763_v20 = vadd.f32 %v6058_v41, %v2762_v42  ;;  %5749 = vmatmul.msk.f32.vlgmr.msra.gmra.mxu2 %vm106_vm0, %v2560_v51  ;;  %5750 = vmatmul.msk.f32.vlgmr.msra.gmra.mxu3 %vm106_vm0, %v2560_v51  ;;  %v2776_v58 = vsub.f32 1.0, %v2775_v37  ;;  %v8372_v37 = vld [vmem:[#allocation22_spill] sm:$0xff] }
 0x3bd   :  { %v2752_v32 = vsel %vm2751_vm2, %v6056_v11, %v2748_v52  ;;  %3284 = vmatpush.msra.mxu0 %v7349_v49  ;;  %3304 = vmatpush.msra.mxu1 %v7352_v38  ;;  %v7592_v11 = vld [vmem:[#allocation3 + $0x60] sm:$0xff]  ;;  %v246_v52 = vadd.f32 %v8372_v37, %v6696_v1 }
 0x3be   :  { %v2757_v40 = vsel %vm2754_vm4, %v2756_v27, %v2752_v32  ;;  %v2767_v3 = vsel %vm2766_vm3, %v6058_v41, %v2763_v20  ;;  %3324 = vmatpush.msra.mxu2 %v7356_v33  ;;  %3344 = vmatpush.msra.mxu3 %v7359_v36  ;;  %v2777_v43 = vmul.f32 %v7524_v62, %v2776_v58  ;;  %v2785_v33 = vand.u32 2147483648, %v7513_v14  ;;  %v7595_v41 = vld [vmem:[#allocation3 + $0x68] sm:$0xff] }
 0x3bf   :  { %v2772_v6 = vsel %vm2769_vm5, %v2771_v48, %v2767_v3  ;;  %v2791_v50 = vmul.f32 %v6064_v35, %v2757_v40  ;;  %3285 = vmatpush.msra.mxu0 %v7363_v39  ;;  %3305 = vmatpush.msra.mxu1 %v7366_v10  ;;  %v2783_v36 = vand.u32 2147483647, %v7513_v14  ;;  %v7557_v39 = vld [vmem:[#allocation6 + $0x20] sm:$0xff]  ;;  %v7560_v10 = vld [vmem:[#allocation6 + $0x28] sm:$0xff] }
 0x3c0   :  { %v2790_v7 = vmul.f32 %v2772_v6, %v7375_v17  ;;  %3325 = vmatpush.msra.mxu2 %v7369_v2  ;;  %3345 = vmatpush.msra.mxu3 %v7372_v54  ;;  %v2778_v38 = vadd.f32 %v7524_v62, %v2777_v43  ;;  %v7567_v54 = vld [vmem:[#allocation6 + $0x30] sm:$0xff]  ;;  %v7570_v17 = vld [vmem:[#allocation6 + $0x38] sm:$0xff]  ;;  %v2786_v31 = vor.u32 1.1754944e-38, %v2785_v33 }
 0x3c1   :  { %vm2784_vm9 = vcmp.eq.f32.partialorder %v2783_v36, 8.507059e+37 }
 0x3c2   :  { %v7545_v49 = vadd.f32 %v2791_v50, %v2790_v7  ;;  %v2782_v0 = vsel %vm7563_vm8, %v7524_v62, %v2778_v38  ;;  %v8373_v50 = vld [vmem:[#allocation25_spill] sm:$0xff] }
 0x3c3   :  { %5754 = vmatmul.msk.f32.vlgmr.msrb.gmra.mxu0 %vm106_vm0, %v2560_v51  ;;  %5755 = vmatmul.msk.f32.vlgmr.msrb.gmra.mxu1 %vm106_vm0, %v2560_v51  ;;  %v2787_v61 = vsel %vm2784_vm9, %v2786_v31, %v2782_v0  ;;  %v287_v7 = vadd.f32 %v8373_v50, %v6701_v21 }
 0x3c4   :  { %6065 = vtanh.f32 %v7545_v49  ;;  %5756 = vmatmul.msk.f32.vlgmr.msrb.gmra.mxu2 %vm106_vm0, %v2560_v51  ;;  %5757 = vmatmul.msk.f32.vlgmr.msrb.gmra.mxu3 %vm106_vm0, %v2560_v51 }
 0x3c5   :  { %3438 = vmatpush.msrb.mxu0 %v7557_v39  ;;  %3458 = vmatpush.msrb.mxu1 %v7560_v10 }
 0x3c6   :  { %3478 = vmatpush.msrb.mxu2 %v7567_v54  ;;  %3498 = vmatpush.msrb.mxu3 %v7570_v17 }
 0x3c7   :  { %3439 = vmatpush.msrb.mxu0 %v7576_v34  ;;  %3459 = vmatpush.msrb.mxu1 %v7579_v46 }
 0x3c8   :  { %3479 = vmatpush.msrb.mxu2 %v7582_v12  ;;  %3499 = vmatpush.msrb.mxu3 %v7585_v9 }
 0x3ca   :  { %v6066_v14 = vpop.eup %6065 }
 0x3cb   :  { %v2794_v15 = vmul.f32 %v6066_v14, %v2787_v61 }
 0x3cd   :  { %5758 = vmatmul.msk.f32.vlgmr.msra.gmra.mxu0 %vm106_vm0, %v2794_v15  ;;  %5759 = vmatmul.msk.f32.vlgmr.msra.gmra.mxu1 %vm106_vm0, %v2794_v15 }
 0x3ce   :  { %5760 = vmatmul.msk.f32.vlgmr.msra.gmra.mxu2 %vm106_vm0, %v2794_v15  ;;  %5761 = vmatmul.msk.f32.vlgmr.msra.gmra.mxu3 %vm106_vm0, %v2794_v15 }
 0x3cf   :  { %3585 = vmatpush.msra.mxu0 %v7592_v11  ;;  %3605 = vmatpush.msra.mxu1 %v7595_v41 }
 0x3d0   :  { %3625 = vmatpush.msra.mxu2 %v7598_v30  ;;  %3645 = vmatpush.msra.mxu3 %v7601_v23 }
 0x3d1   :  { %3586 = vmatpush.msra.mxu0 %v7604_v59  ;;  %3606 = vmatpush.msra.mxu1 %v7607_v53 }
 0x3d2   :  { %3626 = vmatpush.msra.mxu2 %v7610_v22  ;;  %3646 = vmatpush.msra.mxu3 %v7613_v26 }
 0x421   :  { %v2819_v51 = vpop.f32.mrf.mxu0  ;;  %v2839_v47 = vpop.f32.mrf.mxu1 }
 0x422   :  { %v2882_v5 = vadd.f32 %v2819_v51, %v164_v29  ;;  %v2883_v62 = vadd.f32 %v2839_v47, %v205_v45 }
 0x424   :  { %v5740_v42 = vmul.f32 -1.442695, %v2882_v5  ;;  %v5741_v24 = vmul.f32 -1.442695, %v2883_v62 }
 0x426   :  { %6067 = vpow2.f32 %v5740_v42 }
 0x427   :  { %6069 = vpow2.f32 %v5741_v24 }
 0x428   :  { %v2859_v27 = vpop.f32.mrf.mxu2  ;;  %v2879_v6 = vpop.f32.mrf.mxu3 }
 0x429   :  { %v2884_v20 = vadd.f32 %v2859_v27, %v246_v52  ;;  %v2966_v3 = vpop.f32.mrf.mxu0  ;;  %v2986_v43 = vpop.f32.mrf.mxu1  ;;  %v2885_v36 = vadd.f32 %v2879_v6, %v287_v7 }
 0x42a   :  { %v3029_v15 = vadd.f32 %v2966_v3, %v6796_v4  ;;  %v3030_v19 = vadd.f32 %v2986_v43, %v8336_v44 }
 0x42b   :  { %v5742_v35 = vmul.f32 -1.442695, %v2884_v20 }
 0x42c   :  { %v6068_v48 = vpop.eup %6067 }
 0x42d   :  { %v6070_v58 = vpop.eup %6069  ;;  %v2895_v32 = vadd.f32 1.0, %v6068_v48  ;;  %6071 = vpow2.f32 %v5742_v35 }
 0x42e   :  { %v2896_v40 = vadd.f32 1.0, %v6070_v58 }
 0x42f   :  { %6073 = vrcp.f32 %v2895_v32  ;;  %v2907_v18 = vand.u32 2147483647, %v2895_v32  ;;  %v2909_v5 = vand.u32 2147483648, %v2895_v32  ;;  %vm2903_vm13 = vweird.f32 %v2895_v32 }
 0x430   :  { %6075 = vrcp.f32 %v2896_v40  ;;  %v3006_v0 = vpop.f32.mrf.mxu2  ;;  %v2924_v24 = vand.u32 2147483648, %v2896_v40  ;;  %v2922_v52 = vand.u32 2147483647, %v2896_v40  ;;  %vm2918_vm12 = vweird.f32 %v2896_v40  ;;  %v3026_v50 = vpop.f32.mrf.mxu3 }
 0x431   :  { %vm2908_vm14 = vcmp.eq.f32.partialorder %v2907_v18, 8.507059e+37  ;;  %v2910_v43 = vor.u32 1.1754944e-38, %v2909_v5 }
 0x432   :  { %vm2923_vm2 = vcmp.eq.f32.partialorder %v2922_v52, 8.507059e+37 }
 0x433   :  { %v6072_v38 = vpop.eup %6071 }
 0x434   :  { %v7624_v33 = vadd.f32 1.0, %v6072_v38  ;;  %v2925_v38 = vor.u32 1.1754944e-38, %v2924_v24 }
 0x435   :  { %v6074_v2 = vpop.eup %6073 }
 0x436   :  { %v6076_v31 = vpop.eup %6075  ;;  %v2899_v14 = vmul.f32 %v6074_v2, %v2895_v32  ;;  %6077 = vrcp.f32 %v7624_v33  ;;  %vm2904_vm10 = vweird.f32 %v6074_v2  ;;  %vm2933_vm4 = vweird.f32 %v7624_v33 }
 0x437   :  { %v2914_v61 = vmul.f32 %v6076_v31, %v2896_v40  ;;  %6079 = vtanh.f32 %v2885_v36  ;;  %vm2919_vm11 = vweird.f32 %v6076_v31  ;;  %vm2905_vm15 = vmor %vm2903_vm13, %vm2904_vm10 }
 0x438   :  { %v2900_v29 = vsub.f32 1.0, %v2899_v14  ;;  %v3053_v45 = vpop.f32.mrf.mxu0  ;;  %v3073_v51 = vpop.f32.mrf.mxu1  ;;  %vm2920_vm1 = vmor %vm2918_vm12, %vm2919_vm11  ;;  %v3031_v14 = vadd.f32 %v3006_v0, %v8337_v25 }
 0x439   :  { %v2915_v47 = vsub.f32 1.0, %v2914_v61  ;;  %v3116_v62 = vadd.f32 %v3053_v45, %v3029_v15  ;;  %v3117_v42 = vadd.f32 %v3073_v51, %v3030_v19 }
 0x43a   :  { %v2901_v37 = vmul.f32 %v6074_v2, %v2900_v29 }
 0x43b   :  { %v2916_v27 = vmul.f32 %v6076_v31, %v2915_v47  ;;  %v5751_v20 = vmul.f32 -1.442695, %v3116_v62  ;;  %v5752_v35 = vmul.f32 -1.442695, %v3117_v42 }
 0x43c   :  { %v6078_v48 = vpop.eup %6077  ;;  %v2902_v58 = vadd.f32 %v6074_v2, %v2901_v37 }
 0x43d   :  { %v2929_v3 = vmul.f32 %v6078_v48, %v7624_v33  ;;  %v2917_v6 = vadd.f32 %v6076_v31, %v2916_v27  ;;  %6081 = vpow2.f32 %v5751_v20  ;;  %v6080_v7 = vpop.eup %6079  ;;  %vm2934_vm3 = vweird.f32 %v6078_v48  ;;  %v7682_v27 = vld [vmem:[#allocation6 + $0x68] sm:$0xff] }
 0x43e   :  { %v2906_v36 = vsel %vm2905_vm15, %v6074_v2, %v2902_v58  ;;  %6083 = vpow2.f32 %v5752_v35  ;;  %vm7644_vm5 = vmor %vm2933_vm4, %vm2934_vm3 }
 0x43f   :  { %v2930_v61 = vsub.f32 1.0, %v2929_v3  ;;  %v2911_v40 = vsel %vm2908_vm14, %v2910_v43, %v2906_v36  ;;  %v2921_v15 = vsel %vm2920_vm1, %v6076_v31, %v2917_v6  ;;  %v3093_v32 = vpop.f32.mrf.mxu2  ;;  %v2939_v31 = vand.u32 2147483648, %v7624_v33  ;;  %v3113_v20 = vpop.f32.mrf.mxu3 }
 0x440   :  { %v2926_v19 = vsel %vm2923_vm2, %v2925_v38, %v2921_v15  ;;  %v2945_v29 = vmul.f32 %v6080_v7, %v2911_v40  ;;  %v3118_v18 = vadd.f32 %v3093_v32, %v3031_v14  ;;  %v3200_v45 = vpop.f32.mrf.mxu0  ;;  %v3220_v51 = vpop.f32.mrf.mxu1  ;;  %v3032_v3 = vadd.f32 %v3026_v50, %v6814_v60 }
 0x441   :  { %v2931_v47 = vmul.f32 %v6078_v48, %v2930_v61  ;;  %v2944_v5 = vmul.f32 %v2926_v19, %v7425_v8  ;;  %v2937_v8 = vand.u32 2147483647, %v7624_v33  ;;  %v2940_v43 = vor.u32 1.1754944e-38, %v2939_v31 }
 0x442   :  { %v5753_v62 = vmul.f32 -1.442695, %v3118_v18  ;;  %v3263_v6 = vadd.f32 %v3200_v45, %v6978_v28  ;;  %v3264_v33 = vadd.f32 %v3220_v51, %v8348_v13  ;;  %v3119_v38 = vadd.f32 %v3113_v20, %v3032_v3 }
 0x443   :  { %v6082_v42 = vpop.eup %6081  ;;  %v7633_v24 = vadd.f32 %v2945_v29, %v2944_v5  ;;  %v2932_v0 = vadd.f32 %v6078_v48, %v2931_v47  ;;  %vm2938_vm6 = vcmp.eq.f32.partialorder %v2937_v8, 8.507059e+37  ;;  %v7679_v8 = vld [vmem:[#allocation6 + $0x60] sm:$0xff] }
 0x444   :  { %v6084_v2 = vpop.eup %6083  ;;  %v7635_v37 = vadd.f32 1.0, %v6082_v42  ;;  %6085 = vpow2.f32 %v5753_v62 }
 0x445   :  { %6087 = vtanh.f32 %v7633_v24  ;;  %v7639_v52 = vadd.f32 1.0, %v6084_v2  ;;  %v2936_v58 = vsel %vm7644_vm5, %v6078_v48, %v2932_v0 }
 0x446   :  { %6089 = vrcp.f32 %v7635_v37  ;;  %v2941_v40 = vsel %vm2938_vm6, %v2940_v43, %v2936_v58  ;;  %v3141_v51 = vand.u32 2147483647, %v7635_v37  ;;  %v3143_v0 = vand.u32 2147483648, %v7635_v37  ;;  %v7688_v43 = vld [vmem:[#allocation6 + $0x70] sm:$0xff] }
 0x447   :  { %6091 = vrcp.f32 %v7639_v52  ;;  %v3240_v35 = vpop.f32.mrf.mxu2  ;;  %v3158_v2 = vand.u32 2147483648, %v7639_v52  ;;  %v3156_v58 = vand.u32 2147483647, %v7639_v52  ;;  %vm3152_vm9 = vweird.f32 %v7639_v52 }
 0x448   :  { %v3265_v31 = vadd.f32 %v3240_v35, %v6990_v16  ;;  %v7691_v35 = vld [vmem:[#allocation6 + $0x78] sm:$0xff]  ;;  %vm3137_vm10 = vweird.f32 %v7635_v37  ;;  %vm3142_vm13 = vcmp.eq.f32.partialorder %v3141_v51, 8.507059e+37 }
 0x449   :  { %vm3157_vm14 = vcmp.eq.f32.partialorder %v3156_v58, 8.507059e+37  ;;  %v7734_v58 = vld [vmem:[#allocation3 + $0xa0] sm:$0xff] }
 0x44a   :  { %v6086_v7 = vpop.eup %6085  ;;  %v3287_v36 = vpop.f32.mrf.mxu0 }
 0x44b   :  { %v3307_v14 = vpop.f32.mrf.mxu1  ;;  %v6088_v61 = vpop.eup %6087  ;;  %v7654_v15 = vadd.f32 1.0, %v6086_v7  ;;  %v3350_v32 = vadd.f32 %v3287_v36, %v3263_v6  ;;  %v7696_v7 = vld [vmem:[#allocation6 + $0x40] sm:$0xff] }
 0x44c   :  { %v3351_v19 = vadd.f32 %v3307_v14, %v3264_v33  ;;  %v7656_v29 = vpop.eup %6089  ;;  %v7658_v48 = vmul.f32 %v6088_v61, %v2941_v40  ;;  %v3260_v61 = vpop.f32.mrf.mxu3  ;;  %v7707_v40 = vld [vmem:[#allocation6 + $0x50] sm:$0xff] }
 0x44d   :  { %v7660_v50 = vpop.eup %6091  ;;  %v3133_v18 = vmul.f32 %v7656_v29, %v7635_v37  ;;  %6093 = vrcp.f32 %v7654_v15  ;;  %v5762_v5 = vmul.f32 -1.442695, %v3350_v32  ;;  %vm3138_vm7 = vweird.f32 %v7656_v29  ;;  %v7710_v32 = vld [vmem:[#allocation6 + $0x58] sm:$0xff] }
 0x44e   :  { %v3148_v45 = vmul.f32 %v7660_v50, %v7639_v52  ;;  %5765 = vmatmul.msk.f32.vlgmr.msrb.gmra.mxu0 %vm106_vm0, %v7658_v48  ;;  %5766 = vmatmul.msk.f32.vlgmr.msrb.gmra.mxu1 %vm106_vm0, %v7658_v48  ;;  %6095 = vtanh.f32 %v3119_v38  ;;  %v5763_v62 = vmul.f32 -1.442695, %v3351_v19  ;;  %vm3153_vm8 = vweird.f32 %v7660_v50  ;;  %v7699_v38 = vld [vmem:[#allocation6 + $0x48] sm:$0xff]  ;;  %vm3139_vm11 = vmor %vm3137_vm10, %vm3138_vm7 }
 0x44f   :  { %v3134_v47 = vsub.f32 1.0, %v3133_v18  ;;  %5767 = vmatmul.msk.f32.vlgmr.msrb.gmra.mxu2 %vm106_vm0, %v7658_v48  ;;  %5768 = vmatmul.msk.f32.vlgmr.msrb.gmra.mxu3 %vm106_vm0, %v7658_v48  ;;  %6097 = vpow2.f32 %v5762_v5  ;;  %v3144_v52 = vor.u32 1.1754944e-38, %v3143_v0  ;;  %vm3154_vm12 = vmor %vm3152_vm9, %vm3153_vm8  ;;  %vm3167_vm1 = vweird.f32 %v7654_v15 }
 0x450   :  { %v3149_v42 = vsub.f32 1.0, %v3148_v45  ;;  %3672 = vmatpush.msrb.mxu0 %v7679_v8  ;;  %3692 = vmatpush.msrb.mxu1 %v7682_v27  ;;  %6099 = vpow2.f32 %v5763_v62 }
 0x451   :  { %v3135_v20 = vmul.f32 %v7656_v29, %v3134_v47  ;;  %v3327_v3 = vpop.f32.mrf.mxu2  ;;  %3712 = vmatpush.msrb.mxu2 %v7688_v43  ;;  %3732 = vmatpush.msrb.mxu3 %v7691_v35  ;;  %v3159_v47 = vor.u32 1.1754944e-38, %v3158_v2 }
 0x452   :  { %v3150_v6 = vmul.f32 %v7660_v50, %v3149_v42  ;;  %v3352_v33 = vadd.f32 %v3327_v3, %v3265_v31  ;;  %3673 = vmatpush.msrb.mxu0 %v7696_v7  ;;  %3693 = vmatpush.msrb.mxu1 %v7699_v38 }
 0x453   :  { %v7702_v36 = vpop.eup %6093  ;;  %v3136_v14 = vadd.f32 %v7656_v29, %v3135_v20  ;;  %3713 = vmatpush.msrb.mxu2 %v7707_v40  ;;  %3733 = vmatpush.msrb.mxu3 %v7710_v32 }
 0x454   :  { %v3163_v19 = vmul.f32 %v7702_v36, %v7654_v15  ;;  %v3151_v18 = vadd.f32 %v7660_v50, %v3150_v6  ;;  %v5764_v45 = vmul.f32 -1.442695, %v3352_v33  ;;  %v6096_v37 = vpop.eup %6095  ;;  %v7737_v6 = vld [vmem:[#allocation3 + $0xa8] sm:$0xff]  ;;  %vm3168_vm15 = vweird.f32 %v7702_v36 }
 0x455   :  { %v3140_v5 = vsel %vm3139_vm11, %v7656_v29, %v3136_v14  ;;  %v6098_v0 = vpop.eup %6097  ;;  %v7742_v14 = vld [vmem:[#allocation3 + $0xb0] sm:$0xff]  ;;  %vm3169_vm2 = vmor %vm3167_vm1, %vm3168_vm15 }
 0x456   :  { %v3164_v62 = vsub.f32 1.0, %v3163_v19  ;;  %v3145_v42 = vsel %vm3142_vm13, %v3144_v52, %v3140_v5  ;;  %v3155_v31 = vsel %vm3154_vm12, %v7660_v50, %v3151_v18  ;;  %6101 = vpow2.f32 %v5764_v45  ;;  %5772 = vmatmul.msk.f32.vlgmr.msra.gmra.mxu0 %vm106_vm0, %v7658_v48  ;;  %5773 = vmatmul.msk.f32.vlgmr.msra.gmra.mxu1 %vm106_vm0, %v7658_v48  ;;  %v6100_v29 = vpop.eup %6099  ;;  %v7751_v19 = vld [vmem:[#allocation3 + $0x80] sm:$0xff]  ;;  %v7754_v52 = vld [vmem:[#allocation3 + $0x88] sm:$0xff]  ;;  %v7760_v45 = vld [vmem:[#allocation3 + $0x90] sm:$0xff] }
 0x457   :  { %v3160_v20 = vsel %vm3157_vm14, %v3159_v47, %v3155_v31  ;;  %v3179_v3 = vmul.f32 %v6096_v37, %v3145_v42  ;;  %5774 = vmatmul.msk.f32.vlgmr.msra.gmra.mxu2 %vm106_vm0, %v7658_v48  ;;  %5775 = vmatmul.msk.f32.vlgmr.msra.gmra.mxu3 %vm106_vm0, %v7658_v48  ;;  %v7732_v2 = vadd.f32 1.0, %v6098_v0  ;;  %v7740_v33 = vadd.f32 1.0, %v6100_v29  ;;  %v7745_v48 = vld [vmem:[#allocation3 + $0xb8] sm:$0xff]  ;;  %8377 = vst [vmem:[#allocation17_spill] sm:$0xff] %v7751_v19  ;;  %v3347_v31 = vpop.f32.mrf.mxu3 }
 0x458   :  { %v3165_v51 = vmul.f32 %v7702_v36, %v3164_v62  ;;  %v3178_v50 = vmul.f32 %v3160_v20, %v7502_v63  ;;  %3819 = vmatpush.msra.mxu0 %v7734_v58  ;;  %3839 = vmatpush.msra.mxu1 %v7737_v6  ;;  %8376 = vst [vmem:[#allocation16_spill] sm:$0xff] %v7745_v48  ;;  %v7763_v37 = vld [vmem:[#allocation3 + $0x98] sm:$0xff]  ;;  %v3173_v5 = vand.u32 2147483648, %v7654_v15  ;;  %v3171_v62 = vand.u32 2147483647, %v7654_v15 }
 0x459   :  { %3859 = vmatpush.msra.mxu2 %v7742_v14  ;;  %3879 = vmatpush.msra.mxu3 %v7745_v48  ;;  %6103 = vrcp.f32 %v7732_v2  ;;  %8378 = vst [vmem:[#allocation18_spill] sm:$0xff] %v7754_v52  ;;  %v3266_v0 = vadd.f32 %v3260_v61, %v8365_v57  ;;  %v3377_v61 = vand.u32 2147483648, %v7732_v2  ;;  %vm3371_vm6 = vweird.f32 %v7732_v2 }
 0x45a   :  { %v7748_v63 = vadd.f32 %v3179_v3, %v3178_v50  ;;  %3820 = vmatpush.msra.mxu0 %v7751_v19  ;;  %3840 = vmatpush.msra.mxu1 %v7754_v52  ;;  %v3166_v18 = vadd.f32 %v7702_v36, %v3165_v51  ;;  %6105 = vrcp.f32 %v7740_v33  ;;  %8379 = vst [vmem:[#allocation21_spill] sm:$0xff] %v7760_v45  ;;  %v3174_v29 = vor.u32 1.1754944e-38, %v3173_v5 }
 0x45b   :  { %3860 = vmatpush.msra.mxu2 %v7760_v45  ;;  %8380 = vst [vmem:[#allocation12_spill] sm:$0xff] %v7763_v37  ;;  %3880 = vmatpush.msra.mxu3 %v7763_v37  ;;  %v3353_v51 = vadd.f32 %v3347_v31, %v3266_v0  ;;  %vm3172_vm3 = vcmp.eq.f32.partialorder %v3171_v62, 8.507059e+37  ;;  %v3375_v62 = vand.u32 2147483647, %v7732_v2  ;;  %v7793_v0 = vld [vmem:[#allocation6 + $0xa8] sm:$0xff]  ;;  %vm3386_vm7 = vweird.f32 %v7740_v33 }
 0x45c   :  { %v6102_v47 = vpop.eup %6101  ;;  %6107 = vtanh.f32 %v7748_v63  ;;  %v3170_v20 = vsel %vm3169_vm2, %v7702_v36, %v3166_v18  ;;  %v3392_v18 = vand.u32 2147483648, %v7740_v33  ;;  %8382 = vst [vmem:[#allocation14_spill] sm:$0xff] %v7793_v0 }
 0x45d   :  { %v7770_v42 = vadd.f32 1.0, %v6102_v47  ;;  %v3175_v52 = vsel %vm3172_vm3, %v3174_v29, %v3170_v20  ;;  %v3378_v29 = vor.u32 1.1754944e-38, %v3377_v61  ;;  %vm3376_vm10 = vcmp.eq.f32.partialorder %v3375_v62, 8.507059e+37  ;;  %v7815_v61 = vld [vmem:[#allocation6 + $0x80] sm:$0xff] }
 0x45f   :  { %6109 = vrcp.f32 %v7770_v42  ;;  %v6104_v3 = vpop.eup %6103  ;;  %vm3401_vm13 = vweird.f32 %v7770_v42 }
 0x460   :  { %v6106_v50 = vpop.eup %6105  ;;  %v3367_v37 = vmul.f32 %v6104_v3, %v7732_v2  ;;  %6111 = vtanh.f32 %v3353_v51  ;;  %vm3372_vm4 = vweird.f32 %v6104_v3  ;;  %v7805_v2 = vld [vmem:[#allocation6 + $0xb8] sm:$0xff] }
 0x461   :  { %v3382_v15 = vmul.f32 %v6106_v50, %v7740_v33  ;;  %vm3387_vm5 = vweird.f32 %v6106_v50  ;;  %vm7798_vm8 = vmor %vm3371_vm6, %vm3372_vm4  ;;  %8386 = vst [vmem:[#allocation15_spill] sm:$0xff] %v7805_v2 }
 0x462   :  { %v6108_v45 = vpop.eup %6107  ;;  %v3368_v19 = vsub.f32 1.0, %v3367_v37  ;;  %vm7809_vm9 = vmor %vm3386_vm7, %vm3387_vm5 }
 0x463   :  { %v3182_v47 = vmul.f32 %v6108_v45, %v3175_v52  ;;  %v3383_v48 = vsub.f32 1.0, %v3382_v15  ;;  %v3390_v45 = vand.u32 2147483647, %v7740_v33  ;;  %v7802_v15 = vld [vmem:[#allocation6 + $0xb0] sm:$0xff]  ;;  %v3393_v33 = vor.u32 1.1754944e-38, %v3392_v18 }
 0x464   :  { %v3369_v5 = vmul.f32 %v6104_v3, %v3368_v19  ;;  %v7790_v19 = vld [vmem:[#allocation6 + $0xa0] sm:$0xff]  ;;  %8385 = vst [vmem:[#allocation33_spill] sm:$0xff] %v7802_v15 }
 0x465   :  { %v7778_v36 = vpop.eup %6109  ;;  %5776 = vmatmul.msk.f32.vlgmr.msrb.gmra.mxu0 %vm106_vm0, %v3182_v47  ;;  %5777 = vmatmul.msk.f32.vlgmr.msrb.gmra.mxu1 %vm106_vm0, %v3182_v47  ;;  %v3384_v31 = vmul.f32 %v6106_v50, %v3383_v48  ;;  %8381 = vst [vmem:[#allocation13_spill] sm:$0xff] %v7790_v19  ;;  %vm3391_vm11 = vcmp.eq.f32.partialorder %v3390_v45, 8.507059e+37 }
 0x466   :  { %v3397_v52 = vmul.f32 %v7778_v36, %v7770_v42  ;;  %5778 = vmatmul.msk.f32.vlgmr.msrb.gmra.mxu2 %vm106_vm0, %v3182_v47  ;;  %5779 = vmatmul.msk.f32.vlgmr.msrb.gmra.mxu3 %vm106_vm0, %v3182_v47  ;;  %v3370_v37 = vadd.f32 %v6104_v3, %v3369_v5  ;;  %vm3402_vm12 = vweird.f32 %v7778_v36 }
 0x467   :  { %3906 = vmatpush.msrb.mxu0 %v7790_v19  ;;  %3926 = vmatpush.msrb.mxu1 %v7793_v0  ;;  %v3385_v51 = vadd.f32 %v6106_v50, %v3384_v31  ;;  %v7818_v31 = vld [vmem:[#allocation6 + $0x88] sm:$0xff]  ;;  %v7823_v19 = vld [vmem:[#allocation6 + $0x90] sm:$0xff]  ;;  %vm3403_vm14 = vmor %vm3401_vm13, %vm3402_vm12 }
 0x468   :  { %v3398_v48 = vsub.f32 1.0, %v3397_v52  ;;  %3946 = vmatpush.msrb.mxu2 %v7802_v15  ;;  %3966 = vmatpush.msrb.mxu3 %v7805_v2  ;;  %v3374_v52 = vsel %vm7798_vm8, %v6104_v3, %v3370_v37  ;;  %v6112_v15 = vpop.eup %6111  ;;  %v7826_v3 = vld [vmem:[#allocation6 + $0x98] sm:$0xff] }
 0x469   :  { %3907 = vmatpush.msrb.mxu0 %v7815_v61  ;;  %3927 = vmatpush.msrb.mxu1 %v7818_v31  ;;  %v3379_v2 = vsel %vm3376_vm10, %v3378_v29, %v3374_v52  ;;  %v3389_v0 = vsel %vm7809_vm9, %v6106_v50, %v3385_v51 }
 0x46a   :  { %3947 = vmatpush.msrb.mxu2 %v7823_v19  ;;  %3967 = vmatpush.msrb.mxu3 %v7826_v3  ;;  %v3399_v18 = vmul.f32 %v7778_v36, %v3398_v48  ;;  %v3394_v62 = vsel %vm3391_vm11, %v3393_v33, %v3389_v0  ;;  %v3413_v37 = vmul.f32 %v6112_v15, %v3379_v2 }
 0x46b   :  { %v3412_v20 = vmul.f32 %v3394_v62, %v7545_v49  ;;  %v3407_v49 = vand.u32 2147483648, %v7770_v42 }
 0x46c   :  { %v3400_v45 = vadd.f32 %v7778_v36, %v3399_v18  ;;  %v8392_v18 = vld [vmem:[#allocation29_spill] sm:$0xff] }
 0x46d   :  { %5783 = vmatmul.msk.f32.vlgmr.msra.gmra.mxu0 %vm106_vm0, %v3182_v47  ;;  %5784 = vmatmul.msk.f32.vlgmr.msra.gmra.mxu1 %vm106_vm0, %v3182_v47  ;;  %v7833_v50 = vadd.f32 %v3413_v37, %v3412_v20  ;;  %v290_v62 = vadd.f32 %v8392_v18, %v6701_v21 }
 0x46e   :  { %5785 = vmatmul.msk.f32.vlgmr.msra.gmra.mxu2 %vm106_vm0, %v3182_v47  ;;  %5786 = vmatmul.msk.f32.vlgmr.msra.gmra.mxu3 %vm106_vm0, %v3182_v47  ;;  %v3405_v47 = vand.u32 2147483647, %v7770_v42 }
 0x46f   :  { %4060 = vmatpush.msra.mxu0 %v7557_v39  ;;  %4080 = vmatpush.msra.mxu1 %v7560_v10  ;;  %6113 = vtanh.f32 %v7833_v50  ;;  %v3404_v39 = vsel %vm3403_vm14, %v7778_v36, %v3400_v45  ;;  %v3408_v10 = vor.u32 1.1754944e-38, %v3407_v49 }
 0x470   :  { %4100 = vmatpush.msra.mxu2 %v7567_v54  ;;  %4120 = vmatpush.msra.mxu3 %v7570_v17  ;;  %vm3406_vm15 = vcmp.eq.f32.partialorder %v3405_v47, 8.507059e+37 }
 0x471   :  { %4061 = vmatpush.msra.mxu0 %v7576_v34  ;;  %4081 = vmatpush.msra.mxu1 %v7579_v46  ;;  %v3409_v0 = vsel %vm3406_vm15, %v3408_v10, %v3404_v39  ;;  %v8389_v34 = vld [vmem:[#allocation23_spill] sm:$0xff] }
 0x472   :  { %4101 = vmatpush.msra.mxu2 %v7582_v12  ;;  %4121 = vmatpush.msra.mxu3 %v7585_v9  ;;  %v167_v46 = vadd.f32 %v8389_v34, %v6686_v55  ;;  %v8390_v12 = vld [vmem:[#allocation24_spill] sm:$0xff] }
 0x473   :  { %v208_v9 = vadd.f32 %v8390_v12, %v6688_v56 }
 0x475   :  { %v6114_v54 = vpop.eup %6113 }
 0x476   :  { %v3416_v17 = vmul.f32 %v6114_v54, %v3409_v0 }
 0x478   :  { %5787 = vmatmul.msk.f32.vlgmr.msrb.gmra.mxu0 %vm106_vm0, %v3416_v17  ;;  %5788 = vmatmul.msk.f32.vlgmr.msrb.gmra.mxu1 %vm106_vm0, %v3416_v17 }
 0x479   :  { %5789 = vmatmul.msk.f32.vlgmr.msrb.gmra.mxu2 %vm106_vm0, %v3416_v17  ;;  %5790 = vmatmul.msk.f32.vlgmr.msrb.gmra.mxu3 %vm106_vm0, %v3416_v17 }
 0x47a   :  { %4207 = vmatpush.msrb.mxu0 %v7592_v11  ;;  %4227 = vmatpush.msrb.mxu1 %v7595_v41 }
 0x47b   :  { %4247 = vmatpush.msrb.mxu2 %v7598_v30  ;;  %4267 = vmatpush.msrb.mxu3 %v7601_v23 }
 0x47c   :  { %4208 = vmatpush.msrb.mxu0 %v7604_v59  ;;  %4228 = vmatpush.msrb.mxu1 %v7607_v53  ;;  %v8391_v59 = vld [vmem:[#allocation26_spill] sm:$0xff] }
 0x47d   :  { %4248 = vmatpush.msrb.mxu2 %v7610_v22  ;;  %4268 = vmatpush.msrb.mxu3 %v7613_v26  ;;  %v249_v53 = vadd.f32 %v8391_v59, %v6696_v1 }
 0x4cb   :  { %v3441_v11 = vpop.f32.mrf.mxu0  ;;  %v3461_v41 = vpop.f32.mrf.mxu1 }
 0x4cc   :  { %v3504_v42 = vadd.f32 %v3441_v11, %v167_v46  ;;  %v3505_v30 = vadd.f32 %v3461_v41, %v208_v9 }
 0x4ce   :  { %v5769_v36 = vmul.f32 -1.442695, %v3504_v42  ;;  %v5770_v23 = vmul.f32 -1.442695, %v3505_v30 }
 0x4d0   :  { %6115 = vpow2.f32 %v5769_v36 }
 0x4d1   :  { %6117 = vpow2.f32 %v5770_v23 }
 0x4d2   :  { %v3481_v22 = vpop.f32.mrf.mxu2  ;;  %v3501_v52 = vpop.f32.mrf.mxu3 }
 0x4d3   :  { %v3506_v48 = vadd.f32 %v3481_v22, %v249_v53  ;;  %v3588_v5 = vpop.f32.mrf.mxu0  ;;  %v3608_v33 = vpop.f32.mrf.mxu1  ;;  %v3507_v45 = vadd.f32 %v3501_v52, %v290_v62 }
 0x4d4   :  { %v3651_v0 = vadd.f32 %v3588_v5, %v6796_v4  ;;  %v3652_v17 = vadd.f32 %v3608_v33, %v8336_v44 }
 0x4d5   :  { %v5771_v26 = vmul.f32 -1.442695, %v3506_v48 }
 0x4d6   :  { %v6116_v29 = vpop.eup %6115 }
 0x4d7   :  { %v6118_v51 = vpop.eup %6117  ;;  %v3517_v15 = vadd.f32 1.0, %v6116_v29  ;;  %6119 = vpow2.f32 %v5771_v26 }
 0x4d8   :  { %v3518_v2 = vadd.f32 1.0, %v6118_v51 }
 0x4d9   :  { %6121 = vrcp.f32 %v3517_v15  ;;  %v3529_v46 = vand.u32 2147483647, %v3517_v15  ;;  %v3531_v41 = vand.u32 2147483648, %v3517_v15  ;;  %vm3525_vm4 = vweird.f32 %v3517_v15 }
 0x4da   :  { %6123 = vrcp.f32 %v3518_v2  ;;  %v3628_v47 = vpop.f32.mrf.mxu2  ;;  %v3546_v36 = vand.u32 2147483648, %v3518_v2  ;;  %v3544_v59 = vand.u32 2147483647, %v3518_v2  ;;  %vm3540_vm3 = vweird.f32 %v3518_v2 }
 0x4db   :  { %vm3530_vm5 = vcmp.eq.f32.partialorder %v3529_v46, 8.507059e+37  ;;  %v3532_v5 = vor.u32 1.1754944e-38, %v3531_v41 }
 0x4dc   :  { %v3547_v18 = vor.u32 1.1754944e-38, %v3546_v36  ;;  %vm3545_vm8 = vcmp.eq.f32.partialorder %v3544_v59, 8.507059e+37 }
 0x4dd   :  { %v6120_v37 = vpop.eup %6119 }
 0x4de   :  { %v7872_v20 = vadd.f32 1.0, %v6120_v37  ;;  %v3653_v37 = vadd.f32 %v3628_v47, %v8337_v25 }
 0x4df   :  { %v6122_v49 = vpop.eup %6121 }
 0x4e0   :  { %v6124_v39 = vpop.eup %6123  ;;  %v3521_v10 = vmul.f32 %v6122_v49, %v3517_v15  ;;  %6125 = vrcp.f32 %v7872_v20  ;;  %vm3526_vm1 = vweird.f32 %v6122_v49  ;;  %vm3555_vm10 = vweird.f32 %v7872_v20 }
 0x4e1   :  { %v3536_v54 = vmul.f32 %v6124_v39, %v3518_v2  ;;  %6127 = vtanh.f32 %v3507_v45  ;;  %vm3541_vm2 = vweird.f32 %v6124_v39  ;;  %vm3527_vm6 = vmor %vm3525_vm4, %vm3526_vm1  ;;  %v3648_v45 = vpop.f32.mrf.mxu3 }
 0x4e2   :  { %v3522_v34 = vsub.f32 1.0, %v3521_v10  ;;  %v3675_v12 = vpop.f32.mrf.mxu0  ;;  %v3695_v9 = vpop.f32.mrf.mxu1  ;;  %vm3542_vm7 = vmor %vm3540_vm3, %vm3541_vm2 }
 0x4e3   :  { %v3537_v11 = vsub.f32 1.0, %v3536_v54  ;;  %v3738_v42 = vadd.f32 %v3675_v12, %v3651_v0  ;;  %v3739_v30 = vadd.f32 %v3695_v9, %v3652_v17 }
 0x4e4   :  { %v3523_v23 = vmul.f32 %v6122_v49, %v3522_v34 }
 0x4e5   :  { %v3538_v53 = vmul.f32 %v6124_v39, %v3537_v11  ;;  %v5780_v22 = vmul.f32 -1.442695, %v3738_v42  ;;  %v5781_v48 = vmul.f32 -1.442695, %v3739_v30 }
 0x4e6   :  { %v6126_v26 = vpop.eup %6125  ;;  %v3524_v29 = vadd.f32 %v6122_v49, %v3523_v23 }
 0x4e7   :  { %v3551_v51 = vmul.f32 %v6126_v26, %v7872_v20  ;;  %v3539_v33 = vadd.f32 %v6124_v39, %v3538_v53  ;;  %6129 = vpow2.f32 %v5780_v22  ;;  %v6128_v52 = vpop.eup %6127  ;;  %vm3556_vm9 = vweird.f32 %v6126_v26 }
 0x4e8   :  { %v3528_v62 = vsel %vm3527_vm6, %v6122_v49, %v3524_v29  ;;  %6131 = vpow2.f32 %v5781_v48  ;;  %vm3557_vm11 = vmor %vm3555_vm10, %vm3556_vm9  ;;  %v3654_v48 = vadd.f32 %v3648_v45, %v6814_v60 }
 0x4e9   :  { %v3552_v10 = vsub.f32 1.0, %v3551_v51  ;;  %v3533_v54 = vsel %vm3530_vm5, %v3532_v5, %v3528_v62  ;;  %v3543_v2 = vsel %vm3542_vm7, %v6124_v39, %v3539_v33  ;;  %v3715_v15 = vpop.f32.mrf.mxu2  ;;  %v3561_v39 = vand.u32 2147483648, %v7872_v20  ;;  %v3735_v53 = vpop.f32.mrf.mxu3 }
 0x4ea   :  { %v3548_v0 = vsel %vm3545_vm8, %v3547_v18, %v3543_v2  ;;  %v3567_v17 = vmul.f32 %v6128_v52, %v3533_v54  ;;  %v3740_v34 = vadd.f32 %v3715_v15, %v3653_v37  ;;  %v3822_v11 = vpop.f32.mrf.mxu0  ;;  %v3842_v41 = vpop.f32.mrf.mxu1  ;;  %v3741_v18 = vadd.f32 %v3735_v53, %v3654_v48 }
 0x4eb   :  { %v3553_v46 = vmul.f32 %v6126_v26, %v3552_v10  ;;  %v3566_v12 = vmul.f32 %v3548_v0, %v7633_v24  ;;  %v3559_v24 = vand.u32 2147483647, %v7872_v20  ;;  %v3562_v22 = vor.u32 1.1754944e-38, %v3561_v39 }
 0x4ec   :  { %v5782_v9 = vmul.f32 -1.442695, %v3740_v34  ;;  %v3885_v45 = vadd.f32 %v3822_v11, %v6978_v28  ;;  %v3886_v2 = vadd.f32 %v3842_v41, %v8348_v13 }
 0x4ed   :  { %v6130_v42 = vpop.eup %6129  ;;  %v7880_v49 = vadd.f32 %v3567_v17, %v3566_v12  ;;  %v3554_v30 = vadd.f32 %v6126_v26, %v3553_v46  ;;  %vm3560_vm12 = vcmp.eq.f32.partialorder %v3559_v24, 8.507059e+37 }
 0x4ee   :  { %v6132_v47 = vpop.eup %6131  ;;  %v7882_v36 = vadd.f32 1.0, %v6130_v42  ;;  %6133 = vpow2.f32 %v5782_v9 }
 0x4ef   :  { %6135 = vtanh.f32 %v7880_v49  ;;  %v7886_v23 = vadd.f32 1.0, %v6132_v47  ;;  %v3558_v59 = vsel %vm3557_vm11, %v6126_v26, %v3554_v30 }
 0x4f0   :  { %6137 = vrcp.f32 %v7882_v36  ;;  %v3563_v33 = vsel %vm3560_vm12, %v3562_v22, %v3558_v59  ;;  %v3763_v9 = vand.u32 2147483647, %v7882_v36  ;;  %v3765_v11 = vand.u32 2147483648, %v7882_v36 }
 0x4f1   :  { %6139 = vrcp.f32 %v7886_v23  ;;  %v3862_v29 = vpop.f32.mrf.mxu2  ;;  %v3780_v12 = vand.u32 2147483648, %v7886_v23  ;;  %vm3759_vm15 = vweird.f32 %v7882_v36  ;;  %v3778_v39 = vand.u32 2147483647, %v7886_v23 }
 0x4f2   :  { %vm3774_vm1 = vweird.f32 %v7886_v23  ;;  %v3887_v53 = vadd.f32 %v3862_v29, %v6990_v16  ;;  %v3766_v48 = vor.u32 1.1754944e-38, %v3765_v11  ;;  %vm3764_vm4 = vcmp.eq.f32.partialorder %v3763_v9, 8.507059e+37  ;;  %v8395_v9 = vld [vmem:[#allocation18_spill] sm:$0xff] }
 0x4f3   :  { %vm3779_vm5 = vcmp.eq.f32.partialorder %v3778_v39, 8.507059e+37 }
 0x4f4   :  { %v6134_v51 = vpop.eup %6133 }
 0x4f5   :  { %v6136_v5 = vpop.eup %6135  ;;  %v7893_v52 = vadd.f32 1.0, %v6134_v51  ;;  %v3909_v37 = vpop.f32.mrf.mxu0 }
 0x4f6   :  { %v6138_v62 = vpop.eup %6137  ;;  %v7895_v20 = vmul.f32 %v6136_v5, %v3563_v33  ;;  %v3929_v10 = vpop.f32.mrf.mxu1  ;;  %v3972_v17 = vadd.f32 %v3909_v37, %v3885_v45 }
 0x4f7   :  { %v6140_v54 = vpop.eup %6139  ;;  %v3755_v26 = vmul.f32 %v6138_v62, %v7882_v36  ;;  %6141 = vrcp.f32 %v7893_v52  ;;  %v3973_v34 = vadd.f32 %v3929_v10, %v3886_v2  ;;  %vm3760_vm13 = vweird.f32 %v6138_v62 }
 0x4f8   :  { %v3770_v15 = vmul.f32 %v6140_v54, %v7886_v23  ;;  %5794 = vmatmul.msk.f32.vlgmr.msra.gmra.mxu0 %vm106_vm0, %v7895_v20  ;;  %5795 = vmatmul.msk.f32.vlgmr.msra.gmra.mxu1 %vm106_vm0, %v7895_v20  ;;  %6143 = vtanh.f32 %v3741_v18  ;;  %v5791_v42 = vmul.f32 -1.442695, %v3972_v17  ;;  %vm3775_vm14 = vweird.f32 %v6140_v54  ;;  %vm3761_vm2 = vmor %vm3759_vm15, %vm3760_vm13  ;;  %v8393_v17 = vld [vmem:[#allocation16_spill] sm:$0xff] }
 0x4f9   :  { %v3756_v0 = vsub.f32 1.0, %v3755_v26  ;;  %5796 = vmatmul.msk.f32.vlgmr.msra.gmra.mxu2 %vm106_vm0, %v7895_v20  ;;  %5797 = vmatmul.msk.f32.vlgmr.msra.gmra.mxu3 %vm106_vm0, %v7895_v20  ;;  %v5792_v47 = vmul.f32 -1.442695, %v3973_v34  ;;  %vm3776_vm3 = vmor %vm3774_vm1, %vm3775_vm14  ;;  %v3781_v23 = vor.u32 1.1754944e-38, %v3780_v12  ;;  %v3882_v26 = vpop.f32.mrf.mxu3  ;;  %v3795_v11 = vand.u32 2147483648, %v7893_v52 }
 0x4fa   :  { %v3771_v46 = vsub.f32 1.0, %v3770_v15  ;;  %4294 = vmatpush.msra.mxu0 %v7679_v8  ;;  %4314 = vmatpush.msra.mxu1 %v7682_v27  ;;  %6145 = vpow2.f32 %v5791_v42  ;;  %vm3789_vm7 = vweird.f32 %v7893_v52 }
 0x4fb   :  { %v3757_v41 = vmul.f32 %v6138_v62, %v3756_v0  ;;  %4334 = vmatpush.msra.mxu2 %v7688_v43  ;;  %4354 = vmatpush.msra.mxu3 %v7691_v35  ;;  %6147 = vpow2.f32 %v5792_v47 }
 0x4fc   :  { %v3772_v30 = vmul.f32 %v6140_v54, %v3771_v46  ;;  %4295 = vmatpush.msra.mxu0 %v7696_v7  ;;  %4315 = vmatpush.msra.mxu1 %v7699_v38  ;;  %v3949_v22 = vpop.f32.mrf.mxu2 }
 0x4fd   :  { %v7921_v24 = vpop.eup %6141  ;;  %v3758_v59 = vadd.f32 %v6138_v62, %v3757_v41  ;;  %4335 = vmatpush.msra.mxu2 %v7707_v40  ;;  %4355 = vmatpush.msra.mxu3 %v7710_v32  ;;  %v3974_v29 = vadd.f32 %v3949_v22, %v3887_v53  ;;  %v3793_v41 = vand.u32 2147483647, %v7893_v52  ;;  %v3888_v53 = vadd.f32 %v3882_v26, %v8365_v57 }
 0x4fe   :  { %v3785_v36 = vmul.f32 %v7921_v24, %v7893_v52  ;;  %v3773_v51 = vadd.f32 %v6140_v54, %v3772_v30  ;;  %v6144_v5 = vpop.eup %6143  ;;  %vm3790_vm6 = vweird.f32 %v7921_v24  ;;  %v3796_v30 = vor.u32 1.1754944e-38, %v3795_v11 }
 0x4ff   :  { %v3762_v33 = vsel %vm3761_vm2, %v6138_v62, %v3758_v59  ;;  %v5793_v15 = vmul.f32 -1.442695, %v3974_v29  ;;  %vm3791_vm8 = vmor %vm3789_vm7, %vm3790_vm6  ;;  %vm3794_vm9 = vcmp.eq.f32.partialorder %v3793_v41, 8.507059e+37 }
 0x500   :  { %v3786_v18 = vsub.f32 1.0, %v3785_v36  ;;  %v3767_v37 = vsel %vm3764_vm4, %v3766_v48, %v3762_v33  ;;  %v3777_v10 = vsel %vm3776_vm3, %v6140_v54, %v3773_v51  ;;  %5801 = vmatmul.msk.f32.vlgmr.msrb.gmra.mxu0 %vm106_vm0, %v7895_v20  ;;  %5802 = vmatmul.msk.f32.vlgmr.msrb.gmra.mxu1 %vm106_vm0, %v7895_v20  ;;  %v6146_v0 = vpop.eup %6145 }
 0x501   :  { %v3782_v45 = vsel %vm3779_vm5, %v3781_v23, %v3777_v10  ;;  %v3801_v2 = vmul.f32 %v6144_v5, %v3767_v37  ;;  %5803 = vmatmul.msk.f32.vlgmr.msrb.gmra.mxu2 %vm106_vm0, %v7895_v20  ;;  %5804 = vmatmul.msk.f32.vlgmr.msrb.gmra.mxu3 %vm106_vm0, %v7895_v20  ;;  %6149 = vpow2.f32 %v5793_v15  ;;  %v6148_v34 = vpop.eup %6147  ;;  %v7947_v12 = vadd.f32 1.0, %v6146_v0  ;;  %v8394_v20 = vld [vmem:[#allocation17_spill] sm:$0xff]  ;;  %v3969_v59 = vpop.f32.mrf.mxu3  ;;  %v8399_v10 = vld [vmem:[#allocation14_spill] sm:$0xff] }
 0x502   :  { %v3787_v62 = vmul.f32 %v7921_v24, %v3786_v18  ;;  %v3800_v54 = vmul.f32 %v3782_v45, %v7748_v63  ;;  %4441 = vmatpush.msrb.mxu0 %v7734_v58  ;;  %4461 = vmatpush.msrb.mxu1 %v7737_v6  ;;  %v7953_v58 = vadd.f32 1.0, %v6148_v34  ;;  %v8396_v6 = vld [vmem:[#allocation21_spill] sm:$0xff]  ;;  %v3975_v51 = vadd.f32 %v3969_v59, %v3888_v53  ;;  %v6352_v59 = vld [vmem:[#allocation3 + $0x78] sm:$0xff] }
 0x503   :  { %4481 = vmatpush.msrb.mxu2 %v7742_v14  ;;  %4501 = vmatpush.msrb.mxu3 %v8393_v17  ;;  %v8397_v14 = vld [vmem:[#allocation12_spill] sm:$0xff]  ;;  %v3999_v18 = vand.u32 2147483648, %v7947_v12  ;;  %v8398_v37 = vld [vmem:[#allocation13_spill] sm:$0xff]  ;;  %v3997_v15 = vand.u32 2147483647, %v7947_v12  ;;  %vm3993_vm12 = vweird.f32 %v7947_v12 }
 0x504   :  { %v7945_v46 = vadd.f32 %v3801_v2, %v3800_v54  ;;  %4442 = vmatpush.msrb.mxu0 %v8394_v20  ;;  %4462 = vmatpush.msrb.mxu1 %v8395_v9  ;;  %v3788_v63 = vadd.f32 %v7921_v24, %v3787_v62  ;;  %v4014_v45 = vand.u32 2147483648, %v7953_v58  ;;  %v8400_v62 = vld [vmem:[#allocation33_spill] sm:$0xff]  ;;  %v8401_v54 = vld [vmem:[#allocation15_spill] sm:$0xff]  ;;  %v4012_v34 = vand.u32 2147483647, %v7953_v58 }
 0x505   :  { %4482 = vmatpush.msrb.mxu2 %v8396_v6  ;;  %4502 = vmatpush.msrb.mxu3 %v8397_v14  ;;  %vm4008_vm13 = vweird.f32 %v7953_v58  ;;  %vm3998_vm1 = vcmp.eq.f32.partialorder %v3997_v15, 8.507059e+37 }
 0x506   :  { %6151 = vtanh.f32 %v7945_v46  ;;  %v3792_v47 = vsel %vm3791_vm8, %v7921_v24, %v3788_v63  ;;  %v4000_v63 = vor.u32 1.1754944e-38, %v3999_v18  ;;  %v4015_v14 = vor.u32 1.1754944e-38, %v4014_v45 }
 0x507   :  { %6153 = vrcp.f32 %v7947_v12  ;;  %v6150_v42 = vpop.eup %6149  ;;  %v3797_v36 = vsel %vm3794_vm9, %v3796_v30, %v3792_v47  ;;  %vm4013_vm2 = vcmp.eq.f32.partialorder %v4012_v34, 8.507059e+37  ;;  %v6350_v47 = vld [vmem:[#allocation3 + $0x68] sm:$0xff]  ;;  %v6351_v30 = vld [vmem:[#allocation3 + $0x70] sm:$0xff] }
 0x508   :  { %6155 = vrcp.f32 %v7953_v58  ;;  %v7964_v39 = vadd.f32 1.0, %v6150_v42  ;;  %v6349_v42 = vld [vmem:[#allocation3 + $0x60] sm:$0xff] }
 0x50a   :  { %6157 = vrcp.f32 %v7964_v39  ;;  %vm4023_vm4 = vweird.f32 %v7964_v39 }
 0x50b   :  { %6159 = vtanh.f32 %v3975_v51  ;;  %v4029_v51 = vand.u32 2147483648, %v7964_v39 }
 0x50c   :  { %v6152_v22 = vpop.eup %6151 }
 0x50d   :  { %v6154_v52 = vpop.eup %6153  ;;  %v3804_v48 = vmul.f32 %v6152_v22, %v3797_v36  ;;  %v6353_v22 = vld [vmem:[#allocation3 + $0x40] sm:$0xff]  ;;  %v6354_v36 = vld [vmem:[#allocation3 + $0x48] sm:$0xff] }
 0x50e   :  { %v6156_v5 = vpop.eup %6155  ;;  %v3989_v23 = vmul.f32 %v6154_v52, %v7947_v12  ;;  %vm3994_vm10 = vweird.f32 %v6154_v52 }
 0x50f   :  { %v4004_v33 = vmul.f32 %v6156_v5, %v7953_v58  ;;  %5805 = vmatmul.msk.f32.vlgmr.msra.gmra.mxu0 %vm106_vm0, %v3804_v48  ;;  %5806 = vmatmul.msk.f32.vlgmr.msra.gmra.mxu1 %vm106_vm0, %v3804_v48  ;;  %vm4009_vm11 = vweird.f32 %v6156_v5  ;;  %vm3995_vm14 = vmor %vm3993_vm12, %vm3994_vm10 }
 0x510   :  { %v3990_v24 = vsub.f32 1.0, %v3989_v23  ;;  %5807 = vmatmul.msk.f32.vlgmr.msra.gmra.mxu2 %vm106_vm0, %v3804_v48  ;;  %5808 = vmatmul.msk.f32.vlgmr.msra.gmra.mxu3 %vm106_vm0, %v3804_v48  ;;  %v7977_v26 = vpop.eup %6157  ;;  %vm4010_vm15 = vmor %vm4008_vm13, %vm4009_vm11 }
 0x511   :  { %v4005_v29 = vsub.f32 1.0, %v4004_v33  ;;  %4528 = vmatpush.msra.mxu0 %v8398_v37  ;;  %4548 = vmatpush.msra.mxu1 %v8399_v10  ;;  %v4019_v17 = vmul.f32 %v7977_v26, %v7964_v39  ;;  %vm4024_vm3 = vweird.f32 %v7977_v26  ;;  %v4030_v33 = vor.u32 1.1754944e-38, %v4029_v51  ;;  %v8403_v10 = vld [vmem:[#allocation28_spill] sm:$0xff] }
 0x512   :  { %v3991_v2 = vmul.f32 %v6154_v52, %v3990_v24  ;;  %4568 = vmatpush.msra.mxu2 %v8400_v62  ;;  %4588 = vmatpush.msra.mxu3 %v8401_v54  ;;  %vm4025_vm5 = vmor %vm4023_vm4, %vm4024_vm3 }
 0x513   :  { %v4006_v0 = vmul.f32 %v6156_v5, %v4005_v29  ;;  %4529 = vmatpush.msra.mxu0 %v7815_v61  ;;  %4549 = vmatpush.msra.mxu1 %v7818_v31  ;;  %v4020_v9 = vsub.f32 1.0, %v4019_v17  ;;  %v6160_v61 = vpop.eup %6159 }
 0x514   :  { %v3992_v20 = vadd.f32 %v6154_v52, %v3991_v2  ;;  %4569 = vmatpush.msra.mxu2 %v7823_v19  ;;  %4589 = vmatpush.msra.mxu3 %v7826_v3 }
 0x515   :  { %v4007_v6 = vadd.f32 %v6156_v5, %v4006_v0  ;;  %v4021_v19 = vmul.f32 %v7977_v26, %v4020_v9 }
 0x516   :  { %v3996_v11 = vsel %vm3995_vm14, %v6154_v52, %v3992_v20  ;;  %v8405_v20 = vld [vmem:[#allocation31_spill] sm:$0xff] }
 0x517   :  { %v4001_v31 = vsel %vm3998_vm1, %v4000_v63, %v3996_v11  ;;  %v4011_v41 = vsel %vm4010_vm15, %v6156_v5, %v4007_v6  ;;  %5812 = vmatmul.msk.f32.vlgmr.msrb.gmra.mxu0 %vm106_vm0, %v3804_v48  ;;  %5813 = vmatmul.msk.f32.vlgmr.msrb.gmra.mxu1 %vm106_vm0, %v3804_v48  ;;  %v4022_v52 = vadd.f32 %v7977_v26, %v4021_v19  ;;  %v4027_v5 = vand.u32 2147483647, %v7964_v39  ;;  %v8402_v39 = vld [vmem:[#allocation27_spill] sm:$0xff] }
 0x518   :  { %v4016_v3 = vsel %vm4013_vm2, %v4015_v14, %v4011_v41  ;;  %v4035_v12 = vmul.f32 %v6160_v61, %v4001_v31  ;;  %5814 = vmatmul.msk.f32.vlgmr.msrb.gmra.mxu2 %vm106_vm0, %v3804_v48  ;;  %5815 = vmatmul.msk.f32.vlgmr.msrb.gmra.mxu3 %vm106_vm0, %v3804_v48  ;;  %v6355_v48 = vld [vmem:[#allocation3 + $0x50] sm:$0xff]  ;;  %v170_v37 = vadd.f32 %v8402_v39, %v6686_v55 }
 0x519   :  { %v4034_v58 = vmul.f32 %v4016_v3, %v7833_v50  ;;  %4678 = vmatpush.msrb.mxu0 %v6349_v42  ;;  %4698 = vmatpush.msrb.mxu1 %v6350_v47  ;;  %v6356_v50 = vld [vmem:[#allocation3 + $0x58] sm:$0xff]  ;;  %v4026_v23 = vsel %vm4025_vm5, %v7977_v26, %v4022_v52  ;;  %vm4028_vm6 = vcmp.eq.f32.partialorder %v4027_v5, 8.507059e+37  ;;  %v293_v9 = vadd.f32 %v8405_v20, %v6701_v21 }
 0x51a   :  { %4718 = vmatpush.msrb.mxu2 %v6351_v30  ;;  %4738 = vmatpush.msrb.mxu3 %v6352_v59  ;;  %v4031_v29 = vsel %vm4028_vm6, %v4030_v33, %v4026_v23 }
 0x51b   :  { %v7999_v53 = vadd.f32 %v4035_v12, %v4034_v58  ;;  %4679 = vmatpush.msrb.mxu0 %v6353_v22  ;;  %4699 = vmatpush.msrb.mxu1 %v6354_v36 }
 0x51c   :  { %4719 = vmatpush.msrb.mxu2 %v6355_v48  ;;  %4739 = vmatpush.msrb.mxu3 %v6356_v50 }
 0x51d   :  { %6161 = vtanh.f32 %v7999_v53 }
 0x523   :  { %v6162_v24 = vpop.eup %6161 }
 0x524   :  { %v4038_v18 = vmul.f32 %v6162_v24, %v4031_v29 }
 0x526   :  { %5816 = vmatmul.msk.f32.vlgmr.msra.gmra.mxu0 %vm106_vm0, %v4038_v18  ;;  %5817 = vmatmul.msk.f32.vlgmr.msra.gmra.mxu1 %vm106_vm0, %v4038_v18 }
 0x527   :  { %5818 = vmatmul.msk.f32.vlgmr.msra.gmra.mxu2 %vm106_vm0, %v4038_v18  ;;  %5819 = vmatmul.msk.f32.vlgmr.msra.gmra.mxu3 %vm106_vm0, %v4038_v18 }
 0x528   :  { %4765 = vmatpush.msra.mxu0 %v7679_v8  ;;  %4785 = vmatpush.msra.mxu1 %v7682_v27  ;;  %v211_v8 = vadd.f32 %v8403_v10, %v6688_v56 }
 0x529   :  { %4805 = vmatpush.msra.mxu2 %v7688_v43  ;;  %4825 = vmatpush.msra.mxu3 %v7691_v35 }
 0x52a   :  { %4766 = vmatpush.msra.mxu0 %v7696_v7  ;;  %4786 = vmatpush.msra.mxu1 %v7699_v38  ;;  %v8404_v7 = vld [vmem:[#allocation30_spill] sm:$0xff] }
 0x52b   :  { %4806 = vmatpush.msra.mxu2 %v7707_v40  ;;  %4826 = vmatpush.msra.mxu3 %v7710_v32  ;;  %v252_v38 = vadd.f32 %v8404_v7, %v6696_v1 }
 0x575   :  { %v4063_v26 = vpop.f32.mrf.mxu0  ;;  %v4083_v27 = vpop.f32.mrf.mxu1 }
 0x576   :  { %v4126_v45 = vadd.f32 %v4063_v26, %v170_v37  ;;  %v4127_v43 = vadd.f32 %v4083_v27, %v211_v8 }
 0x578   :  { %v5798_v2 = vmul.f32 -1.442695, %v4126_v45  ;;  %v5799_v35 = vmul.f32 -1.442695, %v4127_v43 }
 0x57a   :  { %6163 = vpow2.f32 %v5798_v2 }
 0x57b   :  { %6165 = vpow2.f32 %v5799_v35 }
 0x57c   :  { %v4103_v40 = vpop.f32.mrf.mxu2  ;;  %v4123_v34 = vpop.f32.mrf.mxu3 }
 0x57d   :  { %v4128_v15 = vadd.f32 %v4103_v40, %v252_v38  ;;  %v4210_v56 = vpop.f32.mrf.mxu0  ;;  %v4230_v17 = vpop.f32.mrf.mxu1  ;;  %v4129_v1 = vadd.f32 %v4123_v34, %v293_v9 }
 0x57e   :  { %v4273_v19 = vadd.f32 %v4210_v56, %v6796_v4  ;;  %v4274_v3 = vadd.f32 %v4230_v17, %v8336_v44 }
 0x57f   :  { %v5800_v32 = vmul.f32 -1.442695, %v4128_v15 }
 0x580   :  { %v6164_v62 = vpop.eup %6163 }
 0x581   :  { %v6166_v54 = vpop.eup %6165  ;;  %v4139_v55 = vadd.f32 1.0, %v6164_v62  ;;  %6167 = vpow2.f32 %v5800_v32 }
 0x582   :  { %v4140_v0 = vadd.f32 1.0, %v6166_v54 }
 0x583   :  { %6169 = vrcp.f32 %v4139_v55  ;;  %v4151_v58 = vand.u32 2147483647, %v4139_v55  ;;  %v4153_v30 = vand.u32 2147483648, %v4139_v55  ;;  %vm4147_vm10 = vweird.f32 %v4139_v55 }
 0x584   :  { %6171 = vrcp.f32 %v4140_v0  ;;  %v4250_v11 = vpop.f32.mrf.mxu2  ;;  %v4168_v36 = vand.u32 2147483648, %v4140_v0  ;;  %v4166_v48 = vand.u32 2147483647, %v4140_v0  ;;  %vm4162_vm9 = vweird.f32 %v4140_v0  ;;  %v4270_v26 = vpop.f32.mrf.mxu3 }
 0x585   :  { %vm4152_vm11 = vcmp.eq.f32.partialorder %v4151_v58, 8.507059e+37  ;;  %v4154_v29 = vor.u32 1.1754944e-38, %v4153_v30  ;;  %v4275_v8 = vadd.f32 %v4250_v11, %v8337_v25  ;;  %v4276_v11 = vadd.f32 %v4270_v26, %v6814_v60 }
 0x586   :  { %v4169_v37 = vor.u32 1.1754944e-38, %v4168_v36  ;;  %vm4167_vm14 = vcmp.eq.f32.partialorder %v4166_v48, 8.507059e+37 }
 0x587   :  { %v6168_v63 = vpop.eup %6167 }
 0x588   :  { %v8028_v6 = vadd.f32 1.0, %v6168_v63 }
 0x589   :  { %v6170_v14 = vpop.eup %6169 }
 0x58a   :  { %v6172_v61 = vpop.eup %6171  ;;  %v4143_v31 = vmul.f32 %v6170_v14, %v4139_v55  ;;  %6173 = vrcp.f32 %v8028_v6  ;;  %vm4148_vm7 = vweird.f32 %v6170_v14  ;;  %v4183_v17 = vand.u32 2147483648, %v8028_v6 }
 0x58b   :  { %v4158_v41 = vmul.f32 %v6172_v61, %v4140_v0  ;;  %6175 = vtanh.f32 %v4129_v1  ;;  %vm4163_vm8 = vweird.f32 %v6172_v61  ;;  %vm4149_vm12 = vmor %vm4147_vm10, %vm4148_vm7  ;;  %vm4177_vm1 = vweird.f32 %v8028_v6 }
 0x58c   :  { %v4144_v12 = vsub.f32 1.0, %v4143_v31  ;;  %v4297_v42 = vpop.f32.mrf.mxu0  ;;  %v4317_v21 = vpop.f32.mrf.mxu1  ;;  %vm4164_vm13 = vmor %vm4162_vm9, %vm4163_vm8 }
 0x58d   :  { %v4159_v47 = vsub.f32 1.0, %v4158_v41  ;;  %v4360_v59 = vadd.f32 %v4297_v42, %v4273_v19  ;;  %v4361_v22 = vadd.f32 %v4317_v21, %v4274_v3 }
 0x58e   :  { %v4145_v52 = vmul.f32 %v6170_v14, %v4144_v12 }
 0x58f   :  { %v4160_v50 = vmul.f32 %v6172_v61, %v4159_v47  ;;  %v5809_v51 = vmul.f32 -1.442695, %v4360_v59  ;;  %v5810_v5 = vmul.f32 -1.442695, %v4361_v22 }
 0x590   :  { %v6174_v23 = vpop.eup %6173  ;;  %v4146_v33 = vadd.f32 %v6170_v14, %v4145_v52 }
 0x591   :  { %v4173_v24 = vmul.f32 %v6174_v23, %v8028_v6  ;;  %v4161_v18 = vadd.f32 %v6172_v61, %v4160_v50  ;;  %6177 = vpow2.f32 %v5809_v51  ;;  %v6176_v39 = vpop.eup %6175  ;;  %vm4178_vm15 = vweird.f32 %v6174_v23 }
 0x592   :  { %v4150_v10 = vsel %vm4149_vm12, %v6170_v14, %v4146_v33  ;;  %6179 = vpow2.f32 %v5810_v5  ;;  %vm4179_vm2 = vmor %vm4177_vm1, %vm4178_vm15  ;;  %v4184_v14 = vor.u32 1.1754944e-38, %v4183_v17  ;;  %v8065_v33 = vld [vmem:[#allocation3 + $0xa0] sm:$0xff] }
 0x593   :  { %v4174_v27 = vsub.f32 1.0, %v4173_v24  ;;  %v4155_v45 = vsel %vm4152_vm11, %v4154_v29, %v4150_v10  ;;  %v4165_v43 = vsel %vm4164_vm13, %v6172_v61, %v4161_v18  ;;  %v4337_v2 = vpop.f32.mrf.mxu2  ;;  %v4357_v1 = vpop.f32.mrf.mxu3  ;;  %v8068_v24 = vld [vmem:[#allocation3 + $0xa8] sm:$0xff]  ;;  %v8078_v10 = vld [vmem:[#allocation3 + $0xb8] sm:$0xff] }
 0x594   :  { %v4170_v35 = vsel %vm4167_vm14, %v4169_v37, %v4165_v43  ;;  %v4189_v7 = vmul.f32 %v6176_v39, %v4155_v45  ;;  %v4362_v38 = vadd.f32 %v4337_v2, %v4275_v8  ;;  %v4444_v20 = vpop.f32.mrf.mxu0  ;;  %v4464_v9 = vpop.f32.mrf.mxu1  ;;  %v4363_v19 = vadd.f32 %v4357_v1, %v4276_v11  ;;  %v8075_v37 = vld [vmem:[#allocation3 + $0xb0] sm:$0xff]  ;;  %v8083_v45 = vld [vmem:[#allocation3 + $0x80] sm:$0xff]  ;;  %v8086_v43 = vld [vmem:[#allocation3 + $0x88] sm:$0xff] }
 0x595   :  { %v4175_v40 = vmul.f32 %v6174_v23, %v4174_v27  ;;  %v4188_v15 = vmul.f32 %v4170_v35, %v7880_v49  ;;  %v4181_v49 = vand.u32 2147483647, %v8028_v6  ;;  %v4507_v30 = vadd.f32 %v4444_v20, %v6978_v28 }
 0x596   :  { %v5811_v32 = vmul.f32 -1.442695, %v4362_v38  ;;  %v4508_v59 = vadd.f32 %v4464_v9, %v8348_v13  ;;  %v8096_v38 = vld [vmem:[#allocation3 + $0x90] sm:$0xff] }
 0x597   :  { %v6178_v62 = vpop.eup %6177  ;;  %v4190_v54 = vadd.f32 %v4189_v7, %v4188_v15  ;;  %v4176_v0 = vadd.f32 %v6174_v23, %v4175_v40  ;;  %vm4182_vm3 = vcmp.eq.f32.partialorder %v4181_v49, 8.507059e+37  ;;  %v8099_v40 = vld [vmem:[#allocation3 + $0x98] sm:$0xff] }
 0x598   :  { %v6180_v55 = vpop.eup %6179  ;;  %v8036_v56 = vadd.f32 1.0, %v6178_v62  ;;  %6181 = vpow2.f32 %v5811_v32 }
 0x599   :  { %6183 = vtanh.f32 %v4190_v54  ;;  %v8039_v34 = vadd.f32 1.0, %v6180_v55  ;;  %v4180_v63 = vsel %vm4179_vm2, %v6174_v23, %v4176_v0 }
 0x59a   :  { %6185 = vrcp.f32 %v8036_v56  ;;  %v4185_v3 = vsel %vm4182_vm3, %v4184_v14, %v4180_v63  ;;  %v4385_v36 = vand.u32 2147483647, %v8036_v56  ;;  %v4387_v51 = vand.u32 2147483648, %v8036_v56 }
 0x59b   :  { %6187 = vrcp.f32 %v8039_v34  ;;  %v4484_v6 = vpop.f32.mrf.mxu2  ;;  %v4402_v29 = vand.u32 2147483648, %v8039_v34  ;;  %v4400_v39 = vand.u32 2147483647, %v8039_v34  ;;  %vm4396_vm6 = vweird.f32 %v8039_v34  ;;  %v4504_v9 = vpop.f32.mrf.mxu3 }
 0x59c   :  { %vm4381_vm7 = vweird.f32 %v8036_v56  ;;  %vm8092_vm8 = vcmp.eq.f32.partialorder %v4385_v36, 8.507059e+37  ;;  %v4388_v32 = vor.u32 1.1754944e-38, %v4387_v51  ;;  %v4510_v36 = vadd.f32 %v4504_v9, %v8365_v57  ;;  %v6372_v9 = vld [vmem:[#allocation6 + $0x98] sm:$0xff] }
 0x59d   :  { %v4403_v55 = vor.u32 1.1754944e-38, %v4402_v29  ;;  %vm4401_vm11 = vcmp.eq.f32.partialorder %v4400_v39, 8.507059e+37 }
 0x59e   :  { %v6182_v61 = vpop.eup %6181 }
 0x59f   :  { %v6184_v31 = vpop.eup %6183  ;;  %v8046_v41 = vadd.f32 1.0, %v6182_v61 }
 0x5a0   :  { %v8048_v12 = vpop.eup %6185  ;;  %v4192_v58 = vmul.f32 %v6184_v31, %v4185_v3 }
 0x5a1   :  { %v8050_v42 = vpop.eup %6187  ;;  %v4377_v21 = vmul.f32 %v8048_v12, %v8036_v56  ;;  %6189 = vrcp.f32 %v8046_v41  ;;  %vm4382_vm4 = vweird.f32 %v8048_v12  ;;  %v4509_v56 = vadd.f32 %v4484_v6, %v6990_v16 }
 0x5a2   :  { %v4392_v47 = vmul.f32 %v8050_v42, %v8039_v34  ;;  %5823 = vmatmul.msk.f32.vlgmr.msrb.gmra.mxu0 %vm106_vm0, %v4192_v58  ;;  %5824 = vmatmul.msk.f32.vlgmr.msrb.gmra.mxu1 %vm106_vm0, %v4192_v58  ;;  %6191 = vtanh.f32 %v4363_v19  ;;  %vm4397_vm5 = vweird.f32 %v8050_v42  ;;  %vm4383_vm9 = vmor %vm4381_vm7, %vm4382_vm4  ;;  %vm4411_vm13 = vweird.f32 %v8046_v41 }
 0x5a3   :  { %v4378_v22 = vsub.f32 1.0, %v4377_v21  ;;  %v4531_v52 = vpop.f32.mrf.mxu0  ;;  %v4551_v48 = vpop.f32.mrf.mxu1  ;;  %5825 = vmatmul.msk.f32.vlgmr.msrb.gmra.mxu2 %vm106_vm0, %v4192_v58  ;;  %5826 = vmatmul.msk.f32.vlgmr.msrb.gmra.mxu3 %vm106_vm0, %v4192_v58  ;;  %vm4398_vm10 = vmor %vm4396_vm6, %vm4397_vm5 }
 0x5a4   :  { %v4393_v50 = vsub.f32 1.0, %v4392_v47  ;;  %v4594_v5 = vadd.f32 %v4531_v52, %v4507_v30  ;;  %v4595_v23 = vadd.f32 %v4551_v48, %v4508_v59  ;;  %4912 = vmatpush.msrb.mxu0 %v8065_v33  ;;  %4932 = vmatpush.msrb.mxu1 %v8068_v24 }
 0x5a5   :  { %v4379_v18 = vmul.f32 %v8048_v12, %v4378_v22  ;;  %4952 = vmatpush.msrb.mxu2 %v8075_v37  ;;  %4972 = vmatpush.msrb.mxu3 %v8078_v10 }
 0x5a6   :  { %v4394_v8 = vmul.f32 %v8050_v42, %v4393_v50  ;;  %v5820_v26 = vmul.f32 -1.442695, %v4594_v5  ;;  %v5821_v27 = vmul.f32 -1.442695, %v4595_v23  ;;  %4913 = vmatpush.msrb.mxu0 %v8083_v45  ;;  %4933 = vmatpush.msrb.mxu1 %v8086_v43 }
 0x5a7   :  { %v6190_v2 = vpop.eup %6189  ;;  %v4380_v35 = vadd.f32 %v8048_v12, %v4379_v18  ;;  %4953 = vmatpush.msrb.mxu2 %v8096_v38  ;;  %4973 = vmatpush.msrb.mxu3 %v8099_v40 }
 0x5a8   :  { %v4407_v15 = vmul.f32 %v6190_v2, %v8046_v41  ;;  %v4395_v62 = vadd.f32 %v8050_v42, %v4394_v8  ;;  %6193 = vpow2.f32 %v5820_v26  ;;  %v6192_v54 = vpop.eup %6191  ;;  %vm4412_vm12 = vweird.f32 %v6190_v2 }
 0x5a9   :  { %v4384_v0 = vsel %vm4383_vm9, %v8048_v12, %v4380_v35  ;;  %6195 = vpow2.f32 %v5821_v27  ;;  %vm4413_vm14 = vmor %vm4411_vm13, %vm4412_vm12  ;;  %v8137_v27 = vld [vmem:[#allocation6 + $0xa0] sm:$0xff] }
 0x5aa   :  { %v4408_v17 = vsub.f32 1.0, %v4407_v15  ;;  %v4389_v34 = vsel %vm8092_vm8, %v4388_v32, %v4384_v0  ;;  %v4399_v20 = vsel %vm4398_vm10, %v8050_v42, %v4395_v62  ;;  %v4571_v49 = vpop.f32.mrf.mxu2  ;;  %v4417_v42 = vand.u32 2147483648, %v8046_v41  ;;  %v4591_v59 = vpop.f32.mrf.mxu3  ;;  %v8145_v32 = vld [vmem:[#allocation6 + $0xb0] sm:$0xff]  ;;  %v8148_v62 = vld [vmem:[#allocation6 + $0xb8] sm:$0xff]  ;;  %v6369_v0 = vld [vmem:[#allocation6 + $0x80] sm:$0xff] }
 0x5ab   :  { %v4404_v63 = vsel %vm4401_vm11, %v4403_v55, %v4399_v20  ;;  %v4423_v1 = vmul.f32 %v6192_v54, %v4389_v34  ;;  %v4596_v14 = vadd.f32 %v4571_v49, %v4509_v56  ;;  %v4597_v23 = vadd.f32 %v4591_v59, %v4510_v36  ;;  %v6370_v56 = vld [vmem:[#allocation6 + $0x88] sm:$0xff]  ;;  %v6371_v20 = vld [vmem:[#allocation6 + $0x90] sm:$0xff] }
 0x5ac   :  { %v4409_v11 = vmul.f32 %v6190_v2, %v4408_v17  ;;  %v4422_v61 = vmul.f32 %v4404_v63, %v7945_v46  ;;  %v4415_v46 = vand.u32 2147483647, %v8046_v41  ;;  %v4418_v30 = vor.u32 1.1754944e-38, %v4417_v42 }
 0x5ad   :  { %v5822_v31 = vmul.f32 -1.442695, %v4596_v14 }
 0x5ae   :  { %v6194_v19 = vpop.eup %6193  ;;  %v8114_v3 = vadd.f32 %v4423_v1, %v4422_v61  ;;  %v4410_v6 = vadd.f32 %v6190_v2, %v4409_v11  ;;  %vm4416_vm15 = vcmp.eq.f32.partialorder %v4415_v46, 8.507059e+37 }
 0x5af   :  { %v6196_v12 = vpop.eup %6195  ;;  %v8116_v58 = vadd.f32 1.0, %v6194_v19  ;;  %6197 = vpow2.f32 %v5822_v31 }
 0x5b0   :  { %6199 = vtanh.f32 %v8114_v3  ;;  %v8120_v21 = vadd.f32 1.0, %v6196_v12  ;;  %v4414_v47 = vsel %vm4413_vm14, %v6190_v2, %v4410_v6  ;;  %v8140_v2 = vld [vmem:[#allocation6 + $0xa8] sm:$0xff] }
 0x5b1   :  { %6201 = vrcp.f32 %v8116_v58  ;;  %v4419_v48 = vsel %vm4416_vm15, %v4418_v30, %v4414_v47  ;;  %v4621_v26 = vand.u32 2147483648, %v8116_v58  ;;  %v4619_v15 = vand.u32 2147483647, %v8116_v58 }
 0x5b2   :  { %6203 = vrcp.f32 %v8120_v21  ;;  %v4636_v35 = vand.u32 2147483648, %v8120_v21  ;;  %v4634_v55 = vand.u32 2147483647, %v8120_v21  ;;  %vm4615_vm3 = vweird.f32 %v8116_v58 }
 0x5b3   :  { %vm4630_vm4 = vweird.f32 %v8120_v21  ;;  %v4622_v63 = vor.u32 1.1754944e-38, %v4621_v26  ;;  %vm4620_vm7 = vcmp.eq.f32.partialorder %v4619_v15, 8.507059e+37 }
 0x5b4   :  { %v4637_v14 = vor.u32 1.1754944e-38, %v4636_v35  ;;  %vm4635_vm8 = vcmp.eq.f32.partialorder %v4634_v55, 8.507059e+37 }
 0x5b5   :  { %v6198_v22 = vpop.eup %6197 }
 0x5b6   :  { %v6200_v52 = vpop.eup %6199  ;;  %v8127_v50 = vadd.f32 1.0, %v6198_v22 }
 0x5b7   :  { %v6202_v51 = vpop.eup %6201  ;;  %v4426_v5 = vmul.f32 %v6200_v52, %v4419_v48 }
 0x5b8   :  { %v6204_v41 = vpop.eup %6203  ;;  %v4611_v29 = vmul.f32 %v6202_v51, %v8116_v58  ;;  %6205 = vrcp.f32 %v8127_v50  ;;  %vm4616_vm1 = vweird.f32 %v6202_v51  ;;  %vm4645_vm10 = vweird.f32 %v8127_v50 }
 0x5b9   :  { %v4626_v18 = vmul.f32 %v6204_v41, %v8120_v21  ;;  %5827 = vmatmul.msk.f32.vlgmr.msra.gmra.mxu0 %vm106_vm0, %v4426_v5  ;;  %5828 = vmatmul.msk.f32.vlgmr.msra.gmra.mxu1 %vm106_vm0, %v4426_v5  ;;  %6207 = vtanh.f32 %v4597_v23  ;;  %vm4631_vm2 = vweird.f32 %v6204_v41  ;;  %vm4617_vm5 = vmor %vm4615_vm3, %vm4616_vm1 }
 0x5ba   :  { %v4612_v39 = vsub.f32 1.0, %v4611_v29  ;;  %5829 = vmatmul.msk.f32.vlgmr.msra.gmra.mxu2 %vm106_vm0, %v4426_v5  ;;  %5830 = vmatmul.msk.f32.vlgmr.msra.gmra.mxu3 %vm106_vm0, %v4426_v5  ;;  %vm4632_vm6 = vmor %vm4630_vm4, %vm4631_vm2 }
 0x5bb   :  { %v4627_v8 = vsub.f32 1.0, %v4626_v18  ;;  %4999 = vmatpush.msra.mxu0 %v8137_v27  ;;  %5019 = vmatpush.msra.mxu1 %v8140_v2 }
 0x5bc   :  { %v4613_v7 = vmul.f32 %v6202_v51, %v4612_v39  ;;  %5039 = vmatpush.msra.mxu2 %v8145_v32  ;;  %5059 = vmatpush.msra.mxu3 %v8148_v62 }
 0x5bd   :  { %v4628_v54 = vmul.f32 %v6204_v41, %v4627_v8  ;;  %5000 = vmatpush.msra.mxu0 %v6369_v0  ;;  %5020 = vmatpush.msra.mxu1 %v6370_v56 }
 0x5be   :  { %v6206_v17 = vpop.eup %6205  ;;  %v4614_v34 = vadd.f32 %v6202_v51, %v4613_v7  ;;  %5040 = vmatpush.msra.mxu2 %v6371_v20  ;;  %5060 = vmatpush.msra.mxu3 %v6372_v9 }
 0x5bf   :  { %v4641_v49 = vmul.f32 %v6206_v17, %v8127_v50  ;;  %v4629_v1 = vadd.f32 %v6204_v41, %v4628_v54  ;;  %v6208_v61 = vpop.eup %6207  ;;  %vm4646_vm9 = vweird.f32 %v6206_v17 }
 0x5c0   :  { %v4618_v11 = vsel %vm4617_vm5, %v6202_v51, %v4614_v34  ;;  %vm4647_vm11 = vmor %vm4645_vm10, %vm4646_vm9 }
 0x5c1   :  { %v4642_v31 = vsub.f32 1.0, %v4641_v49  ;;  %v4623_v19 = vsel %vm4620_vm7, %v4622_v63, %v4618_v11  ;;  %v4633_v12 = vsel %vm4632_vm6, %v6204_v41, %v4629_v1  ;;  %5834 = vmatmul.msk.f32.vlgmr.msrb.gmra.mxu0 %vm106_vm0, %v4426_v5  ;;  %5835 = vmatmul.msk.f32.vlgmr.msrb.gmra.mxu1 %vm106_vm0, %v4426_v5 }
 0x5c2   :  { %v4638_v6 = vsel %vm4635_vm8, %v4637_v14, %v4633_v12  ;;  %v4657_v58 = vmul.f32 %v6208_v61, %v4623_v19  ;;  %5836 = vmatmul.msk.f32.vlgmr.msrb.gmra.mxu2 %vm106_vm0, %v4426_v5  ;;  %5837 = vmatmul.msk.f32.vlgmr.msrb.gmra.mxu3 %vm106_vm0, %v4426_v5 }
 0x5c3   :  { %v4643_v42 = vmul.f32 %v6206_v17, %v4642_v31  ;;  %v4656_v21 = vmul.f32 %v4638_v6, %v7999_v53  ;;  %5149 = vmatpush.msrb.mxu0 %v8065_v33  ;;  %5169 = vmatpush.msrb.mxu1 %v8068_v24  ;;  %v4651_v53 = vand.u32 2147483648, %v8127_v50  ;;  %v4649_v33 = vand.u32 2147483647, %v8127_v50 }
 0x5c4   :  { %5189 = vmatpush.msrb.mxu2 %v8075_v37  ;;  %5209 = vmatpush.msrb.mxu3 %v8078_v10 }
 0x5c5   :  { %v8166_v46 = vadd.f32 %v4657_v58, %v4656_v21  ;;  %5150 = vmatpush.msrb.mxu0 %v8083_v45  ;;  %5170 = vmatpush.msrb.mxu1 %v8086_v43  ;;  %v4644_v47 = vadd.f32 %v6206_v17, %v4643_v42  ;;  %v4652_v37 = vor.u32 1.1754944e-38, %v4651_v53  ;;  %vm4650_vm12 = vcmp.eq.f32.partialorder %v4649_v33, 8.507059e+37 }
 0x5c6   :  { %5190 = vmatpush.msrb.mxu2 %v8096_v38  ;;  %5210 = vmatpush.msrb.mxu3 %v8099_v40 }
 0x5c7   :  { %6209 = vtanh.f32 %v8166_v46  ;;  %v4648_v24 = vsel %vm4647_vm11, %v6206_v17, %v4644_v47 }
 0x5c8   :  { %v4653_v45 = vsel %vm4650_vm12, %v4652_v37, %v4648_v24 }
 0x5cd   :  { %v6210_v10 = vpop.eup %6209 }
 0x5ce   :  { %v4660_v43 = vmul.f32 %v6210_v10, %v4653_v45 }
 0x5d0   :  { %5838 = vmatmul.msk.f32.vlgmr.msra.gmra.mxu0 %vm106_vm0, %v4660_v43  ;;  %5839 = vmatmul.msk.f32.vlgmr.msra.gmra.mxu1 %vm106_vm0, %v4660_v43 }
 0x5d1   :  { %5840 = vmatmul.msk.f32.vlgmr.msra.gmra.mxu2 %vm106_vm0, %v4660_v43  ;;  %5841 = vmatmul.msk.f32.vlgmr.msra.gmra.mxu3 %vm106_vm0, %v4660_v43 }
 0x5d2   :  { %5236 = vmatpush.msra.mxu0 %v8137_v27  ;;  %5256 = vmatpush.msra.mxu1 %v8140_v2 }
 0x5d3   :  { %5276 = vmatpush.msra.mxu2 %v8145_v32  ;;  %5296 = vmatpush.msra.mxu3 %v8148_v62 }
 0x5d4   :  { %5237 = vmatpush.msra.mxu0 %v6369_v0  ;;  %5257 = vmatpush.msra.mxu1 %v6370_v56 }
 0x5d5   :  { %5277 = vmatpush.msra.mxu2 %v6371_v20  ;;  %5297 = vmatpush.msra.mxu3 %v6372_v9 }
 0x61f   :  { %v4681_v38 = vpop.f32.mrf.mxu0  ;;  %v4701_v40 = vpop.f32.mrf.mxu1 }
 0x620   :  { %v4744_v30 = vadd.f32 %v4681_v38, %v6796_v4  ;;  %v4745_v59 = vadd.f32 %v4701_v40, %v8336_v44 }
 0x626   :  { %v4721_v22 = vpop.f32.mrf.mxu2  ;;  %v4741_v29 = vpop.f32.mrf.mxu3 }
 0x627   :  { %v4746_v23 = vadd.f32 %v4721_v22, %v8337_v25  ;;  %v4747_v7 = vadd.f32 %v4741_v29, %v6814_v60 }
 0x636   :  { %v4768_v36 = vpop.f32.mrf.mxu0  ;;  %v4788_v52 = vpop.f32.mrf.mxu1 }
 0x637   :  { %v4831_v48 = vadd.f32 %v4768_v36, %v4744_v30  ;;  %v4832_v50 = vadd.f32 %v4788_v52, %v4745_v59 }
 0x639   :  { %v5831_v51 = vmul.f32 -1.442695, %v4831_v48  ;;  %v5832_v5 = vmul.f32 -1.442695, %v4832_v50 }
 0x63b   :  { %6211 = vpow2.f32 %v5831_v51 }
 0x63c   :  { %6213 = vpow2.f32 %v5832_v5 }
 0x63d   :  { %v4808_v41 = vpop.f32.mrf.mxu2  ;;  %v4828_v35 = vpop.f32.mrf.mxu3 }
 0x63e   :  { %v4833_v18 = vadd.f32 %v4808_v41, %v4746_v23  ;;  %v4915_v27 = vpop.f32.mrf.mxu0  ;;  %v4935_v2 = vpop.f32.mrf.mxu1  ;;  %v4834_v25 = vadd.f32 %v4828_v35, %v4747_v7 }
 0x63f   :  { %v4978_v17 = vadd.f32 %v4915_v27, %v6978_v28  ;;  %v4979_v34 = vadd.f32 %v4935_v2, %v8348_v13 }
 0x640   :  { %v5833_v39 = vmul.f32 -1.442695, %v4833_v18 }
 0x641   :  { %v6212_v8 = vpop.eup %6211 }
 0x642   :  { %v6214_v26 = vpop.eup %6213  ;;  %v4844_v4 = vadd.f32 1.0, %v6212_v8  ;;  %6215 = vpow2.f32 %v5833_v39 }
 0x643   :  { %v4845_v44 = vadd.f32 1.0, %v6214_v26 }
 0x644   :  { %6217 = vrcp.f32 %v4844_v4  ;;  %v4856_v9 = vand.u32 2147483647, %v4844_v4  ;;  %v4858_v1 = vand.u32 2147483648, %v4844_v4  ;;  %vm4852_vm1 = vweird.f32 %v4844_v4 }
 0x645   :  { %6219 = vrcp.f32 %v4845_v44  ;;  %v4955_v54 = vpop.f32.mrf.mxu2  ;;  %v4873_v61 = vand.u32 2147483648, %v4845_v44  ;;  %v4871_v19 = vand.u32 2147483647, %v4845_v44  ;;  %vm4867_vm15 = vweird.f32 %v4845_v44  ;;  %v4975_v30 = vpop.f32.mrf.mxu3 }
 0x646   :  { %vm4857_vm2 = vcmp.eq.f32.partialorder %v4856_v9, 8.507059e+37  ;;  %v4859_v53 = vor.u32 1.1754944e-38, %v4858_v1  ;;  %v4980_v45 = vadd.f32 %v4955_v54, %v6990_v16  ;;  %v4981_v2 = vadd.f32 %v4975_v30, %v8365_v57 }
 0x647   :  { %v4874_v37 = vor.u32 1.1754944e-38, %v4873_v61  ;;  %vm4872_vm5 = vcmp.eq.f32.partialorder %v4871_v19, 8.507059e+37 }
 0x648   :  { %v6216_v15 = vpop.eup %6215 }
 0x649   :  { %v8188_v32 = vadd.f32 1.0, %v6216_v15 }
 0x64a   :  { %v6218_v62 = vpop.eup %6217 }
 0x64b   :  { %v6220_v55 = vpop.eup %6219  ;;  %v4848_v0 = vmul.f32 %v6218_v62, %v4844_v4  ;;  %6221 = vrcp.f32 %v8188_v32  ;;  %vm4853_vm13 = vweird.f32 %v6218_v62  ;;  %v4888_v39 = vand.u32 2147483648, %v8188_v32 }
 0x64c   :  { %v4863_v56 = vmul.f32 %v6220_v55, %v4845_v44  ;;  %6223 = vtanh.f32 %v4834_v25  ;;  %vm4868_vm14 = vweird.f32 %v6220_v55  ;;  %vm4854_vm3 = vmor %vm4852_vm1, %vm4853_vm13  ;;  %vm4882_vm7 = vweird.f32 %v8188_v32 }
 0x64d   :  { %v4849_v20 = vsub.f32 1.0, %v4848_v0  ;;  %v5002_v49 = vpop.f32.mrf.mxu0  ;;  %v5022_v60 = vpop.f32.mrf.mxu1  ;;  %vm4869_vm4 = vmor %vm4867_vm15, %vm4868_vm14  ;;  %v4886_v26 = vand.u32 2147483647, %v8188_v32  ;;  %v4889_v4 = vor.u32 1.1754944e-38, %v4888_v39  ;;  %v5370_v39 = vld [vmem:[%s8278_s4 + $0x8] sm:$0xff] }
 0x64e   :  { %v4864_v63 = vsub.f32 1.0, %v4863_v56  ;;  %v5065_v14 = vadd.f32 %v5002_v49, %v4978_v17  ;;  %v5066_v11 = vadd.f32 %v5022_v60, %v4979_v34 }
 0x64f   :  { %v4850_v31 = vmul.f32 %v6218_v62, %v4849_v20  ;;  %vm4887_vm9 = vcmp.eq.f32.partialorder %v4886_v26, 8.507059e+37 }
 0x650   :  { %v4865_v12 = vmul.f32 %v6220_v55, %v4864_v63  ;;  %v5842_v6 = vmul.f32 -1.442695, %v5065_v14  ;;  %v5843_v58 = vmul.f32 -1.442695, %v5066_v11 }
 0x651   :  { %v6222_v42 = vpop.eup %6221  ;;  %v4851_v21 = vadd.f32 %v6218_v62, %v4850_v31 }
 0x652   :  { %v4878_v47 = vmul.f32 %v6222_v42, %v8188_v32  ;;  %v4866_v33 = vadd.f32 %v6220_v55, %v4865_v12  ;;  %6225 = vpow2.f32 %v5842_v6  ;;  %v6224_v24 = vpop.eup %6223  ;;  %vm4883_vm6 = vweird.f32 %v6222_v42 }
 0x653   :  { %v4855_v10 = vsel %vm4854_vm3, %v6218_v62, %v4851_v21  ;;  %6227 = vpow2.f32 %v5843_v58  ;;  %vm4884_vm8 = vmor %vm4882_vm7, %vm4883_vm6 }
 0x654   :  { %v4879_v43 = vsub.f32 1.0, %v4878_v47  ;;  %v4860_v38 = vsel %vm4857_vm2, %v4859_v53, %v4855_v10  ;;  %v4870_v40 = vsel %vm4869_vm4, %v6220_v55, %v4866_v33  ;;  %v5042_v59 = vpop.f32.mrf.mxu2  ;;  %v5062_v44 = vpop.f32.mrf.mxu3 }
 0x655   :  { %v4875_v22 = vsel %vm4872_vm5, %v4874_v37, %v4870_v40  ;;  %v4894_v36 = vmul.f32 %v6224_v24, %v4860_v38  ;;  %v5067_v52 = vadd.f32 %v5042_v59, %v4980_v45  ;;  %v5068_v62 = vadd.f32 %v5062_v44, %v4981_v2 }
 0x656   :  { %v4880_v48 = vmul.f32 %v6222_v42, %v4879_v43  ;;  %v4893_v50 = vmul.f32 %v4875_v22, %v8114_v3 }
 0x657   :  { %v5844_v51 = vmul.f32 -1.442695, %v5067_v52 }
 0x658   :  { %v6226_v5 = vpop.eup %6225  ;;  %v4895_v23 = vadd.f32 %v4894_v36, %v4893_v50  ;;  %v4881_v29 = vadd.f32 %v6222_v42, %v4880_v48 }
 0x659   :  { %v6228_v41 = vpop.eup %6227  ;;  %v5078_v18 = vadd.f32 1.0, %v6226_v5  ;;  %6229 = vpow2.f32 %v5844_v51 }
 0x65a   :  { %6231 = vtanh.f32 %v4895_v23  ;;  %v5079_v8 = vadd.f32 1.0, %v6228_v41  ;;  %v4885_v3 = vsel %vm4884_vm8, %v6222_v42, %v4881_v29 }
 0x65b   :  { %6233 = vrcp.f32 %v5078_v18  ;;  %v4890_v15 = vsel %vm4887_vm9, %v4889_v4, %v4885_v3  ;;  %v5092_v34 = vand.u32 2147483648, %v5078_v18  ;;  %v5090_v49 = vand.u32 2147483647, %v5078_v18 }
 0x65c   :  { %6235 = vrcp.f32 %v5079_v8  ;;  %v5107_v20 = vand.u32 2147483648, %v5079_v8  ;;  %v5105_v63 = vand.u32 2147483647, %v5079_v8  ;;  %vm5086_vm12 = vweird.f32 %v5078_v18 }
 0x65d   :  { %vm5101_vm13 = vweird.f32 %v5079_v8  ;;  %v5093_v61 = vor.u32 1.1754944e-38, %v5092_v34  ;;  %vm5091_vm1 = vcmp.eq.f32.partialorder %v5090_v49, 8.507059e+37 }
 0x65e   :  { %v5108_v19 = vor.u32 1.1754944e-38, %v5107_v20  ;;  %vm5106_vm2 = vcmp.eq.f32.partialorder %v5105_v63, 8.507059e+37 }
 0x65f   :  { %v6230_v27 = vpop.eup %6229 }
 0x660   :  { %v6232_v35 = vpop.eup %6231  ;;  %v5080_v7 = vadd.f32 1.0, %v6230_v27 }
 0x661   :  { %v6234_v25 = vpop.eup %6233  ;;  %v4897_v54 = vmul.f32 %v6232_v35, %v4890_v15 }
 0x662   :  { %v6236_v55 = vpop.eup %6235  ;;  %v5082_v0 = vmul.f32 %v6234_v25, %v5078_v18  ;;  %6237 = vrcp.f32 %v5080_v7  ;;  %vm5087_vm10 = vweird.f32 %v6234_v25  ;;  %v5122_v45 = vand.u32 2147483648, %v5080_v7 }
 0x663   :  { %v5097_v32 = vmul.f32 %v6236_v55, %v5079_v8  ;;  %5845 = vmatmul.msk.f32.vlgmr.msrb.gmra.mxu0 %vm106_vm0, %v4897_v54  ;;  %5846 = vmatmul.msk.f32.vlgmr.msrb.gmra.mxu1 %vm106_vm0, %v4897_v54  ;;  %6239 = vtanh.f32 %v5068_v62  ;;  %vm5102_vm11 = vweird.f32 %v6236_v55  ;;  %vm5088_vm14 = vmor %vm5086_vm12, %vm5087_vm10  ;;  %vm5116_vm4 = vweird.f32 %v5080_v7  ;;  %v5369_v8 = vld [vmem:[%s8278_s4] sm:$0xff] }
 0x664   :  { %v5083_v56 = vsub.f32 1.0, %v5082_v0  ;;  %5847 = vmatmul.msk.f32.vlgmr.msrb.gmra.mxu2 %vm106_vm0, %v4897_v54  ;;  %5848 = vmatmul.msk.f32.vlgmr.msrb.gmra.mxu3 %vm106_vm0, %v4897_v54  ;;  %vm5103_vm15 = vmor %vm5101_vm13, %vm5102_vm11  ;;  %v5120_v43 = vand.u32 2147483647, %v5080_v7  ;;  %v5123_v40 = vor.u32 1.1754944e-38, %v5122_v45 }
 0x665   :  { %v5098_v17 = vsub.f32 1.0, %v5097_v32  ;;  %5392 = vmatpush.msrb.mxu0 %v5370_v39 }
 0x666   :  { %v5084_v9 = vmul.f32 %v6234_v25, %v5083_v56  ;;  %vm5121_vm6 = vcmp.eq.f32.partialorder %v5120_v43, 8.507059e+37 }
 0x667   :  { %v5099_v60 = vmul.f32 %v6236_v55, %v5098_v17  ;;  %5393 = vmatpush.msrb.mxu0 %v5369_v8 }
 0x668   :  { %v6238_v1 = vpop.eup %6237  ;;  %v5085_v14 = vadd.f32 %v6234_v25, %v5084_v9 }
 0x669   :  { %v5112_v11 = vmul.f32 %v6238_v1, %v5080_v7  ;;  %v5100_v31 = vadd.f32 %v6236_v55, %v5099_v60  ;;  %v6240_v6 = vpop.eup %6239  ;;  %vm5117_vm3 = vweird.f32 %v6238_v1 }
 0x66a   :  { %v5089_v12 = vsel %vm5088_vm14, %v6234_v25, %v5085_v14  ;;  %vm5118_vm5 = vmor %vm5116_vm4, %vm5117_vm3  ;;  %vm5401_vm4 = vcmask 156672  }
 0x66b   :  { %v5113_v58 = vsub.f32 1.0, %v5112_v11  ;;  %v5094_v42 = vsel %vm5091_vm1, %v5093_v61, %v5089_v12  ;;  %v5104_v21 = vsel %vm5103_vm15, %v6236_v55, %v5100_v31 }
 0x66c   :  { %v5109_v47 = vsel %vm5106_vm2, %v5108_v19, %v5104_v21  ;;  %v5128_v53 = vmul.f32 %v6240_v6, %v5094_v42 }
 0x66d   :  { %v5114_v33 = vmul.f32 %v6238_v1, %v5113_v58  ;;  %v5127_v24 = vmul.f32 %v5109_v47, %v8166_v46 }
 0x66f   :  { %v8205_v37 = vadd.f32 %v5128_v53, %v5127_v24  ;;  %v5115_v10 = vadd.f32 %v6238_v1, %v5114_v33 }
 0x671   :  { %6241 = vtanh.f32 %v8205_v37  ;;  %v5119_v38 = vsel %vm5118_vm5, %v6238_v1, %v5115_v10  ;;  %vm5458_vm5 = vcmask 1043456  }
 0x672   :  { %v5124_v59 = vsel %vm5121_vm6, %v5123_v40, %v5119_v38 }
 0x677   :  { %v6242_v30 = vpop.eup %6241 }
 0x678   :  { %v5131_v22 = vmul.f32 %v6242_v30, %v5124_v59 }
 0x67a   :  { %5849 = vmatmul.msk.f32.vlgmr.msra.gmra.mxu0 %vm106_vm0, %v5131_v22  ;;  %5850 = vmatmul.msk.f32.vlgmr.msra.gmra.mxu1 %vm106_vm0, %v5131_v22 }
 0x67b   :  { %5851 = vmatmul.msk.f32.vlgmr.msra.gmra.mxu2 %vm106_vm0, %v5131_v22  ;;  %5852 = vmatmul.msk.f32.vlgmr.msra.gmra.mxu3 %vm106_vm0, %v5131_v22 }
 0x6e0   :  { %v5152_v46 = vpop.f32.mrf.mxu0  ;;  %v5172_v36 = vpop.f32.mrf.mxu1 }
 0x6e1   :  { %v5215_v52 = vadd.f32 %v5152_v46, %v6978_v28  ;;  %v5216_v48 = vadd.f32 %v5172_v36, %v8348_v13  ;;  %v6456_v46 = vmov 2.0  }
 0x6e7   :  { %v5192_v50 = vpop.f32.mrf.mxu2  ;;  %v5212_v3 = vpop.f32.mrf.mxu3 }
 0x6e8   :  { %v5217_v28 = vadd.f32 %v5192_v50, %v6990_v16  ;;  %v5218_v25 = vadd.f32 %v5212_v3, %v8365_v57 }
 0x6f7   :  { %v5239_v51 = vpop.f32.mrf.mxu0  ;;  %v5259_v5 = vpop.f32.mrf.mxu1 }
 0x6f8   :  { %v5302_v23 = vadd.f32 %v5239_v51, %v5215_v52  ;;  %v5303_v41 = vadd.f32 %v5259_v5, %v5216_v48 }
 0x6fa   :  { %v5853_v29 = vmul.f32 -1.442695, %v5302_v23  ;;  %v5854_v18 = vmul.f32 -1.442695, %v5303_v41 }
 0x6fc   :  { %6243 = vpow2.f32 %v5853_v29 }
 0x6fd   :  { %6245 = vpow2.f32 %v5854_v18 }
 0x6fe   :  { %v5279_v13 = vpop.f32.mrf.mxu2  ;;  %v5299_v7 = vpop.f32.mrf.mxu3 }
 0x6ff   :  { %v5304_v26 = vadd.f32 %v5279_v13, %v5217_v28  ;;  %v5305_v16 = vadd.f32 %v5299_v7, %v5218_v25 }
 0x701   :  { %v5855_v4 = vmul.f32 -1.442695, %v5304_v26 }
 0x702   :  { %v6244_v44 = vpop.eup %6243 }
 0x703   :  { %v6246_v27 = vpop.eup %6245  ;;  %v5315_v2 = vadd.f32 1.0, %v6244_v44  ;;  %6247 = vpow2.f32 %v5855_v4 }
 0x704   :  { %v5316_v35 = vadd.f32 1.0, %v6246_v27 }
 0x705   :  { %6249 = vrcp.f32 %v5315_v2  ;;  %v5329_v34 = vand.u32 2147483648, %v5315_v2  ;;  %v5327_v49 = vand.u32 2147483647, %v5315_v2  ;;  %vm5323_vm9 = vweird.f32 %v5315_v2 }
 0x706   :  { %6251 = vrcp.f32 %v5316_v35  ;;  %v5344_v20 = vand.u32 2147483648, %v5316_v35  ;;  %v5342_v63 = vand.u32 2147483647, %v5316_v35  ;;  %vm5338_vm10 = vweird.f32 %v5316_v35 }
 0x707   :  { %v5330_v11 = vor.u32 1.1754944e-38, %v5329_v34  ;;  %vm5328_vm13 = vcmp.eq.f32.partialorder %v5327_v49, 8.507059e+37 }
 0x708   :  { %v5345_v31 = vor.u32 1.1754944e-38, %v5344_v20  ;;  %vm5343_vm14 = vcmp.eq.f32.partialorder %v5342_v63, 8.507059e+37  ;;  %v5869_v63 = vld [vmem:[%s8280_s6] ss:$0 sm:$0xff] }
 0x709   :  { %v6248_v15 = vpop.eup %6247 }
 0x70a   :  { %v5317_v62 = vadd.f32 1.0, %v6248_v15  ;;  %v5449_v15 = vld [vmem:[%s8282_s8 + $0x10] sm:$0xf] }
 0x70b   :  { %v6250_v54 = vpop.eup %6249  ;;  %5857 = vmatpush.msk.msrb.mxu1 %vm5458_vm5, %v5449_v15 }
 0x70c   :  { %v6252_v55 = vpop.eup %6251  ;;  %v5319_v0 = vmul.f32 %v6250_v54, %v5315_v2  ;;  %6253 = vrcp.f32 %v5317_v62  ;;  %vm5324_vm7 = vweird.f32 %v6250_v54  ;;  %v5359_v45 = vand.u32 2147483648, %v5317_v62 }
 0x70d   :  { %v5334_v32 = vmul.f32 %v6252_v55, %v5316_v35  ;;  %6255 = vtanh.f32 %v5305_v16  ;;  %vm5339_vm8 = vweird.f32 %v6252_v55  ;;  %vm5325_vm11 = vmor %vm5323_vm9, %vm5324_vm7  ;;  %vm5353_vm1 = vweird.f32 %v5317_v62  ;;  %v5447_v16 = vld [vmem:[%s8282_s8] sm:$0xff] }
 0x70e   :  { %v5320_v56 = vsub.f32 1.0, %v5319_v0  ;;  %vm5340_vm12 = vmor %vm5338_vm10, %vm5339_vm8  ;;  %v5357_v43 = vand.u32 2147483647, %v5317_v62  ;;  %v5360_v40 = vor.u32 1.1754944e-38, %v5359_v45  ;;  %vm5454_vm9 = vcmask 162816  }
 0x70f   :  { %v5335_v17 = vsub.f32 1.0, %v5334_v32  ;;  %vm5485_vm10 = vcmask 74752  }
 0x710   :  { %v5321_v9 = vmul.f32 %v6250_v54, %v5320_v56  ;;  %vm5358_vm3 = vcmp.eq.f32.partialorder %v5357_v43, 8.507059e+37 }
 0x711   :  { %v5336_v60 = vmul.f32 %v6252_v55, %v5335_v17 }
 0x712   :  { %v6254_v1 = vpop.eup %6253  ;;  %v5322_v57 = vadd.f32 %v6250_v54, %v5321_v9 }
 0x713   :  { %v5349_v14 = vmul.f32 %v6254_v1, %v5317_v62  ;;  %v5337_v61 = vadd.f32 %v6252_v55, %v5336_v60  ;;  %v6256_v12 = vpop.eup %6255  ;;  %vm5354_vm15 = vweird.f32 %v6254_v1  ;;  %v5448_v62 = vld [vmem:[%s8282_s8 + $0x8] sm:$0xff] }
 0x714   :  { %v5326_v19 = vsel %vm5325_vm11, %v6250_v54, %v5322_v57  ;;  %vm5355_vm2 = vmor %vm5353_vm1, %vm5354_vm15  ;;  %5476 = vmatpush.msrb.mxu1 %v5448_v62  ;;  %vm5534_vm11 = vcmask 1041408   ;;  %vm5530_vm15 = vcmask 80896   ;;  %vm5558_vm1 = vcmask 17408  }
 0x715   :  { %v5350_v6 = vsub.f32 1.0, %v5349_v14  ;;  %v5331_v58 = vsel %vm5328_vm13, %v5330_v11, %v5326_v19  ;;  %v5341_v42 = vsel %vm5340_vm12, %v6252_v55, %v5337_v61  ;;  %v5870_v14 = vld [vmem:[%s8281_s7] ss:$0 sm:$0xff] }
 0x716   :  { %v5346_v21 = vsel %vm5343_vm14, %v5345_v31, %v5341_v42  ;;  %v5365_v47 = vmul.f32 %v6256_v12, %v5331_v58  ;;  %5477 = vmatpush.msrb.mxu1 %v5447_v16  ;;  %v5871_v31 = vld [vmem:[%s8283_s9] ss:$0 sm:$0xff] }
 0x717   :  { %v5351_v53 = vmul.f32 %v6254_v1, %v5350_v6  ;;  %v5364_v33 = vmul.f32 %v5346_v21, %v8205_v37  ;;  %v5868_v37 = vld [vmem:[%s8279_s5] ss:$0 sm:$0xff] }
 0x719   :  { %v5366_v24 = vadd.f32 %v5365_v47, %v5364_v33  ;;  %v5352_v10 = vadd.f32 %v6254_v1, %v5351_v53 }
 0x71b   :  { %6257 = vtanh.f32 %v5366_v24  ;;  %v5356_v38 = vsel %vm5355_vm2, %v6254_v1, %v5352_v10 }
 0x71c   :  { %v5361_v59 = vsel %vm5358_vm3, %v5360_v40, %v5356_v38  ;;  %6259 = vrcp.f32 %v6456_v46 }
 0x721   :  { %v6258_v30 = vpop.eup %6257 }
 0x722   :  { %v5368_v22 = vmul.f32 %v6258_v30, %v5361_v59  ;;  %v6260_v36 = vpop.eup %6259 }
 0x723   :  { %v5410_v52 = vmul.f32 2.0, %v6260_v36 }
 0x724   :  { %5856 = vmatmul.msk.f32.vlgmr.msrb.gmra.mxu0 %vm106_vm0, %v5368_v22  ;;  %vm5414_vm0 = vweird.f32 %v6260_v36  ;;  %v5525_v22 = vld [vmem:[%s8286_s12 + $0x8] sm:$0x3] }
 0x725   :  { %v5411_v5 = vsub.f32 1.0, %v5410_v52  ;;  %5859 = vmatpush.msk.msrb.mxu2 %vm5534_vm11, %v5525_v22 }
 0x727   :  { %v5412_v29 = vmul.f32 %v6260_v36, %v5411_v5 }
 0x729   :  { %v5413_v8 = vadd.f32 %v6260_v36, %v5412_v29 }
 0x72b   :  { %v8228_v26 = vsel %vm5414_vm0, %v6260_v36, %v5413_v8  ;;  %v5524_v36 = vld [vmem:[%s8286_s12] sm:$0xff] }
 0x72c   :  { %5553 = vmatpush.msrb.mxu2 %v5524_v36 }
 0x7a1   :  { %v5395_v48 = vpop.f32.mrf.mxu0 }
 0x7a2   :  { %v5396_v50 = vadd.f32 %v5868_v37, %v5395_v48 }
 0x7a4   :  { %v5398_v51 = vmax.f32 %v5396_v50, 0.0 }
 0x7a6   :  { %v5402_v23 = vsel %vm5401_vm4, %v5398_v51, 0.0 }
 0x7a7   :  { %v5403_v41 = vrot.slane %v5402_v23, 4 }
 0x7a9   :  { %v5404_v18 = vadd.f32 %v5403_v41, %v5402_v23 }
 0x7ab   :  { %v5405_v39 = vrot.slane %v5404_v18, 2 }
 0x7ad   :  { %v5406_v28 = vadd.f32 %v5405_v39, %v5404_v18  ;;  %v5872_v39 = vld [vmem:[%s8284_s10] ss:$0 sm:$0xff]  ;;  %s6457_s10 = smov [#allocation8]  }
 0x7af   :  { %v5407_v13 = vrot.slane %v5406_v28, 1 }
 0x7b1   :  { %v5408_v3 = vadd.f32 %v5407_v13, %v5406_v28  ;;  %v5873_v13 = vld [vmem:[%s8285_s11] ss:$0 sm:$0xff]  ;;  %s5589_s11 = sshll.u32 %s6457_s10, 4  ;;  %s5590_s11 = int_to_ptr.vmem [resolvable:$true] %s5589_s11 }
 0x7b3   :  { %v5416_v4 = vmul.f32 %v8228_v26, %v5408_v3 }
 0x7b5   :  { %v5417_v44 = vsub.f32 %v5398_v51, %v5416_v4  ;;  %v5874_v4 = vld [vmem:[%s8287_s13] ss:$0 sm:$0xff] }
 0x7b7   :  { %v5418_v27 = vmul.f32 %v5417_v44, %v5417_v44 }
 0x7b9   :  { %v5419_v2 = vsel %vm5401_vm4, %v5418_v27, 0.0 }
 0x7ba   :  { %v5420_v35 = vrot.slane %v5419_v2, 4 }
 0x7bc   :  { %v5421_v7 = vadd.f32 %v5420_v35, %v5419_v2 }
 0x7be   :  { %v5422_v25 = vrot.slane %v5421_v7, 2 }
 0x7c0   :  { %v5423_v54 = vadd.f32 %v5422_v25, %v5421_v7 }
 0x7c2   :  { %v5424_v55 = vrot.slane %v5423_v54, 1 }
 0x7c4   :  { %v5425_v0 = vadd.f32 %v5424_v55, %v5423_v54 }
 0x7c6   :  { %v5426_v32 = vmul.f32 %v5425_v0, %v8228_v26 }
 0x7c8   :  { %v5427_v56 = vadd.f32 1e-05, %v5426_v32 }
 0x7ca   :  { %6261 = vrsqrt.f32 %v5427_v56  ;;  %vm5434_vm7 = vweird.f32 %v5427_v56 }
 0x7d0   :  { %v6262_v17 = vpop.eup %6261 }
 0x7d1   :  { %v5429_v34 = vmul.f32 %v6262_v17, %v5427_v56  ;;  %vm5435_vm6 = vweird.f32 %v6262_v17 }
 0x7d2   :  { %vm5436_vm8 = vmor %vm5434_vm7, %vm5435_vm6 }
 0x7d3   :  { %v5430_v20 = vmul.f32 %v6262_v17, %v5429_v34 }
 0x7d5   :  { %v5431_v9 = vmul.f32 0.5, %v5430_v20 }
 0x7d7   :  { %v5432_v49 = vsub.f32 1.5, %v5431_v9 }
 0x7d9   :  { %v5433_v60 = vmul.f32 %v6262_v17, %v5432_v49 }
 0x7db   :  { %v5437_v1 = vsel %vm5436_vm8, %v6262_v17, %v5433_v60 }
 0x7dc   :  { %v5438_v57 = vmul.f32 %v5437_v1, %v5417_v44 }
 0x7de   :  { %v5442_v11 = vmul.f32 %v5869_v63, %v5438_v57 }
 0x7e0   :  { %v5446_v61 = vadd.f32 %v5870_v14, %v5442_v11 }
 0x7e2   :  { %5858 = vmatmul.msk.f32.vlgmr.msrb.gmra.mxu1 %vm5454_vm9, %v5446_v61 }
 0x85f   :  { %v5479_v19 = vpop.f32.mrf.mxu1 }
 0x860   :  { %v5480_v12 = vadd.f32 %v5871_v31, %v5479_v19 }
 0x862   :  { %v5482_v6 = vmax.f32 %v5480_v12, 0.0 }
 0x864   :  { %v5486_v58 = vsel %vm5485_vm10, %v5482_v6, 0.0 }
 0x865   :  { %v5487_v42 = vrot.slane %v5486_v58, 4 }
 0x867   :  { %v5488_v21 = vadd.f32 %v5487_v42, %v5486_v58 }
 0x869   :  { %v5489_v47 = vrot.slane %v5488_v21, 2 }
 0x86b   :  { %v5490_v53 = vadd.f32 %v5489_v47, %v5488_v21 }
 0x86d   :  { %v5491_v33 = vrot.slane %v5490_v53, 1 }
 0x86f   :  { %v5492_v24 = vadd.f32 %v5491_v33, %v5490_v53 }
 0x871   :  { %v5493_v10 = vmul.f32 %v5492_v24, %v8228_v26 }
 0x873   :  { %v5494_v45 = vsub.f32 %v5482_v6, %v5493_v10 }
 0x875   :  { %v5495_v43 = vmul.f32 %v5494_v45, %v5494_v45 }
 0x877   :  { %v5496_v38 = vsel %vm5485_vm10, %v5495_v43, 0.0 }
 0x878   :  { %v5497_v40 = vrot.slane %v5496_v38, 4 }
 0x87a   :  { %v5498_v30 = vadd.f32 %v5497_v40, %v5496_v38 }
 0x87c   :  { %v5499_v59 = vrot.slane %v5498_v30, 2 }
 0x87e   :  { %v5500_v46 = vadd.f32 %v5499_v59, %v5498_v30 }
 0x880   :  { %v5501_v37 = vrot.slane %v5500_v46, 1 }
 0x882   :  { %v5502_v52 = vadd.f32 %v5501_v37, %v5500_v46 }
 0x884   :  { %v5503_v48 = vmul.f32 %v5502_v52, %v8228_v26 }
 0x886   :  { %v5504_v50 = vadd.f32 1e-05, %v5503_v48 }
 0x888   :  { %6263 = vrsqrt.f32 %v5504_v50  ;;  %vm5511_vm13 = vweird.f32 %v5504_v50 }
 0x88e   :  { %v6264_v51 = vpop.eup %6263 }
 0x88f   :  { %v5506_v5 = vmul.f32 %v6264_v51, %v5504_v50  ;;  %vm5512_vm12 = vweird.f32 %v6264_v51 }
 0x890   :  { %vm5513_vm14 = vmor %vm5511_vm13, %vm5512_vm12 }
 0x891   :  { %v5507_v23 = vmul.f32 %v6264_v51, %v5506_v5 }
 0x893   :  { %v5508_v41 = vmul.f32 0.5, %v5507_v23 }
 0x895   :  { %v5509_v29 = vsub.f32 1.5, %v5508_v41 }
 0x897   :  { %v5510_v18 = vmul.f32 %v6264_v51, %v5509_v29 }
 0x899   :  { %v5514_v8 = vsel %vm5513_vm14, %v6264_v51, %v5510_v18 }
 0x89a   :  { %v5515_v28 = vmul.f32 %v5514_v8, %v5494_v45 }
 0x89c   :  { %v5519_v26 = vmul.f32 %v5872_v39, %v5515_v28 }
 0x89e   :  { %v5523_v3 = vadd.f32 %v5873_v13, %v5519_v26 }
 0x8a0   :  { %5860 = vmatmul.msk.f32.vlgmr.msrb.gmra.mxu2 %vm5530_vm15, %v5523_v3 }
 0x923   :  { %v5555_v44 = vpop.f32.mrf.mxu2 }
 0x924   :  { %v5556_v27 = vadd.f32 %v5874_v4, %v5555_v44 }
 0x926   :  { %v5559_v2 = vsel %vm5558_vm1, %v5556_v27, -inf }
 0x927   :  { %5560 = vmax.xlane.f32.xlu0 %v5559_v2 }
 0x99a   :  { %v5561_v35 = vpop.xlane.xlu0 %5560 }
 0x99b   :  { %v5562_v7 = vsub.f32 %v5556_v27, %v5561_v35 }
 0x99d   :  { %v5563_v15 = vmul.f32 1.442695, %v5562_v7 }
 0x99f   :  { %6265 = vpow2.f32 %v5563_v15 }
 0x9a5   :  { %v6266_v25 = vpop.eup %6265 }
 0x9a6   :  { %v5565_v62 = vsel %vm5558_vm1, %v6266_v25, 0.0 }
 0x9a7   :  { %5566 = vadd.xlane.f32.xlu0 %v5565_v62 }
 0xa1a   :  { %v5567_v54 = vpop.xlane.xlu0 %5566 }
 0xa1b   :  { %6267 = vrcp.f32 %v5567_v54  ;;  %v5579_v32 = vand.u32 2147483648, %v5567_v54  ;;  %v5577_v17 = vand.u32 2147483647, %v5567_v54  ;;  %vm5573_vm3 = vweird.f32 %v5567_v54 }
 0xa1d   :  { %v5580_v20 = vor.u32 1.1754944e-38, %v5579_v32  ;;  %vm5578_vm0 = vcmp.eq.f32.partialorder %v5577_v17, 8.507059e+37 }
 0xa21   :  { %v6268_v16 = vpop.eup %6267 }
 0xa22   :  { %v5569_v55 = vmul.f32 %v6268_v16, %v5567_v54  ;;  %vm5574_vm2 = vweird.f32 %v6268_v16 }
 0xa23   :  { %vm5575_vm4 = vmor %vm5573_vm3, %vm5574_vm2 }
 0xa24   :  { %v5570_v0 = vsub.f32 1.0, %v5569_v55 }
 0xa26   :  { %v5571_v56 = vmul.f32 %v6268_v16, %v5570_v0 }
 0xa28   :  { %v5572_v34 = vadd.f32 %v6268_v16, %v5571_v56 }
 0xa2a   :  { %v5576_v9 = vsel %vm5575_vm4, %v6268_v16, %v5572_v34 }
 0xa2b   :  { %v5581_v49 = vsel %vm5578_vm0, %v5580_v20, %v5576_v9 }
 0xa2c   :  { %v5582_v60 = vmul.f32 %v6266_v25, %v5581_v49 }
 0xa2e   :  { %5583 = vst.msk [vmem:[#allocation8] sm:$0x3] %vm5558_vm1, %v5582_v60 }
 0xa2f   :  { %5594 = dma.vmem_to_hbm [thread:$0]  %s5590_s11, 32, %s5592_s27, [#allocation5]  }
 0xa30   :  { %6449 = dma.done.wait [#allocation5], 32  }
 0xa31   :  { %6450 = vsyncadd [#allocation5], 4294967264 }
 0xa32   :  { %5599 = vsyncpa [#allocation4], 1 }
 0xa33   :  { %5600 = vsyncpa [#allocation7], 1 }
 0xa34   :  { %5601 = vsyncpa [#allocation5], 1 }

</bundles_post_ra>
